<compile_context>
chip_gen: v7x
topology: tpu7x:2x2x1
jax: 0.10.0
libtpu: 0.0.40
codegen_flags: <defaults>
</compile_context>

<pallas_src>
import math
import functools

import jax
import jax.numpy as jnp
from jax.experimental import pallas as pl
from jax.experimental.pallas import tpu as pltpu

# ----------------------------- config (small synthetic ViT) ------------------
IMG = 16          # image spatial size
PATCH = 4         # patch size
CH = 3            # input channels
EMBED = 32        # true embed dim D
HEADS = 4         # attention heads
HEAD_DIM = EMBED // HEADS
DEPTH = 2         # transformer blocks
MLP_HIDDEN = 64   # SwiGLU hidden dim (fc1 packs 2 * MLP_HIDDEN)
REG = 4           # register tokens (Virchow2: output[:, 5:] are patch tokens)
N_PATCH = (IMG // PATCH) ** 2
PREFIX = 1 + REG                     # cls + registers = 5
TOKENS = PREFIX + N_PATCH            # 21
EPS = 1e-6

# lane-dense padded dims (last dim of every activation / weight tile = 128)
DP = 128                             # padded embed dim
GPAD = 128                           # padded q/k/v group width (H*Dh = 32 -> 128)
HDP = 128                            # padded MLP hidden dim
KP = 128                             # padded patch-embed contraction dim (48 -> 128)
T_PAD = -(-TOKENS // 8) * 8          # tokens padded to a sublane multiple (24)

# precision switches (review: make bf16 MXU inputs / approx reciprocal switchable)
MXU_DTYPE = jnp.bfloat16             # set jnp.float32 for tighter reference parity
APPROX_SOFTMAX_RECIP = True          # set False for an exact softmax divide


# ----------------------------- fused Pallas kernel ---------------------------
def _virchow2_kernel(
    patches_ref, pw_ref, base_ref, hmask_ref,
    ln1g_ref, ln1b_ref, wqkv_ref, bqkv_ref, wo_ref, bo_ref,
    ln2g_ref, ln2b_ref, w1_ref, b1_ref, w2_ref, b2_ref,
    ng_ref, nb_ref,
    o_ref,
    *, d_model, n_heads, head_dim, n_tok,
):
    B, TP, DPl = o_ref.shape
    BT = B * TP
    H = n_heads
    depth = ln1g_ref.shape[0]
    GP = wqkv_ref.shape[2] // 3          # padded per-group width (128)
    HDPl = w2_ref.shape[1]               # padded MLP hidden (128)
    inv_d = 1.0 / d_model
    scale = 1.0 / math.sqrt(head_dim)

    # masks: valid embed lanes (LN stats) and valid key tokens (softmax)
    lane = jax.lax.broadcasted_iota(jnp.int32, (1, 1, DPl), 2)
    lane_valid = lane < d_model
    key = jax.lax.broadcasted_iota(jnp.int32, (1, 1, TP), 2)
    key_valid = key < n_tok
    hm = hmask_ref[...]                  # [1, H, 1, GP] per-head lane mask (f32)

    def layernorm(v, g, b):
        # v: [B, TP, DP]; lanes >= d_model are zero by construction,
        # statistics use the true dim d_model (matches PyTorch LayerNorm).
        mu = jnp.sum(v, axis=-1, keepdims=True) * inv_d
        diff = jnp.where(lane_valid, v - mu, 0.0)
        var = jnp.sum(diff * diff, axis=-1, keepdims=True) * inv_d
        return diff * jax.lax.rsqrt(var + EPS) * g + b   # g, b zero-padded -> pad lanes stay 0

    # ---- patch embed; cls/reg tokens, pos embed and patch bias pre-baked in `base`
    pe = jnp.dot(patches_ref[...].reshape(BT, -1), pw_ref[...],
                 preferred_element_type=jnp.float32)               # [BT, DP]
    x = pe.reshape(B, TP, DPl) + base_ref[...]                     # [B, TP, DP] f32

    # ---- transformer blocks (static unroll over depth) ----------------------
    for d in range(depth):
        # -- multi-head self-attention (heads batched into the einsum batch dim)
        xn = layernorm(x, ln1g_ref[d], ln1b_ref[d])
        xb = xn.reshape(BT, DPl).astype(MXU_DTYPE)
        qkv = jnp.dot(xb, wqkv_ref[d],
                      preferred_element_type=jnp.float32) + bqkv_ref[d]   # [BT, 3*GP]
        q = (qkv[:, 0:GP] * scale).reshape(B, 1, TP, GP)           # fold 1/sqrt(Dh) into q
        k = qkv[:, GP:2 * GP].reshape(B, 1, TP, GP)
        v = qkv[:, 2 * GP:3 * GP].reshape(B, 1, TP, GP)
        # per-head lane mask makes each 128-lane contraction exactly one head
        q4 = (q * hm).reshape(B * H, TP, GP).astype(MXU_DTYPE)
        k4 = (k * hm).reshape(B * H, TP, GP).astype(MXU_DTYPE)
        v4 = (v * hm).reshape(B * H, TP, GP).astype(MXU_DTYPE)
        s = jnp.einsum('ntd,nsd->nts', q4, k4,
                       preferred_element_type=jnp.float32)         # [B*H, TP, TP]
        s = jnp.where(key_valid, s, -1e30)                         # mask padded key tokens
        s = s - jnp.max(s, axis=-1, keepdims=True)
        p = jnp.exp(s)
        denom = jnp.sum(p, axis=-1, keepdims=True)
        if APPROX_SOFTMAX_RECIP:
            p = p * pl.reciprocal(denom, approx=True)
        else:
            p = p / denom
        oh = jnp.einsum('nts,nsd->ntd', p.astype(MXU_DTYPE), v4,
                        preferred_element_type=jnp.float32)        # [B*H, TP, GP]
        # heads occupy disjoint lanes of GP -> merging heads is a plain add
        oh4 = oh.reshape(B, H, TP, GP)
        o_c = oh4[:, 0]
        for hh in range(1, H):
            o_c = o_c + oh4[:, hh]
        proj = jnp.dot(o_c.reshape(BT, GP).astype(MXU_DTYPE), wo_ref[d],
                       preferred_element_type=jnp.float32) + bo_ref[d]
        x = x + proj.reshape(B, TP, DPl)

        # -- SwiGLU-packed MLP: one fused fc1 (gate | value), SiLU(g) * u --
        xn = layernorm(x, ln2g_ref[d], ln2b_ref[d])
        xb = xn.reshape(BT, DPl).astype(MXU_DTYPE)
        h12 = jnp.dot(xb, w1_ref[d], preferred_element_type=jnp.float32) + b1_ref[d]
        g = h12[:, :HDPl]
        u = h12[:, HDPl:]
        act = (g * jax.nn.sigmoid(g)) * u                          # [BT, HDP] f32
        y = jnp.dot(act.astype(MXU_DTYPE), w2_ref[d],
                    preferred_element_type=jnp.float32) + b2_ref[d]
        x = x + y.reshape(B, TP, DPl)

    # ---- final LayerNorm (single store of the output) ------------------------
    o_ref[...] = layernorm(x, ng_ref[...], nb_ref[...])


# ----------------------------- weight preparation (done ONCE) ----------------
def prepare_weights(params):
    """Pad / pack / cast all weights once (hoisted out of the per-call path)."""
    D, H, Dh, Hd = EMBED, HEADS, HEAD_DIM, MLP_HIDDEN

    patch_w = jnp.pad(params["patch_w"],
                      ((0, KP - params["patch_w"].shape[0]),
                       (0, DP - D))).astype(MXU_DTYPE)                         # [KP, DP]

    # base token tensor: rows 0..4 = cls/reg + pos, rows 5..20 = patch bias + pos,
    # rows 21..23 (padding) = 0.  timm default (no_embed_class=False): pos_embed
    # spans cls + registers + patches and is added after concatenation.
    cls_reg = jnp.concatenate([params["cls_token"], params["reg_tokens"]], axis=1)
    prefix = cls_reg + params["pos_embed"][:, :PREFIX]                         # [1, 5, D]
    patch_rows = params["patch_b"][:, None, :] + params["pos_embed"][:, PREFIX:]
    base = jnp.concatenate(
        [prefix, patch_rows, jnp.zeros((1, T_PAD - TOKENS, D), jnp.float32)], axis=1)
    base = jnp.pad(base, ((0, 0), (0, 0), (0, DP - D)))                        # [1, 24, DP]

    # per-head lane mask: head h owns lanes [h*Dh, (h+1)*Dh) of the padded group
    lane = jnp.arange(GPAD)[None, None, None, :]
    head = jnp.arange(H)[None, :, None, None]
    head_mask = ((lane >= head * Dh) & (lane < (head + 1) * Dh)).astype(jnp.float32)

    def pad_vec(v, cols):                  # [1, c] -> [1, cols]
        return jnp.pad(v, ((0, 0), (0, cols - v.shape[1])))

    def per_block(blk):
        wqkv = blk["wqkv"]                                            # [D, 3D]  (q | k | v)
        wq = jnp.pad(wqkv[:, :D],      ((0, DP - D), (0, GPAD - D)))
        wk = jnp.pad(wqkv[:, D:2 * D], ((0, DP - D), (0, GPAD - D)))
        wv = jnp.pad(wqkv[:, 2 * D:],  ((0, DP - D), (0, GPAD - D)))
        wqkv_p = jnp.concatenate([wq, wk, wv], axis=1).astype(MXU_DTYPE)   # [DP, 3*GPAD]
        bqkv = blk["bqkv"]
        bqkv_p = jnp.concatenate([pad_vec(bqkv[:, :D], GPAD),
                                  pad_vec(bqkv[:, D:2 * D], GPAD),
                                  pad_vec(bqkv[:, 2 * D:], GPAD)], axis=1)  # [1, 3*GPAD]

        wo_p = jnp.pad(blk["wo"], ((0, GPAD - D), (0, DP - D))).astype(MXU_DTYPE)
        bo_p = pad_vec(blk["bo"], DP)

        w1 = blk["w1"]                                                # [D, 2*Hd] (gate|value)
        w1_p = jnp.concatenate(
            [jnp.pad(w1[:, :Hd], ((0, DP - D), (0, HDP - Hd))),
             jnp.pad(w1[:, Hd:], ((0, DP - D), (0, HDP - Hd)))], axis=1).astype(MXU_DTYPE)
        b1_p = jnp.concatenate([pad_vec(blk["b1"][:, :Hd], HDP),
                                pad_vec(blk["b1"][:, Hd:], HDP)], axis=1)
        w2_p = jnp.pad(blk["w2"], ((0, HDP - Hd), (0, DP - D))).astype(MXU_DTYPE)
        b2_p = pad_vec(blk["b2"], DP)

        # zero-padded gamma/beta keep lanes >= D identically zero after LN
        return (pad_vec(blk["ln1_g"], DP), pad_vec(blk["ln1_b"], DP),
                wqkv_p, bqkv_p, wo_p, bo_p,
                pad_vec(blk["ln2_g"], DP), pad_vec(blk["ln2_b"], DP),
                w1_p, b1_p, w2_p, b2_p)

    per = [per_block(b) for b in params["blocks"]]
    stacked = [jnp.stack(ts, axis=0) for ts in zip(*per)]             # each: [DEPTH, ...]

    norm_g = pad_vec(params["norm_g"], DP)
    norm_b = pad_vec(params["norm_b"], DP)

    weights = tuple([patch_w, base, head_mask] + stacked + [norm_g, norm_b])
    return jax.device_put(weights)


# ----------------------------- parameter init --------------------------------
def init_params(key):
    def nrm(k, shape, scale=0.02):
        return scale * jax.random.normal(k, shape, dtype=jnp.float32)

    keys = iter(jax.random.split(key, 8 + DEPTH * 8))
    params = {
        "patch_w": nrm(next(keys), (CH * PATCH * PATCH, EMBED)),   # conv weight, (C,P,P) flattened
        "patch_b": jnp.zeros((1, EMBED), jnp.float32),
        "cls_token": nrm(next(keys), (1, 1, EMBED)),
        "reg_tokens": nrm(next(keys), (1, REG, EMBED)),
        "pos_embed": nrm(next(keys), (1, TOKENS, EMBED)),
        "norm_g": jnp.ones((1, EMBED), jnp.float32),
        "norm_b": jnp.zeros((1, EMBED), jnp.float32),
        "blocks": [],
    }
    for _ in range(DEPTH):
        blk = {
            "ln1_g": jnp.ones((1, EMBED), jnp.float32),
            "ln1_b": jnp.zeros((1, EMBED), jnp.float32),
            "wqkv": nrm(next(keys), (EMBED, 3 * EMBED)),
            "bqkv": jnp.zeros((1, 3 * EMBED), jnp.float32),
            "wo": nrm(next(keys), (EMBED, EMBED)),
            "bo": jnp.zeros((1, EMBED), jnp.float32),
            "ln2_g": jnp.ones((1, EMBED), jnp.float32),
            "ln2_b": jnp.zeros((1, EMBED), jnp.float32),
            "w1": nrm(next(keys), (EMBED, 2 * MLP_HIDDEN)),
            "b1": jnp.zeros((1, 2 * MLP_HIDDEN), jnp.float32),
            "w2": nrm(next(keys), (MLP_HIDDEN, EMBED)),
            "b2": jnp.zeros((1, EMBED), jnp.float32),
        }
        params["blocks"].append(blk)
    return params


# ----------------------------- forward ---------------------------------------
def _batch_grid_for_device(batch):
    """Parallel batch grid only where it helps (v7x: 2 TensorCores/chip)."""
    try:
        kind = jax.devices()[0].device_kind.lower()
    except Exception:
        return 1
    if batch % 2 == 0 and any(t in kind for t in ("v7", "tpu7")):
        return 2
    return 1


@functools.partial(jax.jit, static_argnames=("only_cls_token", "batch_grid"))
def virchow2_forward(x, weights, only_cls_token=True, batch_grid=1):
    # x: NCHW [B, C, H, W]
    B = x.shape[0]
    nH, nW = x.shape[2] // PATCH, x.shape[3] // PATCH
    pp = CH * PATCH * PATCH
    # patchify: per-patch flatten in (C, P, P) order (matches Conv2d weight layout)
    patches = x.reshape(B, CH, nH, PATCH, nW, PATCH)
    patches = patches.transpose(0, 2, 4, 1, 3, 5).reshape(B, nH * nW, pp)
    # place patch rows at token positions 5..20; prefix / pad rows stay zero so the
    # single in-kernel patch matmul covers all 24 rows and `base` supplies the rest
    full = jnp.concatenate(
        [jnp.zeros((B, PREFIX, pp), x.dtype), patches,
         jnp.zeros((B, T_PAD - TOKENS, pp), x.dtype)], axis=1)       # [B, 24, 48]
    full = jnp.pad(full, ((0, 0), (0, 0), (0, KP - pp))).astype(MXU_DTYPE)

    bg = batch_grid if (batch_grid > 0 and B % batch_grid == 0) else 1
    Bb = B // bg

    def const_spec(a):
        nd = a.ndim
        return pl.BlockSpec(a.shape, lambda b, _n=nd: (0,) * _n)

    in_specs = ([pl.BlockSpec((Bb, T_PAD, KP), lambda b: (b, 0, 0))]
                + [const_spec(w) for w in weights])
    out_specs = pl.BlockSpec((Bb, T_PAD, DP), lambda b: (b, 0, 0))

    out = pl.pallas_call(
        functools.partial(_virchow2_kernel, d_model=EMBED, n_heads=HEADS,
                          head_dim=HEAD_DIM, n_tok=TOKENS),
        out_shape=jax.ShapeDtypeStruct((B, T_PAD, DP), jnp.float32),
        grid=(bg,),
        in_specs=in_specs,
        out_specs=out_specs,
        compiler_params=pltpu.CompilerParams(dimension_semantics=("parallel",)),
    )(full, *weights)

    tokens = out[:, :TOKENS, :EMBED]                                 # drop padding
    class_token = tokens[:, 0]                                       # [B, D]
    if only_cls_token:
        return class_token
    patch_tokens = tokens[:, PREFIX:]                                # skip cls + 4 registers
    return jnp.concatenate([class_token, patch_tokens.mean(axis=1)], axis=-1)


# ----------------------------- pure-JAX reference ----------------------------
def _reference_forward(x, params, only_cls_token):
    B = x.shape[0]
    nH, nW = x.shape[2] // PATCH, x.shape[3] // PATCH
    patches = x.reshape(B, CH, nH, PATCH, nW, PATCH).transpose(0, 2, 4, 1, 3, 5)
    patches = patches.reshape(B, N_PATCH, CH * PATCH * PATCH)
    pe = patches @ params["patch_w"] + params["patch_b"]
    cls = jnp.broadcast_to(params["cls_token"], (B, 1, EMBED))
    reg = jnp.broadcast_to(params["reg_tokens"], (B, REG, EMBED))
    xx = jnp.concatenate([cls, reg, pe], axis=1) + params["pos_embed"]

    def ln(v, g, b):
        mu = v.mean(-1, keepdims=True)
        var = ((v - mu) ** 2).mean(-1, keepdims=True)
        return (v - mu) * jax.lax.rsqrt(var + EPS) * g + b

    for blk in params["blocks"]:
        xn = ln(xx, blk["ln1_g"], blk["ln1_b"])
        qkv = xn @ blk["wqkv"] + blk["bqkv"]
        q, k, v = jnp.split(qkv, 3, axis=-1)

        def heads(t):
            return t.reshape(B, TOKENS, HEADS, HEAD_DIM).transpose(0, 2, 1, 3)

        qh, kh, vh = heads(q), heads(k), heads(v)
        s = jnp.einsum('bhtd,bhsd->bhts', qh, kh) / math.sqrt(HEAD_DIM)
        p = jax.nn.softmax(s, axis=-1)
        o = jnp.einsum('bhts,bhsd->bhtd', p, vh).transpose(0, 2, 1, 3).reshape(B, TOKENS, EMBED)
        xx = xx + o @ blk["wo"] + blk["bo"]

        xn = ln(xx, blk["ln2_g"], blk["ln2_b"])
        h12 = xn @ blk["w1"] + blk["b1"]
        g_, u_ = h12[..., :MLP_HIDDEN], h12[..., MLP_HIDDEN:]
        xx = xx + (jax.nn.silu(g_) * u_) @ blk["w2"] + blk["b2"]

    xx = ln(xx, params["norm_g"], params["norm_b"])
    cls_t = xx[:, 0]
    if only_cls_token:
        return cls_t
    return jnp.concatenate([cls_t, xx[:, PREFIX:].mean(1)], axis=-1)


# ----------------------------- main ------------------------------------------
if __name__ == "__main__":
    key = jax.random.PRNGKey(0)
    kp, kx = jax.random.split(key)
    params = init_params(kp)
    weights = prepare_weights(params)        # padding / packing / casting done ONCE

    # NOTE: kernel is batch-agnostic; on v6e/v7x throughput keeps improving until
    # B*T_PAD >= 256 rows (B >= 11) fills the 256-row MXU.  Small B kept for the demo.
    x = jax.random.normal(kx, (2, CH, IMG, IMG), dtype=jnp.float32)   # NCHW

    bg = _batch_grid_for_device(x.shape[0])
    cls_out = virchow2_forward(x, weights, only_cls_token=True, batch_grid=bg)    # [2, 32]
    emb_out = virchow2_forward(x, weights, only_cls_token=False, batch_grid=bg)   # [2, 64]
    jax.block_until_ready((cls_out, emb_out))

    assert cls_out.shape == (2, EMBED)
    assert emb_out.shape == (2, 2 * EMBED)
    assert bool(jnp.all(jnp.isfinite(cls_out))) and bool(jnp.all(jnp.isfinite(emb_out)))

    # loose parity vs. pure-JAX f32 reference (bf16 MXU inputs + approx reciprocal
    # give ~1e-2 absolute error; a real packing/masking bug would be O(1))
    ref_cls = _reference_forward(x, params, True)
    ref_emb = _reference_forward(x, params, False)
    assert float(jnp.max(jnp.abs(cls_out - ref_cls))) < 0.2
    assert float(jnp.max(jnp.abs(emb_out - ref_emb))) < 0.2

    print("KERNEL_OK")
</pallas_src>

<mosaic_0001>
module attributes {stable_mosaic.version = 11 : i64} {
  func.func @_virchow2_kernel(%arg0: i32, %arg1: memref<2x24x128xbf16, #tpu.memory_space<vmem>>, %arg2: memref<128x128xbf16, #tpu.memory_space<vmem>>, %arg3: memref<1x24x128xf32, #tpu.memory_space<vmem>>, %arg4: memref<1x4x1x128xf32, #tpu.memory_space<vmem>>, %arg5: memref<2x1x128xf32, #tpu.memory_space<vmem>>, %arg6: memref<2x1x128xf32, #tpu.memory_space<vmem>>, %arg7: memref<2x128x384xbf16, #tpu.memory_space<vmem>>, %arg8: memref<2x1x384xf32, #tpu.memory_space<vmem>>, %arg9: memref<2x128x128xbf16, #tpu.memory_space<vmem>>, %arg10: memref<2x1x128xf32, #tpu.memory_space<vmem>>, %arg11: memref<2x1x128xf32, #tpu.memory_space<vmem>>, %arg12: memref<2x1x128xf32, #tpu.memory_space<vmem>>, %arg13: memref<2x128x256xbf16, #tpu.memory_space<vmem>>, %arg14: memref<2x1x256xf32, #tpu.memory_space<vmem>>, %arg15: memref<2x128x128xbf16, #tpu.memory_space<vmem>>, %arg16: memref<2x1x128xf32, #tpu.memory_space<vmem>>, %arg17: memref<1x128xf32, #tpu.memory_space<vmem>>, %arg18: memref<1x128xf32, #tpu.memory_space<vmem>>, %arg19: memref<2x24x128xf32, #tpu.memory_space<vmem>>) attributes {dimension_semantics = [#tpu.dimension_semantics<parallel>], iteration_bounds = array<i64: 1>, scalar_prefetch = 0 : i64, scratch_operands = 0 : i64, tpu.core_type = #tpu.core_type<tc>, window_params = [{transform_indices = @transform_0, window_bounds = array<i64: 2, 24, 128>}, {pipeline_mode = #tpu.pipeline_mode<synchronous>, transform_indices = @transform_1, window_bounds = array<i64: 128, 128>}, {pipeline_mode = #tpu.pipeline_mode<synchronous>, transform_indices = @transform_2, window_bounds = array<i64: 1, 24, 128>}, {pipeline_mode = #tpu.pipeline_mode<synchronous>, transform_indices = @transform_3, window_bounds = array<i64: 1, 4, 1, 128>}, {pipeline_mode = #tpu.pipeline_mode<synchronous>, transform_indices = @transform_4, window_bounds = array<i64: 2, 1, 128>}, {pipeline_mode = #tpu.pipeline_mode<synchronous>, transform_indices = @transform_5, window_bounds = array<i64: 2, 1, 128>}, {pipeline_mode = #tpu.pipeline_mode<synchronous>, transform_indices = @transform_6, window_bounds = array<i64: 2, 128, 384>}, {pipeline_mode = #tpu.pipeline_mode<synchronous>, transform_indices = @transform_7, window_bounds = array<i64: 2, 1, 384>}, {pipeline_mode = #tpu.pipeline_mode<synchronous>, transform_indices = @transform_8, window_bounds = array<i64: 2, 128, 128>}, {pipeline_mode = #tpu.pipeline_mode<synchronous>, transform_indices = @transform_9, window_bounds = array<i64: 2, 1, 128>}, {pipeline_mode = #tpu.pipeline_mode<synchronous>, transform_indices = @transform_10, window_bounds = array<i64: 2, 1, 128>}, {pipeline_mode = #tpu.pipeline_mode<synchronous>, transform_indices = @transform_11, window_bounds = array<i64: 2, 1, 128>}, {pipeline_mode = #tpu.pipeline_mode<synchronous>, transform_indices = @transform_12, window_bounds = array<i64: 2, 128, 256>}, {pipeline_mode = #tpu.pipeline_mode<synchronous>, transform_indices = @transform_13, window_bounds = array<i64: 2, 1, 256>}, {pipeline_mode = #tpu.pipeline_mode<synchronous>, transform_indices = @transform_14, window_bounds = array<i64: 2, 128, 128>}, {pipeline_mode = #tpu.pipeline_mode<synchronous>, transform_indices = @transform_15, window_bounds = array<i64: 2, 1, 128>}, {pipeline_mode = #tpu.pipeline_mode<synchronous>, transform_indices = @transform_16, window_bounds = array<i64: 1, 128>}, {pipeline_mode = #tpu.pipeline_mode<synchronous>, transform_indices = @transform_17, window_bounds = array<i64: 1, 128>}, {transform_indices = @transform_18, window_bounds = array<i64: 2, 24, 128>}]} {
    %0 = tpu.iota {dimensions = array<i32: 2>} : vector<1x1x128xi32>
    %c32_i32 = arith.constant 32 : i32
    %1 = vector.broadcast %c32_i32 : i32 to vector<1x1x128xi32>
    %2 = arith.cmpi slt, %0, %1 : vector<1x1x128xi32>
    %3 = tpu.iota {dimensions = array<i32: 2>} : vector<1x1x24xi32>
    %c21_i32 = arith.constant 21 : i32
    %4 = vector.broadcast %c21_i32 : i32 to vector<1x1x24xi32>
    %5 = arith.cmpi slt, %3, %4 : vector<1x1x24xi32>
    %c0 = arith.constant 0 : index
    %c0_0 = arith.constant 0 : index
    %c0_1 = arith.constant 0 : index
    %c0_2 = arith.constant 0 : index
    %6 = vector.load %arg4[%c0, %c0_0, %c0_1, %c0_2] : memref<1x4x1x128xf32, #tpu.memory_space<vmem>>, vector<1x4x1x128xf32>
    %c0_3 = arith.constant 0 : index
    %c0_4 = arith.constant 0 : index
    %c0_5 = arith.constant 0 : index
    %7 = vector.load %arg1[%c0_3, %c0_4, %c0_5] : memref<2x24x128xbf16, #tpu.memory_space<vmem>>, vector<2x24x128xbf16>
    %8 = vector.shape_cast %7 : vector<2x24x128xbf16> to vector<48x128xbf16>
    %c0_6 = arith.constant 0 : index
    %c0_7 = arith.constant 0 : index
    %9 = vector.load %arg2[%c0_6, %c0_7] : memref<128x128xbf16, #tpu.memory_space<vmem>>, vector<128x128xbf16>
    %cst = arith.constant dense<0.000000e+00> : vector<48x128xf32>
    %10 = tpu.matmul %8, %9, %cst {dimension_numbers = #tpu.dot_dimension_numbers<[1], [0], [0], [1], [0, 0, 1, 1], [], []>} : vector<48x128xbf16>, vector<128x128xbf16>, vector<48x128xf32> -> vector<48x128xf32>
    %11 = vector.shape_cast %10 : vector<48x128xf32> to vector<2x24x128xf32>
    %c0_8 = arith.constant 0 : index
    %c0_9 = arith.constant 0 : index
    %c0_10 = arith.constant 0 : index
    %12 = vector.load %arg3[%c0_8, %c0_9, %c0_10] : memref<1x24x128xf32, #tpu.memory_space<vmem>>, vector<1x24x128xf32>
    %13 = vector.broadcast %12 : vector<1x24x128xf32> to vector<2x24x128xf32>
    %14 = arith.addf %11, %13 : vector<2x24x128xf32>
    %c0_11 = arith.constant 0 : index
    %c0_12 = arith.constant 0 : index
    %c0_13 = arith.constant 0 : index
    %15 = vector.load %arg5[%c0_11, %c0_12, %c0_13] : memref<2x1x128xf32, #tpu.memory_space<vmem>>, vector<1x1x128xf32>
    %16 = vector.shape_cast %15 : vector<1x1x128xf32> to vector<1x128xf32>
    %c0_14 = arith.constant 0 : index
    %c0_15 = arith.constant 0 : index
    %c0_16 = arith.constant 0 : index
    %17 = vector.load %arg6[%c0_14, %c0_15, %c0_16] : memref<2x1x128xf32, #tpu.memory_space<vmem>>, vector<1x1x128xf32>
    %18 = vector.shape_cast %17 : vector<1x1x128xf32> to vector<1x128xf32>
    %cst_17 = arith.constant dense<0.000000e+00> : vector<2x24xf32>
    %19 = vector.multi_reduction <add>, %14, %cst_17 [2] : vector<2x24x128xf32> to vector<2x24xf32>
    %20 = vector.shape_cast %19 : vector<2x24xf32> to vector<2x24x1xf32>
    %cst_18 = arith.constant 3.125000e-02 : f32
    %21 = vector.broadcast %cst_18 : f32 to vector<2x24x1xf32>
    %22 = arith.mulf %20, %21 : vector<2x24x1xf32>
    %23 = vector.broadcast %22 : vector<2x24x1xf32> to vector<2x24x128xf32>
    %24 = arith.subf %14, %23 : vector<2x24x128xf32>
    %cst_19 = arith.constant 0.000000e+00 : f32
    %25 = vector.shape_cast %2 : vector<1x1x128xi1> to vector<1x1x128xi1>
    %26 = vector.broadcast %25 : vector<1x1x128xi1> to vector<2x24x128xi1>
    %27 = vector.broadcast %cst_19 : f32 to vector<2x24x128xf32>
    %28 = arith.select %26, %24, %27 : vector<2x24x128xi1>, vector<2x24x128xf32>
    %29 = arith.mulf %28, %28 : vector<2x24x128xf32>
    %cst_20 = arith.constant dense<0.000000e+00> : vector<2x24xf32>
    %30 = vector.multi_reduction <add>, %29, %cst_20 [2] : vector<2x24x128xf32> to vector<2x24xf32>
    %31 = vector.shape_cast %30 : vector<2x24xf32> to vector<2x24x1xf32>
    %cst_21 = arith.constant 3.125000e-02 : f32
    %32 = vector.broadcast %cst_21 : f32 to vector<2x24x1xf32>
    %33 = arith.mulf %31, %32 : vector<2x24x1xf32>
    %cst_22 = arith.constant 9.99999997E-7 : f32
    %34 = vector.broadcast %cst_22 : f32 to vector<2x24x1xf32>
    %35 = arith.addf %33, %34 : vector<2x24x1xf32>
    %36 = math.rsqrt %35 : vector<2x24x1xf32>
    %37 = vector.broadcast %36 : vector<2x24x1xf32> to vector<2x24x128xf32>
    %38 = arith.mulf %28, %37 : vector<2x24x128xf32>
    %39 = vector.shape_cast %16 : vector<1x128xf32> to vector<1x1x128xf32>
    %40 = vector.broadcast %39 : vector<1x1x128xf32> to vector<2x24x128xf32>
    %41 = arith.mulf %38, %40 : vector<2x24x128xf32>
    %42 = vector.shape_cast %18 : vector<1x128xf32> to vector<1x1x128xf32>
    %43 = vector.broadcast %42 : vector<1x1x128xf32> to vector<2x24x128xf32>
    %44 = arith.addf %41, %43 : vector<2x24x128xf32>
    %45 = vector.shape_cast %44 : vector<2x24x128xf32> to vector<48x128xf32>
    %46 = arith.truncf %45 : vector<48x128xf32> to vector<48x128xbf16>
    %c0_23 = arith.constant 0 : index
    %c0_24 = arith.constant 0 : index
    %c0_25 = arith.constant 0 : index
    %47 = vector.load %arg7[%c0_23, %c0_24, %c0_25] : memref<2x128x384xbf16, #tpu.memory_space<vmem>>, vector<1x128x384xbf16>
    %48 = vector.shape_cast %47 : vector<1x128x384xbf16> to vector<128x384xbf16>
    %cst_26 = arith.constant dense<0.000000e+00> : vector<48x384xf32>
    %49 = tpu.matmul %46, %48, %cst_26 {dimension_numbers = #tpu.dot_dimension_numbers<[1], [0], [0], [1], [0, 0, 1, 1], [], []>} : vector<48x128xbf16>, vector<128x384xbf16>, vector<48x384xf32> -> vector<48x384xf32>
    %c0_27 = arith.constant 0 : index
    %c0_28 = arith.constant 0 : index
    %c0_29 = arith.constant 0 : index
    %50 = vector.load %arg8[%c0_27, %c0_28, %c0_29] : memref<2x1x384xf32, #tpu.memory_space<vmem>>, vector<1x1x384xf32>
    %51 = vector.shape_cast %50 : vector<1x1x384xf32> to vector<1x384xf32>
    %52 = vector.broadcast %51 : vector<1x384xf32> to vector<48x384xf32>
    %53 = arith.addf %49, %52 : vector<48x384xf32>
    %54 = vector.extract_strided_slice %53 {offsets = [0, 0], sizes = [48, 128], strides = [1, 1]} : vector<48x384xf32> to vector<48x128xf32>
    %cst_30 = arith.constant 0.353553385 : f32
    %55 = vector.broadcast %cst_30 : f32 to vector<48x128xf32>
    %56 = arith.mulf %54, %55 : vector<48x128xf32>
    %57 = vector.shape_cast %56 : vector<48x128xf32> to vector<2x1x24x128xf32>
    %58 = vector.extract_strided_slice %53 {offsets = [0, 128], sizes = [48, 128], strides = [1, 1]} : vector<48x384xf32> to vector<48x128xf32>
    %59 = vector.shape_cast %58 : vector<48x128xf32> to vector<2x1x24x128xf32>
    %60 = vector.extract_strided_slice %53 {offsets = [0, 256], sizes = [48, 128], strides = [1, 1]} : vector<48x384xf32> to vector<48x128xf32>
    %61 = vector.shape_cast %60 : vector<48x128xf32> to vector<2x1x24x128xf32>
    %62 = vector.broadcast %57 : vector<2x1x24x128xf32> to vector<2x4x24x128xf32>
    %63 = vector.broadcast %6 : vector<1x4x1x128xf32> to vector<2x4x24x128xf32>
    %64 = arith.mulf %62, %63 : vector<2x4x24x128xf32>
    %65 = vector.shape_cast %64 : vector<2x4x24x128xf32> to vector<8x24x128xf32>
    %66 = arith.truncf %65 : vector<8x24x128xf32> to vector<8x24x128xbf16>
    %67 = vector.broadcast %59 : vector<2x1x24x128xf32> to vector<2x4x24x128xf32>
    %68 = vector.broadcast %6 : vector<1x4x1x128xf32> to vector<2x4x24x128xf32>
    %69 = arith.mulf %67, %68 : vector<2x4x24x128xf32>
    %70 = vector.shape_cast %69 : vector<2x4x24x128xf32> to vector<8x24x128xf32>
    %71 = arith.truncf %70 : vector<8x24x128xf32> to vector<8x24x128xbf16>
    %72 = vector.broadcast %61 : vector<2x1x24x128xf32> to vector<2x4x24x128xf32>
    %73 = vector.broadcast %6 : vector<1x4x1x128xf32> to vector<2x4x24x128xf32>
    %74 = arith.mulf %72, %73 : vector<2x4x24x128xf32>
    %75 = vector.shape_cast %74 : vector<2x4x24x128xf32> to vector<8x24x128xf32>
    %76 = arith.truncf %75 : vector<8x24x128xf32> to vector<8x24x128xbf16>
    "tpu.trace_start"() <{level = 10 : i32, message = "ntd,nsd->nts"}> : () -> ()
    %cst_31 = arith.constant dense<0.000000e+00> : vector<8x24x24xf32>
    %77 = tpu.matmul %66, %71, %cst_31 {dimension_numbers = #tpu.dot_dimension_numbers<[2], [2], [1], [1], [0, 0, 0, 1, 1, 1], [0], [0]>} : vector<8x24x128xbf16>, vector<8x24x128xbf16>, vector<8x24x24xf32> -> vector<8x24x24xf32>
    %cst_32 = arith.constant -1.000000e+30 : f32
    "tpu.trace_stop"() : () -> ()
    %78 = vector.shape_cast %5 : vector<1x1x24xi1> to vector<1x1x24xi1>
    %79 = vector.broadcast %78 : vector<1x1x24xi1> to vector<8x24x24xi1>
    %80 = vector.broadcast %cst_32 : f32 to vector<8x24x24xf32>
    %81 = arith.select %79, %77, %80 : vector<8x24x24xi1>, vector<8x24x24xf32>
    %cst_33 = arith.constant dense<0xFF800000> : vector<8x24xf32>
    %82 = vector.multi_reduction <maximumf>, %81, %cst_33 [2] : vector<8x24x24xf32> to vector<8x24xf32>
    %83 = vector.shape_cast %82 : vector<8x24xf32> to vector<8x24x1xf32>
    %84 = vector.broadcast %83 : vector<8x24x1xf32> to vector<8x24x24xf32>
    %85 = arith.subf %81, %84 : vector<8x24x24xf32>
    %86 = math.exp %85 : vector<8x24x24xf32>
    %cst_34 = arith.constant dense<0.000000e+00> : vector<8x24xf32>
    %87 = vector.multi_reduction <add>, %86, %cst_34 [2] : vector<8x24x24xf32> to vector<8x24xf32>
    %88 = vector.shape_cast %87 : vector<8x24xf32> to vector<8x24x1xf32>
    %89 = tpu.reciprocal %88 {approx = true} : vector<8x24x1xf32> -> vector<8x24x1xf32>
    %90 = vector.broadcast %89 : vector<8x24x1xf32> to vector<8x24x24xf32>
    %91 = arith.mulf %86, %90 : vector<8x24x24xf32>
    %92 = arith.truncf %91 : vector<8x24x24xf32> to vector<8x24x24xbf16>
    "tpu.trace_start"() <{level = 10 : i32, message = "nts,nsd->ntd"}> : () -> ()
    %cst_35 = arith.constant dense<0.000000e+00> : vector<8x24x128xf32>
    %93 = tpu.matmul %92, %76, %cst_35 {dimension_numbers = #tpu.dot_dimension_numbers<[2], [1], [1], [2], [0, 0, 0, 1, 1, 2], [0], [0]>} : vector<8x24x24xbf16>, vector<8x24x128xbf16>, vector<8x24x128xf32> -> vector<8x24x128xf32>
    "tpu.trace_stop"() : () -> ()
    %94 = vector.shape_cast %93 : vector<8x24x128xf32> to vector<2x4x24x128xf32>
    %95 = vector.extract_strided_slice %94 {offsets = [0, 0, 0, 0], sizes = [2, 1, 24, 128], strides = [1, 1, 1, 1]} : vector<2x4x24x128xf32> to vector<2x1x24x128xf32>
    %96 = vector.shape_cast %95 : vector<2x1x24x128xf32> to vector<2x24x128xf32>
    %97 = vector.extract_strided_slice %94 {offsets = [0, 1, 0, 0], sizes = [2, 1, 24, 128], strides = [1, 1, 1, 1]} : vector<2x4x24x128xf32> to vector<2x1x24x128xf32>
    %98 = vector.shape_cast %97 : vector<2x1x24x128xf32> to vector<2x24x128xf32>
    %99 = arith.addf %96, %98 : vector<2x24x128xf32>
    %100 = vector.extract_strided_slice %94 {offsets = [0, 2, 0, 0], sizes = [2, 1, 24, 128], strides = [1, 1, 1, 1]} : vector<2x4x24x128xf32> to vector<2x1x24x128xf32>
    %101 = vector.shape_cast %100 : vector<2x1x24x128xf32> to vector<2x24x128xf32>
    %102 = arith.addf %99, %101 : vector<2x24x128xf32>
    %103 = vector.extract_strided_slice %94 {offsets = [0, 3, 0, 0], sizes = [2, 1, 24, 128], strides = [1, 1, 1, 1]} : vector<2x4x24x128xf32> to vector<2x1x24x128xf32>
    %104 = vector.shape_cast %103 : vector<2x1x24x128xf32> to vector<2x24x128xf32>
    %105 = arith.addf %102, %104 : vector<2x24x128xf32>
    %106 = vector.shape_cast %105 : vector<2x24x128xf32> to vector<48x128xf32>
    %107 = arith.truncf %106 : vector<48x128xf32> to vector<48x128xbf16>
    %c0_36 = arith.constant 0 : index
    %c0_37 = arith.constant 0 : index
    %c0_38 = arith.constant 0 : index
    %108 = vector.load %arg9[%c0_36, %c0_37, %c0_38] : memref<2x128x128xbf16, #tpu.memory_space<vmem>>, vector<1x128x128xbf16>
    %109 = vector.shape_cast %108 : vector<1x128x128xbf16> to vector<128x128xbf16>
    %cst_39 = arith.constant dense<0.000000e+00> : vector<48x128xf32>
    %110 = tpu.matmul %107, %109, %cst_39 {dimension_numbers = #tpu.dot_dimension_numbers<[1], [0], [0], [1], [0, 0, 1, 1], [], []>} : vector<48x128xbf16>, vector<128x128xbf16>, vector<48x128xf32> -> vector<48x128xf32>
    %c0_40 = arith.constant 0 : index
    %c0_41 = arith.constant 0 : index
    %c0_42 = arith.constant 0 : index
    %111 = vector.load %arg10[%c0_40, %c0_41, %c0_42] : memref<2x1x128xf32, #tpu.memory_space<vmem>>, vector<1x1x128xf32>
    %112 = vector.shape_cast %111 : vector<1x1x128xf32> to vector<1x128xf32>
    %113 = vector.broadcast %112 : vector<1x128xf32> to vector<48x128xf32>
    %114 = arith.addf %110, %113 : vector<48x128xf32>
    %115 = vector.shape_cast %114 : vector<48x128xf32> to vector<2x24x128xf32>
    %116 = arith.addf %14, %115 : vector<2x24x128xf32>
    %c0_43 = arith.constant 0 : index
    %c0_44 = arith.constant 0 : index
    %c0_45 = arith.constant 0 : index
    %117 = vector.load %arg11[%c0_43, %c0_44, %c0_45] : memref<2x1x128xf32, #tpu.memory_space<vmem>>, vector<1x1x128xf32>
    %118 = vector.shape_cast %117 : vector<1x1x128xf32> to vector<1x128xf32>
    %c0_46 = arith.constant 0 : index
    %c0_47 = arith.constant 0 : index
    %c0_48 = arith.constant 0 : index
    %119 = vector.load %arg12[%c0_46, %c0_47, %c0_48] : memref<2x1x128xf32, #tpu.memory_space<vmem>>, vector<1x1x128xf32>
    %120 = vector.shape_cast %119 : vector<1x1x128xf32> to vector<1x128xf32>
    %cst_49 = arith.constant dense<0.000000e+00> : vector<2x24xf32>
    %121 = vector.multi_reduction <add>, %116, %cst_49 [2] : vector<2x24x128xf32> to vector<2x24xf32>
    %122 = vector.shape_cast %121 : vector<2x24xf32> to vector<2x24x1xf32>
    %cst_50 = arith.constant 3.125000e-02 : f32
    %123 = vector.broadcast %cst_50 : f32 to vector<2x24x1xf32>
    %124 = arith.mulf %122, %123 : vector<2x24x1xf32>
    %125 = vector.broadcast %124 : vector<2x24x1xf32> to vector<2x24x128xf32>
    %126 = arith.subf %116, %125 : vector<2x24x128xf32>
    %cst_51 = arith.constant 0.000000e+00 : f32
    %127 = vector.shape_cast %2 : vector<1x1x128xi1> to vector<1x1x128xi1>
    %128 = vector.broadcast %127 : vector<1x1x128xi1> to vector<2x24x128xi1>
    %129 = vector.broadcast %cst_51 : f32 to vector<2x24x128xf32>
    %130 = arith.select %128, %126, %129 : vector<2x24x128xi1>, vector<2x24x128xf32>
    %131 = arith.mulf %130, %130 : vector<2x24x128xf32>
    %cst_52 = arith.constant dense<0.000000e+00> : vector<2x24xf32>
    %132 = vector.multi_reduction <add>, %131, %cst_52 [2] : vector<2x24x128xf32> to vector<2x24xf32>
    %133 = vector.shape_cast %132 : vector<2x24xf32> to vector<2x24x1xf32>
    %cst_53 = arith.constant 3.125000e-02 : f32
    %134 = vector.broadcast %cst_53 : f32 to vector<2x24x1xf32>
    %135 = arith.mulf %133, %134 : vector<2x24x1xf32>
    %cst_54 = arith.constant 9.99999997E-7 : f32
    %136 = vector.broadcast %cst_54 : f32 to vector<2x24x1xf32>
    %137 = arith.addf %135, %136 : vector<2x24x1xf32>
    %138 = math.rsqrt %137 : vector<2x24x1xf32>
    %139 = vector.broadcast %138 : vector<2x24x1xf32> to vector<2x24x128xf32>
    %140 = arith.mulf %130, %139 : vector<2x24x128xf32>
    %141 = vector.shape_cast %118 : vector<1x128xf32> to vector<1x1x128xf32>
    %142 = vector.broadcast %141 : vector<1x1x128xf32> to vector<2x24x128xf32>
    %143 = arith.mulf %140, %142 : vector<2x24x128xf32>
    %144 = vector.shape_cast %120 : vector<1x128xf32> to vector<1x1x128xf32>
    %145 = vector.broadcast %144 : vector<1x1x128xf32> to vector<2x24x128xf32>
    %146 = arith.addf %143, %145 : vector<2x24x128xf32>
    %147 = vector.shape_cast %146 : vector<2x24x128xf32> to vector<48x128xf32>
    %148 = arith.truncf %147 : vector<48x128xf32> to vector<48x128xbf16>
    %c0_55 = arith.constant 0 : index
    %c0_56 = arith.constant 0 : index
    %c0_57 = arith.constant 0 : index
    %149 = vector.load %arg13[%c0_55, %c0_56, %c0_57] : memref<2x128x256xbf16, #tpu.memory_space<vmem>>, vector<1x128x256xbf16>
    %150 = vector.shape_cast %149 : vector<1x128x256xbf16> to vector<128x256xbf16>
    %cst_58 = arith.constant dense<0.000000e+00> : vector<48x256xf32>
    %151 = tpu.matmul %148, %150, %cst_58 {dimension_numbers = #tpu.dot_dimension_numbers<[1], [0], [0], [1], [0, 0, 1, 1], [], []>} : vector<48x128xbf16>, vector<128x256xbf16>, vector<48x256xf32> -> vector<48x256xf32>
    %c0_59 = arith.constant 0 : index
    %c0_60 = arith.constant 0 : index
    %c0_61 = arith.constant 0 : index
    %152 = vector.load %arg14[%c0_59, %c0_60, %c0_61] : memref<2x1x256xf32, #tpu.memory_space<vmem>>, vector<1x1x256xf32>
    %153 = vector.shape_cast %152 : vector<1x1x256xf32> to vector<1x256xf32>
    %154 = vector.broadcast %153 : vector<1x256xf32> to vector<48x256xf32>
    %155 = arith.addf %151, %154 : vector<48x256xf32>
    %156 = vector.extract_strided_slice %155 {offsets = [0, 0], sizes = [48, 128], strides = [1, 1]} : vector<48x256xf32> to vector<48x128xf32>
    %157 = vector.extract_strided_slice %155 {offsets = [0, 128], sizes = [48, 128], strides = [1, 1]} : vector<48x256xf32> to vector<48x128xf32>
    %158 = arith.negf %156 : vector<48x128xf32>
    %159 = math.exp %158 : vector<48x128xf32>
    %cst_62 = arith.constant 1.000000e+00 : f32
    %160 = vector.broadcast %cst_62 : f32 to vector<48x128xf32>
    %161 = arith.addf %160, %159 : vector<48x128xf32>
    %162 = arith.divf %160, %161 : vector<48x128xf32>
    %163 = arith.mulf %156, %162 : vector<48x128xf32>
    %164 = arith.mulf %163, %157 : vector<48x128xf32>
    %165 = arith.truncf %164 : vector<48x128xf32> to vector<48x128xbf16>
    %c0_63 = arith.constant 0 : index
    %c0_64 = arith.constant 0 : index
    %c0_65 = arith.constant 0 : index
    %166 = vector.load %arg15[%c0_63, %c0_64, %c0_65] : memref<2x128x128xbf16, #tpu.memory_space<vmem>>, vector<1x128x128xbf16>
    %167 = vector.shape_cast %166 : vector<1x128x128xbf16> to vector<128x128xbf16>
    %cst_66 = arith.constant dense<0.000000e+00> : vector<48x128xf32>
    %168 = tpu.matmul %165, %167, %cst_66 {dimension_numbers = #tpu.dot_dimension_numbers<[1], [0], [0], [1], [0, 0, 1, 1], [], []>} : vector<48x128xbf16>, vector<128x128xbf16>, vector<48x128xf32> -> vector<48x128xf32>
    %c0_67 = arith.constant 0 : index
    %c0_68 = arith.constant 0 : index
    %c0_69 = arith.constant 0 : index
    %169 = vector.load %arg16[%c0_67, %c0_68, %c0_69] : memref<2x1x128xf32, #tpu.memory_space<vmem>>, vector<1x1x128xf32>
    %170 = vector.shape_cast %169 : vector<1x1x128xf32> to vector<1x128xf32>
    %171 = vector.broadcast %170 : vector<1x128xf32> to vector<48x128xf32>
    %172 = arith.addf %168, %171 : vector<48x128xf32>
    %173 = vector.shape_cast %172 : vector<48x128xf32> to vector<2x24x128xf32>
    %174 = arith.addf %116, %173 : vector<2x24x128xf32>
    %c1 = arith.constant 1 : index
    %c0_70 = arith.constant 0 : index
    %c0_71 = arith.constant 0 : index
    %175 = vector.load %arg5[%c1, %c0_70, %c0_71] : memref<2x1x128xf32, #tpu.memory_space<vmem>>, vector<1x1x128xf32>
    %176 = vector.shape_cast %175 : vector<1x1x128xf32> to vector<1x128xf32>
    %c1_72 = arith.constant 1 : index
    %c0_73 = arith.constant 0 : index
    %c0_74 = arith.constant 0 : index
    %177 = vector.load %arg6[%c1_72, %c0_73, %c0_74] : memref<2x1x128xf32, #tpu.memory_space<vmem>>, vector<1x1x128xf32>
    %178 = vector.shape_cast %177 : vector<1x1x128xf32> to vector<1x128xf32>
    %cst_75 = arith.constant dense<0.000000e+00> : vector<2x24xf32>
    %179 = vector.multi_reduction <add>, %174, %cst_75 [2] : vector<2x24x128xf32> to vector<2x24xf32>
    %180 = vector.shape_cast %179 : vector<2x24xf32> to vector<2x24x1xf32>
    %cst_76 = arith.constant 3.125000e-02 : f32
    %181 = vector.broadcast %cst_76 : f32 to vector<2x24x1xf32>
    %182 = arith.mulf %180, %181 : vector<2x24x1xf32>
    %183 = vector.broadcast %182 : vector<2x24x1xf32> to vector<2x24x128xf32>
    %184 = arith.subf %174, %183 : vector<2x24x128xf32>
    %cst_77 = arith.constant 0.000000e+00 : f32
    %185 = vector.shape_cast %2 : vector<1x1x128xi1> to vector<1x1x128xi1>
    %186 = vector.broadcast %185 : vector<1x1x128xi1> to vector<2x24x128xi1>
    %187 = vector.broadcast %cst_77 : f32 to vector<2x24x128xf32>
    %188 = arith.select %186, %184, %187 : vector<2x24x128xi1>, vector<2x24x128xf32>
    %189 = arith.mulf %188, %188 : vector<2x24x128xf32>
    %cst_78 = arith.constant dense<0.000000e+00> : vector<2x24xf32>
    %190 = vector.multi_reduction <add>, %189, %cst_78 [2] : vector<2x24x128xf32> to vector<2x24xf32>
    %191 = vector.shape_cast %190 : vector<2x24xf32> to vector<2x24x1xf32>
    %cst_79 = arith.constant 3.125000e-02 : f32
    %192 = vector.broadcast %cst_79 : f32 to vector<2x24x1xf32>
    %193 = arith.mulf %191, %192 : vector<2x24x1xf32>
    %cst_80 = arith.constant 9.99999997E-7 : f32
    %194 = vector.broadcast %cst_80 : f32 to vector<2x24x1xf32>
    %195 = arith.addf %193, %194 : vector<2x24x1xf32>
    %196 = math.rsqrt %195 : vector<2x24x1xf32>
    %197 = vector.broadcast %196 : vector<2x24x1xf32> to vector<2x24x128xf32>
    %198 = arith.mulf %188, %197 : vector<2x24x128xf32>
    %199 = vector.shape_cast %176 : vector<1x128xf32> to vector<1x1x128xf32>
    %200 = vector.broadcast %199 : vector<1x1x128xf32> to vector<2x24x128xf32>
    %201 = arith.mulf %198, %200 : vector<2x24x128xf32>
    %202 = vector.shape_cast %178 : vector<1x128xf32> to vector<1x1x128xf32>
    %203 = vector.broadcast %202 : vector<1x1x128xf32> to vector<2x24x128xf32>
    %204 = arith.addf %201, %203 : vector<2x24x128xf32>
    %205 = vector.shape_cast %204 : vector<2x24x128xf32> to vector<48x128xf32>
    %206 = arith.truncf %205 : vector<48x128xf32> to vector<48x128xbf16>
    %c1_81 = arith.constant 1 : index
    %c0_82 = arith.constant 0 : index
    %c0_83 = arith.constant 0 : index
    %207 = vector.load %arg7[%c1_81, %c0_82, %c0_83] : memref<2x128x384xbf16, #tpu.memory_space<vmem>>, vector<1x128x384xbf16>
    %208 = vector.shape_cast %207 : vector<1x128x384xbf16> to vector<128x384xbf16>
    %cst_84 = arith.constant dense<0.000000e+00> : vector<48x384xf32>
    %209 = tpu.matmul %206, %208, %cst_84 {dimension_numbers = #tpu.dot_dimension_numbers<[1], [0], [0], [1], [0, 0, 1, 1], [], []>} : vector<48x128xbf16>, vector<128x384xbf16>, vector<48x384xf32> -> vector<48x384xf32>
    %c1_85 = arith.constant 1 : index
    %c0_86 = arith.constant 0 : index
    %c0_87 = arith.constant 0 : index
    %210 = vector.load %arg8[%c1_85, %c0_86, %c0_87] : memref<2x1x384xf32, #tpu.memory_space<vmem>>, vector<1x1x384xf32>
    %211 = vector.shape_cast %210 : vector<1x1x384xf32> to vector<1x384xf32>
    %212 = vector.broadcast %211 : vector<1x384xf32> to vector<48x384xf32>
    %213 = arith.addf %209, %212 : vector<48x384xf32>
    %214 = vector.extract_strided_slice %213 {offsets = [0, 0], sizes = [48, 128], strides = [1, 1]} : vector<48x384xf32> to vector<48x128xf32>
    %cst_88 = arith.constant 0.353553385 : f32
    %215 = vector.broadcast %cst_88 : f32 to vector<48x128xf32>
    %216 = arith.mulf %214, %215 : vector<48x128xf32>
    %217 = vector.shape_cast %216 : vector<48x128xf32> to vector<2x1x24x128xf32>
    %218 = vector.extract_strided_slice %213 {offsets = [0, 128], sizes = [48, 128], strides = [1, 1]} : vector<48x384xf32> to vector<48x128xf32>
    %219 = vector.shape_cast %218 : vector<48x128xf32> to vector<2x1x24x128xf32>
    %220 = vector.extract_strided_slice %213 {offsets = [0, 256], sizes = [48, 128], strides = [1, 1]} : vector<48x384xf32> to vector<48x128xf32>
    %221 = vector.shape_cast %220 : vector<48x128xf32> to vector<2x1x24x128xf32>
    %222 = vector.broadcast %217 : vector<2x1x24x128xf32> to vector<2x4x24x128xf32>
    %223 = vector.broadcast %6 : vector<1x4x1x128xf32> to vector<2x4x24x128xf32>
    %224 = arith.mulf %222, %223 : vector<2x4x24x128xf32>
    %225 = vector.shape_cast %224 : vector<2x4x24x128xf32> to vector<8x24x128xf32>
    %226 = arith.truncf %225 : vector<8x24x128xf32> to vector<8x24x128xbf16>
    %227 = vector.broadcast %219 : vector<2x1x24x128xf32> to vector<2x4x24x128xf32>
    %228 = vector.broadcast %6 : vector<1x4x1x128xf32> to vector<2x4x24x128xf32>
    %229 = arith.mulf %227, %228 : vector<2x4x24x128xf32>
    %230 = vector.shape_cast %229 : vector<2x4x24x128xf32> to vector<8x24x128xf32>
    %231 = arith.truncf %230 : vector<8x24x128xf32> to vector<8x24x128xbf16>
    %232 = vector.broadcast %221 : vector<2x1x24x128xf32> to vector<2x4x24x128xf32>
    %233 = vector.broadcast %6 : vector<1x4x1x128xf32> to vector<2x4x24x128xf32>
    %234 = arith.mulf %232, %233 : vector<2x4x24x128xf32>
    %235 = vector.shape_cast %234 : vector<2x4x24x128xf32> to vector<8x24x128xf32>
    %236 = arith.truncf %235 : vector<8x24x128xf32> to vector<8x24x128xbf16>
    "tpu.trace_start"() <{level = 10 : i32, message = "ntd,nsd->nts"}> : () -> ()
    %cst_89 = arith.constant dense<0.000000e+00> : vector<8x24x24xf32>
    %237 = tpu.matmul %226, %231, %cst_89 {dimension_numbers = #tpu.dot_dimension_numbers<[2], [2], [1], [1], [0, 0, 0, 1, 1, 1], [0], [0]>} : vector<8x24x128xbf16>, vector<8x24x128xbf16>, vector<8x24x24xf32> -> vector<8x24x24xf32>
    %cst_90 = arith.constant -1.000000e+30 : f32
    "tpu.trace_stop"() : () -> ()
    %238 = vector.shape_cast %5 : vector<1x1x24xi1> to vector<1x1x24xi1>
    %239 = vector.broadcast %238 : vector<1x1x24xi1> to vector<8x24x24xi1>
    %240 = vector.broadcast %cst_90 : f32 to vector<8x24x24xf32>
    %241 = arith.select %239, %237, %240 : vector<8x24x24xi1>, vector<8x24x24xf32>
    %cst_91 = arith.constant dense<0xFF800000> : vector<8x24xf32>
    %242 = vector.multi_reduction <maximumf>, %241, %cst_91 [2] : vector<8x24x24xf32> to vector<8x24xf32>
    %243 = vector.shape_cast %242 : vector<8x24xf32> to vector<8x24x1xf32>
    %244 = vector.broadcast %243 : vector<8x24x1xf32> to vector<8x24x24xf32>
    %245 = arith.subf %241, %244 : vector<8x24x24xf32>
    %246 = math.exp %245 : vector<8x24x24xf32>
    %cst_92 = arith.constant dense<0.000000e+00> : vector<8x24xf32>
    %247 = vector.multi_reduction <add>, %246, %cst_92 [2] : vector<8x24x24xf32> to vector<8x24xf32>
    %248 = vector.shape_cast %247 : vector<8x24xf32> to vector<8x24x1xf32>
    %249 = tpu.reciprocal %248 {approx = true} : vector<8x24x1xf32> -> vector<8x24x1xf32>
    %250 = vector.broadcast %249 : vector<8x24x1xf32> to vector<8x24x24xf32>
    %251 = arith.mulf %246, %250 : vector<8x24x24xf32>
    %252 = arith.truncf %251 : vector<8x24x24xf32> to vector<8x24x24xbf16>
    "tpu.trace_start"() <{level = 10 : i32, message = "nts,nsd->ntd"}> : () -> ()
    %cst_93 = arith.constant dense<0.000000e+00> : vector<8x24x128xf32>
    %253 = tpu.matmul %252, %236, %cst_93 {dimension_numbers = #tpu.dot_dimension_numbers<[2], [1], [1], [2], [0, 0, 0, 1, 1, 2], [0], [0]>} : vector<8x24x24xbf16>, vector<8x24x128xbf16>, vector<8x24x128xf32> -> vector<8x24x128xf32>
    "tpu.trace_stop"() : () -> ()
    %254 = vector.shape_cast %253 : vector<8x24x128xf32> to vector<2x4x24x128xf32>
    %255 = vector.extract_strided_slice %254 {offsets = [0, 0, 0, 0], sizes = [2, 1, 24, 128], strides = [1, 1, 1, 1]} : vector<2x4x24x128xf32> to vector<2x1x24x128xf32>
    %256 = vector.shape_cast %255 : vector<2x1x24x128xf32> to vector<2x24x128xf32>
    %257 = vector.extract_strided_slice %254 {offsets = [0, 1, 0, 0], sizes = [2, 1, 24, 128], strides = [1, 1, 1, 1]} : vector<2x4x24x128xf32> to vector<2x1x24x128xf32>
    %258 = vector.shape_cast %257 : vector<2x1x24x128xf32> to vector<2x24x128xf32>
    %259 = arith.addf %256, %258 : vector<2x24x128xf32>
    %260 = vector.extract_strided_slice %254 {offsets = [0, 2, 0, 0], sizes = [2, 1, 24, 128], strides = [1, 1, 1, 1]} : vector<2x4x24x128xf32> to vector<2x1x24x128xf32>
    %261 = vector.shape_cast %260 : vector<2x1x24x128xf32> to vector<2x24x128xf32>
    %262 = arith.addf %259, %261 : vector<2x24x128xf32>
    %263 = vector.extract_strided_slice %254 {offsets = [0, 3, 0, 0], sizes = [2, 1, 24, 128], strides = [1, 1, 1, 1]} : vector<2x4x24x128xf32> to vector<2x1x24x128xf32>
    %264 = vector.shape_cast %263 : vector<2x1x24x128xf32> to vector<2x24x128xf32>
    %265 = arith.addf %262, %264 : vector<2x24x128xf32>
    %266 = vector.shape_cast %265 : vector<2x24x128xf32> to vector<48x128xf32>
    %267 = arith.truncf %266 : vector<48x128xf32> to vector<48x128xbf16>
    %c1_94 = arith.constant 1 : index
    %c0_95 = arith.constant 0 : index
    %c0_96 = arith.constant 0 : index
    %268 = vector.load %arg9[%c1_94, %c0_95, %c0_96] : memref<2x128x128xbf16, #tpu.memory_space<vmem>>, vector<1x128x128xbf16>
    %269 = vector.shape_cast %268 : vector<1x128x128xbf16> to vector<128x128xbf16>
    %cst_97 = arith.constant dense<0.000000e+00> : vector<48x128xf32>
    %270 = tpu.matmul %267, %269, %cst_97 {dimension_numbers = #tpu.dot_dimension_numbers<[1], [0], [0], [1], [0, 0, 1, 1], [], []>} : vector<48x128xbf16>, vector<128x128xbf16>, vector<48x128xf32> -> vector<48x128xf32>
    %c1_98 = arith.constant 1 : index
    %c0_99 = arith.constant 0 : index
    %c0_100 = arith.constant 0 : index
    %271 = vector.load %arg10[%c1_98, %c0_99, %c0_100] : memref<2x1x128xf32, #tpu.memory_space<vmem>>, vector<1x1x128xf32>
    %272 = vector.shape_cast %271 : vector<1x1x128xf32> to vector<1x128xf32>
    %273 = vector.broadcast %272 : vector<1x128xf32> to vector<48x128xf32>
    %274 = arith.addf %270, %273 : vector<48x128xf32>
    %275 = vector.shape_cast %274 : vector<48x128xf32> to vector<2x24x128xf32>
    %276 = arith.addf %174, %275 : vector<2x24x128xf32>
    %c1_101 = arith.constant 1 : index
    %c0_102 = arith.constant 0 : index
    %c0_103 = arith.constant 0 : index
    %277 = vector.load %arg11[%c1_101, %c0_102, %c0_103] : memref<2x1x128xf32, #tpu.memory_space<vmem>>, vector<1x1x128xf32>
    %278 = vector.shape_cast %277 : vector<1x1x128xf32> to vector<1x128xf32>
    %c1_104 = arith.constant 1 : index
    %c0_105 = arith.constant 0 : index
    %c0_106 = arith.constant 0 : index
    %279 = vector.load %arg12[%c1_104, %c0_105, %c0_106] : memref<2x1x128xf32, #tpu.memory_space<vmem>>, vector<1x1x128xf32>
    %280 = vector.shape_cast %279 : vector<1x1x128xf32> to vector<1x128xf32>
    %cst_107 = arith.constant dense<0.000000e+00> : vector<2x24xf32>
    %281 = vector.multi_reduction <add>, %276, %cst_107 [2] : vector<2x24x128xf32> to vector<2x24xf32>
    %282 = vector.shape_cast %281 : vector<2x24xf32> to vector<2x24x1xf32>
    %cst_108 = arith.constant 3.125000e-02 : f32
    %283 = vector.broadcast %cst_108 : f32 to vector<2x24x1xf32>
    %284 = arith.mulf %282, %283 : vector<2x24x1xf32>
    %285 = vector.broadcast %284 : vector<2x24x1xf32> to vector<2x24x128xf32>
    %286 = arith.subf %276, %285 : vector<2x24x128xf32>
    %cst_109 = arith.constant 0.000000e+00 : f32
    %287 = vector.shape_cast %2 : vector<1x1x128xi1> to vector<1x1x128xi1>
    %288 = vector.broadcast %287 : vector<1x1x128xi1> to vector<2x24x128xi1>
    %289 = vector.broadcast %cst_109 : f32 to vector<2x24x128xf32>
    %290 = arith.select %288, %286, %289 : vector<2x24x128xi1>, vector<2x24x128xf32>
    %291 = arith.mulf %290, %290 : vector<2x24x128xf32>
    %cst_110 = arith.constant dense<0.000000e+00> : vector<2x24xf32>
    %292 = vector.multi_reduction <add>, %291, %cst_110 [2] : vector<2x24x128xf32> to vector<2x24xf32>
    %293 = vector.shape_cast %292 : vector<2x24xf32> to vector<2x24x1xf32>
    %cst_111 = arith.constant 3.125000e-02 : f32
    %294 = vector.broadcast %cst_111 : f32 to vector<2x24x1xf32>
    %295 = arith.mulf %293, %294 : vector<2x24x1xf32>
    %cst_112 = arith.constant 9.99999997E-7 : f32
    %296 = vector.broadcast %cst_112 : f32 to vector<2x24x1xf32>
    %297 = arith.addf %295, %296 : vector<2x24x1xf32>
    %298 = math.rsqrt %297 : vector<2x24x1xf32>
    %299 = vector.broadcast %298 : vector<2x24x1xf32> to vector<2x24x128xf32>
    %300 = arith.mulf %290, %299 : vector<2x24x128xf32>
    %301 = vector.shape_cast %278 : vector<1x128xf32> to vector<1x1x128xf32>
    %302 = vector.broadcast %301 : vector<1x1x128xf32> to vector<2x24x128xf32>
    %303 = arith.mulf %300, %302 : vector<2x24x128xf32>
    %304 = vector.shape_cast %280 : vector<1x128xf32> to vector<1x1x128xf32>
    %305 = vector.broadcast %304 : vector<1x1x128xf32> to vector<2x24x128xf32>
    %306 = arith.addf %303, %305 : vector<2x24x128xf32>
    %307 = vector.shape_cast %306 : vector<2x24x128xf32> to vector<48x128xf32>
    %308 = arith.truncf %307 : vector<48x128xf32> to vector<48x128xbf16>
    %c1_113 = arith.constant 1 : index
    %c0_114 = arith.constant 0 : index
    %c0_115 = arith.constant 0 : index
    %309 = vector.load %arg13[%c1_113, %c0_114, %c0_115] : memref<2x128x256xbf16, #tpu.memory_space<vmem>>, vector<1x128x256xbf16>
    %310 = vector.shape_cast %309 : vector<1x128x256xbf16> to vector<128x256xbf16>
    %cst_116 = arith.constant dense<0.000000e+00> : vector<48x256xf32>
    %311 = tpu.matmul %308, %310, %cst_116 {dimension_numbers = #tpu.dot_dimension_numbers<[1], [0], [0], [1], [0, 0, 1, 1], [], []>} : vector<48x128xbf16>, vector<128x256xbf16>, vector<48x256xf32> -> vector<48x256xf32>
    %c1_117 = arith.constant 1 : index
    %c0_118 = arith.constant 0 : index
    %c0_119 = arith.constant 0 : index
    %312 = vector.load %arg14[%c1_117, %c0_118, %c0_119] : memref<2x1x256xf32, #tpu.memory_space<vmem>>, vector<1x1x256xf32>
    %313 = vector.shape_cast %312 : vector<1x1x256xf32> to vector<1x256xf32>
    %314 = vector.broadcast %313 : vector<1x256xf32> to vector<48x256xf32>
    %315 = arith.addf %311, %314 : vector<48x256xf32>
    %316 = vector.extract_strided_slice %315 {offsets = [0, 0], sizes = [48, 128], strides = [1, 1]} : vector<48x256xf32> to vector<48x128xf32>
    %317 = vector.extract_strided_slice %315 {offsets = [0, 128], sizes = [48, 128], strides = [1, 1]} : vector<48x256xf32> to vector<48x128xf32>
    %318 = arith.negf %316 : vector<48x128xf32>
    %319 = math.exp %318 : vector<48x128xf32>
    %cst_120 = arith.constant 1.000000e+00 : f32
    %320 = vector.broadcast %cst_120 : f32 to vector<48x128xf32>
    %321 = arith.addf %320, %319 : vector<48x128xf32>
    %322 = arith.divf %320, %321 : vector<48x128xf32>
    %323 = arith.mulf %316, %322 : vector<48x128xf32>
    %324 = arith.mulf %323, %317 : vector<48x128xf32>
    %325 = arith.truncf %324 : vector<48x128xf32> to vector<48x128xbf16>
    %c1_121 = arith.constant 1 : index
    %c0_122 = arith.constant 0 : index
    %c0_123 = arith.constant 0 : index
    %326 = vector.load %arg15[%c1_121, %c0_122, %c0_123] : memref<2x128x128xbf16, #tpu.memory_space<vmem>>, vector<1x128x128xbf16>
    %327 = vector.shape_cast %326 : vector<1x128x128xbf16> to vector<128x128xbf16>
    %cst_124 = arith.constant dense<0.000000e+00> : vector<48x128xf32>
    %328 = tpu.matmul %325, %327, %cst_124 {dimension_numbers = #tpu.dot_dimension_numbers<[1], [0], [0], [1], [0, 0, 1, 1], [], []>} : vector<48x128xbf16>, vector<128x128xbf16>, vector<48x128xf32> -> vector<48x128xf32>
    %c1_125 = arith.constant 1 : index
    %c0_126 = arith.constant 0 : index
    %c0_127 = arith.constant 0 : index
    %329 = vector.load %arg16[%c1_125, %c0_126, %c0_127] : memref<2x1x128xf32, #tpu.memory_space<vmem>>, vector<1x1x128xf32>
    %330 = vector.shape_cast %329 : vector<1x1x128xf32> to vector<1x128xf32>
    %331 = vector.broadcast %330 : vector<1x128xf32> to vector<48x128xf32>
    %332 = arith.addf %328, %331 : vector<48x128xf32>
    %333 = vector.shape_cast %332 : vector<48x128xf32> to vector<2x24x128xf32>
    %334 = arith.addf %276, %333 : vector<2x24x128xf32>
    %c0_128 = arith.constant 0 : index
    %c0_129 = arith.constant 0 : index
    %335 = vector.load %arg17[%c0_128, %c0_129] : memref<1x128xf32, #tpu.memory_space<vmem>>, vector<1x128xf32>
    %c0_130 = arith.constant 0 : index
    %c0_131 = arith.constant 0 : index
    %336 = vector.load %arg18[%c0_130, %c0_131] : memref<1x128xf32, #tpu.memory_space<vmem>>, vector<1x128xf32>
    %cst_132 = arith.constant dense<0.000000e+00> : vector<2x24xf32>
    %337 = vector.multi_reduction <add>, %334, %cst_132 [2] : vector<2x24x128xf32> to vector<2x24xf32>
    %338 = vector.shape_cast %337 : vector<2x24xf32> to vector<2x24x1xf32>
    %cst_133 = arith.constant 3.125000e-02 : f32
    %339 = vector.broadcast %cst_133 : f32 to vector<2x24x1xf32>
    %340 = arith.mulf %338, %339 : vector<2x24x1xf32>
    %341 = vector.broadcast %340 : vector<2x24x1xf32> to vector<2x24x128xf32>
    %342 = arith.subf %334, %341 : vector<2x24x128xf32>
    %cst_134 = arith.constant 0.000000e+00 : f32
    %343 = vector.shape_cast %2 : vector<1x1x128xi1> to vector<1x1x128xi1>
    %344 = vector.broadcast %343 : vector<1x1x128xi1> to vector<2x24x128xi1>
    %345 = vector.broadcast %cst_134 : f32 to vector<2x24x128xf32>
    %346 = arith.select %344, %342, %345 : vector<2x24x128xi1>, vector<2x24x128xf32>
    %347 = arith.mulf %346, %346 : vector<2x24x128xf32>
    %cst_135 = arith.constant dense<0.000000e+00> : vector<2x24xf32>
    %348 = vector.multi_reduction <add>, %347, %cst_135 [2] : vector<2x24x128xf32> to vector<2x24xf32>
    %349 = vector.shape_cast %348 : vector<2x24xf32> to vector<2x24x1xf32>
    %cst_136 = arith.constant 3.125000e-02 : f32
    %350 = vector.broadcast %cst_136 : f32 to vector<2x24x1xf32>
    %351 = arith.mulf %349, %350 : vector<2x24x1xf32>
    %cst_137 = arith.constant 9.99999997E-7 : f32
    %352 = vector.broadcast %cst_137 : f32 to vector<2x24x1xf32>
    %353 = arith.addf %351, %352 : vector<2x24x1xf32>
    %354 = math.rsqrt %353 : vector<2x24x1xf32>
    %355 = vector.broadcast %354 : vector<2x24x1xf32> to vector<2x24x128xf32>
    %356 = arith.mulf %346, %355 : vector<2x24x128xf32>
    %357 = vector.shape_cast %335 : vector<1x128xf32> to vector<1x1x128xf32>
    %358 = vector.broadcast %357 : vector<1x1x128xf32> to vector<2x24x128xf32>
    %359 = arith.mulf %356, %358 : vector<2x24x128xf32>
    %360 = vector.shape_cast %336 : vector<1x128xf32> to vector<1x1x128xf32>
    %361 = vector.broadcast %360 : vector<1x1x128xf32> to vector<2x24x128xf32>
    %362 = arith.addf %359, %361 : vector<2x24x128xf32>
    %c0_138 = arith.constant 0 : index
    %c0_139 = arith.constant 0 : index
    %c0_140 = arith.constant 0 : index
    %363 = vector.load %arg19[%c0_138, %c0_139, %c0_140] : memref<2x24x128xf32, #tpu.memory_space<vmem>>, vector<2x24x128xf32>
    tpu.vector_store %arg19[%c0_138, %c0_139, %c0_140], %362 {strides = array<i32>} : memref<2x24x128xf32, #tpu.memory_space<vmem>>, vector<2x24x128xf32>,
    return
  }
  func.func @transform_0(%arg0: i32) -> (i32, i32, i32) {
    %c0_i32 = arith.constant 0 : i32
    %c0_i32_0 = arith.constant 0 : i32
    %c0_i32_1 = arith.constant 0 : i32
    return %arg0, %c0_i32, %c0_i32_0 : i32, i32, i32
  }
  func.func @transform_1(%arg0: i32) -> (i32, i32) {
    %c0_i32 = arith.constant 0 : i32
    %c0_i32_0 = arith.constant 0 : i32
    %c0_i32_1 = arith.constant 0 : i32
    return %c0_i32, %c0_i32_0 : i32, i32
  }
  func.func @transform_2(%arg0: i32) -> (i32, i32, i32) {
    %c0_i32 = arith.constant 0 : i32
    %c0_i32_0 = arith.constant 0 : i32
    %c0_i32_1 = arith.constant 0 : i32
    %c0_i32_2 = arith.constant 0 : i32
    return %c0_i32, %c0_i32_0, %c0_i32_1 : i32, i32, i32
  }
  func.func @transform_3(%arg0: i32) -> (i32, i32, i32, i32) {
    %c0_i32 = arith.constant 0 : i32
    %c0_i32_0 = arith.constant 0 : i32
    %c0_i32_1 = arith.constant 0 : i32
    %c0_i32_2 = arith.constant 0 : i32
    %c0_i32_3 = arith.constant 0 : i32
    return %c0_i32, %c0_i32_0, %c0_i32_1, %c0_i32_2 : i32, i32, i32, i32
  }
  func.func @transform_4(%arg0: i32) -> (i32, i32, i32) {
    %c0_i32 = arith.constant 0 : i32
    %c0_i32_0 = arith.constant 0 : i32
    %c0_i32_1 = arith.constant 0 : i32
    %c0_i32_2 = arith.constant 0 : i32
    return %c0_i32, %c0_i32_0, %c0_i32_1 : i32, i32, i32
  }
  func.func @transform_5(%arg0: i32) -> (i32, i32, i32) {
    %c0_i32 = arith.constant 0 : i32
    %c0_i32_0 = arith.constant 0 : i32
    %c0_i32_1 = arith.constant 0 : i32
    %c0_i32_2 = arith.constant 0 : i32
    return %c0_i32, %c0_i32_0, %c0_i32_1 : i32, i32, i32
  }
  func.func @transform_6(%arg0: i32) -> (i32, i32, i32) {
    %c0_i32 = arith.constant 0 : i32
    %c0_i32_0 = arith.constant 0 : i32
    %c0_i32_1 = arith.constant 0 : i32
    %c0_i32_2 = arith.constant 0 : i32
    return %c0_i32, %c0_i32_0, %c0_i32_1 : i32, i32, i32
  }
  func.func @transform_7(%arg0: i32) -> (i32, i32, i32) {
    %c0_i32 = arith.constant 0 : i32
    %c0_i32_0 = arith.constant 0 : i32
    %c0_i32_1 = arith.constant 0 : i32
    %c0_i32_2 = arith.constant 0 : i32
    return %c0_i32, %c0_i32_0, %c0_i32_1 : i32, i32, i32
  }
  func.func @transform_8(%arg0: i32) -> (i32, i32, i32) {
    %c0_i32 = arith.constant 0 : i32
    %c0_i32_0 = arith.constant 0 : i32
    %c0_i32_1 = arith.constant 0 : i32
    %c0_i32_2 = arith.constant 0 : i32
    return %c0_i32, %c0_i32_0, %c0_i32_1 : i32, i32, i32
  }
  func.func @transform_9(%arg0: i32) -> (i32, i32, i32) {
    %c0_i32 = arith.constant 0 : i32
    %c0_i32_0 = arith.constant 0 : i32
    %c0_i32_1 = arith.constant 0 : i32
    %c0_i32_2 = arith.constant 0 : i32
    return %c0_i32, %c0_i32_0, %c0_i32_1 : i32, i32, i32
  }
  func.func @transform_10(%arg0: i32) -> (i32, i32, i32) {
    %c0_i32 = arith.constant 0 : i32
    %c0_i32_0 = arith.constant 0 : i32
    %c0_i32_1 = arith.constant 0 : i32
    %c0_i32_2 = arith.constant 0 : i32
    return %c0_i32, %c0_i32_0, %c0_i32_1 : i32, i32, i32
  }
  func.func @transform_11(%arg0: i32) -> (i32, i32, i32) {
    %c0_i32 = arith.constant 0 : i32
    %c0_i32_0 = arith.constant 0 : i32
    %c0_i32_1 = arith.constant 0 : i32
    %c0_i32_2 = arith.constant 0 : i32
    return %c0_i32, %c0_i32_0, %c0_i32_1 : i32, i32, i32
  }
  func.func @transform_12(%arg0: i32) -> (i32, i32, i32) {
    %c0_i32 = arith.constant 0 : i32
    %c0_i32_0 = arith.constant 0 : i32
    %c0_i32_1 = arith.constant 0 : i32
    %c0_i32_2 = arith.constant 0 : i32
    return %c0_i32, %c0_i32_0, %c0_i32_1 : i32, i32, i32
  }
  func.func @transform_13(%arg0: i32) -> (i32, i32, i32) {
    %c0_i32 = arith.constant 0 : i32
    %c0_i32_0 = arith.constant 0 : i32
    %c0_i32_1 = arith.constant 0 : i32
    %c0_i32_2 = arith.constant 0 : i32
    return %c0_i32, %c0_i32_0, %c0_i32_1 : i32, i32, i32
  }
  func.func @transform_14(%arg0: i32) -> (i32, i32, i32) {
    %c0_i32 = arith.constant 0 : i32
    %c0_i32_0 = arith.constant 0 : i32
    %c0_i32_1 = arith.constant 0 : i32
    %c0_i32_2 = arith.constant 0 : i32
    return %c0_i32, %c0_i32_0, %c0_i32_1 : i32, i32, i32
  }
  func.func @transform_15(%arg0: i32) -> (i32, i32, i32) {
    %c0_i32 = arith.constant 0 : i32
    %c0_i32_0 = arith.constant 0 : i32
    %c0_i32_1 = arith.constant 0 : i32
    %c0_i32_2 = arith.constant 0 : i32
    return %c0_i32, %c0_i32_0, %c0_i32_1 : i32, i32, i32
  }
  func.func @transform_16(%arg0: i32) -> (i32, i32) {
    %c0_i32 = arith.constant 0 : i32
    %c0_i32_0 = arith.constant 0 : i32
    %c0_i32_1 = arith.constant 0 : i32
    return %c0_i32, %c0_i32_0 : i32, i32
  }
  func.func @transform_17(%arg0: i32) -> (i32, i32) {
    %c0_i32 = arith.constant 0 : i32
    %c0_i32_0 = arith.constant 0 : i32
    %c0_i32_1 = arith.constant 0 : i32
    return %c0_i32, %c0_i32_0 : i32, i32
  }
  func.func @transform_18(%arg0: i32) -> (i32, i32, i32) {
    %c0_i32 = arith.constant 0 : i32
    %c0_i32_0 = arith.constant 0 : i32
    %c0_i32_1 = arith.constant 0 : i32
    return %arg0, %c0_i32, %c0_i32_0 : i32, i32, i32
  }
}

</mosaic_0001>

<bundles_post_ra>
// kernel: virchow2_forward.1
= control target key start
LH: loop header
LB: loop body
LE: loop exit
PB: predicated region body
PF: predicated region fallthrough
CT: control target
= control target key end

     0   :  { %v8584_v0 = vmov 0.0   ;;  %vm6395_vm0 = vmmov 0   ;;  %v60_v37 = vlaneseq  ;;  %vm1469_vm2 = vcmask 1043456   ;;  %s8559_s1 = inlined_call_operand.vmem [shape: bf16[128,128], index: 1, kind: input, shape index: {}]   ;;  %s8560_s0 = inlined_call_operand.vmem [shape: bf16[2,24,128], index: 0, kind: input, shape index: {}]   ;;  %s8561_s2 = inlined_call_operand.vmem [shape: f32[1,24,128], index: 2, kind: input, shape index: {}]   ;;  %s8562_s6 = inlined_call_operand.vmem [shape: bf16[2,128,384], index: 6, kind: input, shape index: {}]   ;;  %s8563_s4 = inlined_call_operand.vmem [shape: f32[2,1,128], index: 4, kind: input, shape index: {}]   ;;  %s8564_s5 = inlined_call_operand.vmem [shape: f32[2,1,128], index: 5, kind: input, shape index: {}]   ;;  %s8565_s7 = inlined_call_operand.vmem [shape: f32[2,1,384], index: 7, kind: input, shape index: {}]   ;;  %s8566_s3 = inlined_call_operand.vmem [shape: f32[1,4,1,128], index: 3, kind: input, shape index: {}]   ;;  %s8567_s8 = inlined_call_operand.vmem [shape: bf16[2,128,128], index: 8, kind: input, shape index: {}]   ;;  %s8568_s9 = inlined_call_operand.vmem [shape: f32[2,1,128], index: 9, kind: input, shape index: {}]   ;;  %s8569_s12 = inlined_call_operand.vmem [shape: bf16[2,128,256], index: 12, kind: input, shape index: {}]   ;;  %s8570_s10 = inlined_call_operand.vmem [shape: f32[2,1,128], index: 10, kind: input, shape index: {}]   ;;  %s8571_s11 = inlined_call_operand.vmem [shape: f32[2,1,128], index: 11, kind: input, shape index: {}]   ;;  %s8572_s14 = inlined_call_operand.vmem [shape: bf16[2,128,128], index: 14, kind: input, shape index: {}]   ;;  %s8573_s13 = inlined_call_operand.vmem [shape: f32[2,1,256], index: 13, kind: input, shape index: {}]   ;;  %s8574_s15 = inlined_call_operand.vmem [shape: f32[2,1,128], index: 15, kind: input, shape index: {}]   ;;  %s8575_s16 = inlined_call_operand.vmem [shape: f32[1,128], index: 16, kind: input, shape index: {}]   ;;  %s8576_s17 = inlined_call_operand.vmem [shape: f32[1,128], index: 17, kind: input, shape index: {}]   ;;  %s8577_s18 = inlined_call_operand.vmem [shape: f32[2,24,128], index: 18, kind: output, shape index: {}]  }
   0x1   :  { %8586 = sst [smem:[#allocation2_spill]] %s8559_s1  ;;  %5410 = vmatprep.subr.bf16.mxu0 %v8584_v0  ;;  %5426 = vmatprep.mubr.msk.bf16.mxu0 %vm6395_vm0, %v8584_v0  ;;  %v5940_v33 = vld [vmem:[%s8562_s6 + $0x4] ss:$12 sps:$4 sm:$0xff]   ;;  %v5942_v34 = vld [vmem:[%s8562_s6] ss:$12 sps:$4 sm:$0xff]   ;;  %vm1182_vm4 = vcmask 195584  }
   0x2   :  { %8587 = sst [smem:[#allocation3_spill]] %s8560_s0  ;;  %s8589_s29 = sld [smem:[#allocation2_spill]]  ;;  %502 = vmatprep.subr.bf16.mxu1 %v5940_v33  ;;  %v5943_v35 = vld [vmem:[%s8562_s6 + $0x8] ss:$12 sps:$4 sm:$0xff]   ;;  %v6583_v38 = vand.u32 127, %v60_v37 }
   0x3   :  { %8588 = sst [smem:[#allocation4_spill]] %s8561_s2  ;;  %s8590_s19 = sld [smem:[#allocation3_spill]]  ;;  %503 = vmatpush1.bf16.msra.mxu1 %v5942_v34  ;;  %v5944_v36 = vld [vmem:[%s8562_s6 + $0x1c] ss:$12 sps:$4 sm:$0xff]  }
   0x4   :  { %s8591_s23 = sld [smem:[#allocation4_spill]]  ;;  %504 = vmatprep.subr.bf16.mxu1 %v5944_v36  ;;  %vm62_vm1 = vcmp.lt.s32.totalorder %v6583_v38, 32  ;;  %vm63_vm3 = vcmp.lt.s32.totalorder %v6583_v38, 21 }
   0x8   :  { %v5929_v1 = vld [vmem:[%s8589_s29] sm:$0xff]   ;;  %v5930_v2 = vld [vmem:[%s8589_s29 + $0x8] sm:$0xff]   ;;  %v5931_v3 = vld [vmem:[%s8589_s29 + $0x10] sm:$0xff]  }
   0x9   :  { %5411 = vmatpush3.bf16.msra.mxu0 %v5929_v1  ;;  %v5932_v4 = vld [vmem:[%s8589_s29 + $0x18] sm:$0xff]   ;;  %v5933_v5 = vld [vmem:[%s8589_s29 + $0x20] sm:$0xff]   ;;  %v5934_v6 = vld [vmem:[%s8589_s29 + $0x28] sm:$0xff]  }
   0xa   :  { %5412 = vmatprep.subr.bf16.mxu0 %v8584_v0  ;;  %v5935_v7 = vld [vmem:[%s8589_s29 + $0x30] sm:$0xff]   ;;  %v5936_v8 = vld [vmem:[%s8589_s29 + $0x38] sm:$0xff]   ;;  %v5937_v9 = vld [vmem:[%s8590_s19] sm:$0xff]  }
   0xb   :  { %v5938_v10 = vld [vmem:[%s8590_s19 + $0x8] sm:$0xff]   ;;  %v5939_v11 = vld [vmem:[%s8590_s19 + $0x10] sm:$0xff]   ;;  %v213_v12 = vld [vmem:[%s8591_s23] sm:$0xff] }
   0xc   :  { %v214_v17 = vld [vmem:[%s8591_s23 + $0x8] sm:$0xff]  ;;  %v215_v20 = vld [vmem:[%s8591_s23 + $0x10] sm:$0xff]  ;;  %v5946_v1 = vld [vmem:[%s8562_s6 + $0x18] ss:$12 sps:$4 sm:$0xff]  }
   0xd   :  { %5413 = vmatpush3.bf16.msra.mxu0 %v5930_v2  ;;  %v5947_v2 = vld [vmem:[%s8562_s6 + $0x20] ss:$12 sps:$4 sm:$0xff]   ;;  %505 = vmatpush1.bf16.msra.mxu1 %v5946_v1 }
   0xe   :  { %5414 = vmatprep.subr.bf16.mxu0 %v8584_v0 }
  0x11   :  { %5415 = vmatpush3.bf16.msra.mxu0 %v5931_v3 }
  0x12   :  { %5416 = vmatprep.subr.bf16.mxu0 %v8584_v0 }
  0x15   :  { %5417 = vmatpush3.bf16.msra.mxu0 %v5932_v4 }
  0x16   :  { %5418 = vmatprep.subr.bf16.mxu0 %v8584_v0 }
  0x19   :  { %5419 = vmatpush3.bf16.msra.mxu0 %v5933_v5 }
  0x1a   :  { %5420 = vmatprep.subr.bf16.mxu0 %v8584_v0 }
  0x1d   :  { %5421 = vmatpush3.bf16.msra.mxu0 %v5934_v6 }
  0x1e   :  { %5422 = vmatprep.subr.bf16.mxu0 %v8584_v0 }
  0x21   :  { %5423 = vmatpush3.bf16.msra.mxu0 %v5935_v7  ;;  %v5948_v7 = vld [vmem:[%s8562_s6 + $0x34] ss:$12 sps:$4 sm:$0xff]  }
  0x22   :  { %5424 = vmatprep.subr.bf16.mxu0 %v8584_v0  ;;  %506 = vmatprep.subr.bf16.mxu1 %v5948_v7 }
  0x25   :  { %5425 = vmatpush3.bf16.msra.mxu0 %v5936_v8 }
  0x26   :  { %5438 = vmatprep.subr.bf16.mxu0 %v8584_v0 }
  0x28   :  { %5427 = vmatmul.mubr.bf16.vlgmr.msra.gmra.mrb[0].mxu0 %v5937_v9  ;;  %v5950_v9 = vld [vmem:[%s8562_s6 + $0x30] ss:$12 sps:$4 sm:$0xff]  }
  0x29   :  { %5430 = vmatprep.mubr.msk.bf16.mxu0 %vm6395_vm0, %v8584_v0  ;;  %5439 = vmatpush3.bf16.msra.mxu0 %v5943_v35 }
  0x2a   :  { %5440 = vmatprep.subr.bf16.mxu0 %v8584_v0  ;;  %507 = vmatpush1.bf16.msra.mxu1 %v5950_v9 }
  0x2d   :  { %5441 = vmatpush3.bf16.msra.mxu0 %v5947_v2 }
  0x2e   :  { %5442 = vmatprep.subr.bf16.mxu0 %v8584_v0 }
  0x30   :  { %5431 = vmatmul.mubr.bf16.gmra.mrb[4].mxu0 %v5938_v10  ;;  %v5951_v10 = vld [vmem:[%s8562_s6 + $0x38] ss:$12 sps:$4 sm:$0xff]  }
  0x31   :  { %5434 = vmatprep.mubr.msk.bf16.mxu0 %vm6395_vm0, %v8584_v0  ;;  %5443 = vmatpush3.bf16.msra.mxu0 %v5951_v10 }
  0x32   :  { %5444 = vmatprep.subr.bf16.mxu0 %v8584_v0 }
  0x38   :  { %5435 = vmatmul.mubr.bf16.gmra.mrb[8].mxu0 %v5939_v11  ;;  %v5952_v11 = vld [vmem:[%s8562_s6 + $0x4c] ss:$12 sps:$4 sm:$0xff]  }
  0x39   :  { %5454 = vmatprep.mubr.msk.bf16.mxu0 %vm6395_vm0, %v8584_v0  ;;  %508 = vmatprep.subr.bf16.mxu1 %v5952_v11 }
  0xfb   :  { %v190_v13 = vpop.f32.mrb[0].mxu0 }
  0xfc   :  { %v6545_v14 = vadd.f32 %v213_v12, %v190_v13  ;;  %v5428_v15 = vpop.f32.mrb[1].mxu0  ;;  %v5955_v13 = vld [vmem:[%s8562_s6 + $0x50] ss:$12 sps:$4 sm:$0xff]  }
  0xfd   :  { %v193_v16 = vpop.f32.mrb[2].mxu0  ;;  %5445 = vmatpush3.bf16.msra.mxu0 %v5955_v13  ;;  %v5956_v15 = vld [vmem:[%s8562_s6 + $0x64] ss:$12 sps:$4 sm:$0xff]  }
  0xfe   :  { %224 = vadd.xlane.f32.xlu0 %v6545_v14  ;;  %v5429_v18 = vpop.f32.mrb[3].mxu0  ;;  %v6551_v19 = vadd.f32 %v214_v17, %v193_v16  ;;  %5446 = vmatprep.subr.bf16.mxu0 %v8584_v0  ;;  %v5958_v16 = vld [vmem:[%s8562_s6 + $0x60] ss:$12 sps:$4 sm:$0xff]  }
  0xff   :  { %v5960_v18 = vld [vmem:[%s8562_s6 + $0x7c] ss:$12 sps:$4 sm:$0xff]  }
 0x102   :  { %226 = vadd.xlane.f32.xlu0 %v6551_v19 }
 0x103   :  { %v198_v21 = vpop.f32.mrb[4].mxu0 }
 0x104   :  { %v6557_v22 = vadd.f32 %v215_v20, %v198_v21  ;;  %v5432_v23 = vpop.f32.mrb[5].mxu0  ;;  %v5963_v21 = vld [vmem:[%s8562_s6 + $0x80] ss:$12 sps:$4 sm:$0xff]  }
 0x105   :  { %v201_v24 = vpop.f32.mrb[6].mxu0  ;;  %v5964_v23 = vld [vmem:[%s8562_s6 + $0x94] ss:$12 sps:$4 sm:$0xff]  }
 0x106   :  { %228 = vadd.xlane.f32.xlu1 %v6557_v22  ;;  %v5433_v25 = vpop.f32.mrb[7].mxu0  ;;  %v6560_v26 = vadd.f32 %v213_v12, %v201_v24  ;;  %v5954_v12 = vld [vmem:[%s8562_s6 + $0x48] ss:$12 sps:$4 sm:$0xff]   ;;  %v5966_v24 = vld [vmem:[%s8562_s6 + $0x90] ss:$12 sps:$4 sm:$0xff]  }
 0x107   :  { %509 = vmatpush1.bf16.msra.mxu1 %v5954_v12  ;;  %v5967_v25 = vld [vmem:[%s8562_s6 + $0x98] ss:$12 sps:$4 sm:$0xff]  }
 0x108   :  { %510 = vmatprep.subr.bf16.mxu1 %v5956_v15 }
 0x10a   :  { %230 = vadd.xlane.f32.xlu1 %v6560_v26 }
 0x10b   :  { %v206_v27 = vpop.f32.mrb[8].mxu0  ;;  %511 = vmatpush1.bf16.msra.mxu1 %v5958_v16 }
 0x10c   :  { %v6563_v28 = vadd.f32 %v214_v17, %v206_v27  ;;  %v5436_v29 = vpop.f32.mrb[9].mxu0  ;;  %v5959_v17 = vld [vmem:[%s8562_s6 + $0x68] ss:$12 sps:$4 sm:$0xff]   ;;  %512 = vmatprep.subr.bf16.mxu1 %v5960_v18  ;;  %v5968_v27 = vld [vmem:[%s8562_s6 + $0xac] ss:$12 sps:$4 sm:$0xff]  }
 0x10d   :  { %v209_v30 = vpop.f32.mrb[10].mxu0  ;;  %5447 = vmatpush3.bf16.msra.mxu0 %v5959_v17  ;;  %v5970_v29 = vld [vmem:[%s8562_s6 + $0xa8] ss:$12 sps:$4 sm:$0xff]  }
 0x10e   :  { %v6565_v31 = vadd.f32 %v215_v20, %v209_v30  ;;  %232 = vadd.xlane.f32.xlu0 %v6563_v28  ;;  %v5437_v32 = vpop.f32.mrb[11].mxu0  ;;  %5448 = vmatprep.subr.bf16.mxu0 %v8584_v0  ;;  %v5962_v20 = vld [vmem:[%s8562_s6 + $0x78] ss:$12 sps:$4 sm:$0xff]   ;;  %v5971_v30 = vld [vmem:[%s8562_s6 + $0xb0] ss:$12 sps:$4 sm:$0xff]  }
 0x10f   :  { %513 = vmatpush1.bf16.msra.mxu1 %v5962_v20  ;;  %v8582_v32 = vmov 0  }
 0x110   :  { %234 = vadd.xlane.f32.xlu1 %v6565_v31  ;;  %514 = vmatprep.subr.bf16.mxu1 %v5964_v23 }
 0x111   :  { %5449 = vmatpush3.bf16.msra.mxu0 %v5963_v21  ;;  %534 = vmatprep.mubr.bf16.mxu1 %v8582_v32 }
 0x112   :  { %5450 = vmatprep.subr.bf16.mxu0 %v8584_v0 }
 0x113   :  { %515 = vmatpush1.bf16.msra.mxu1 %v5966_v24 }
 0x114   :  { %516 = vmatprep.subr.bf16.mxu1 %v5968_v27 }
 0x115   :  { %5451 = vmatpush3.bf16.msra.mxu0 %v5967_v25  ;;  %v357_v25 = vld [vmem:[%s8565_s7] sm:$0x7] }
 0x116   :  { %5452 = vmatprep.subr.bf16.mxu0 %v8584_v0 }
 0x117   :  { %517 = vmatpush1.bf16.msra.mxu1 %v5970_v29 }
 0x119   :  { %5453 = vmatpush3.bf16.msra.mxu0 %v5971_v30 }
 0x18b   :  { %v225_v39 = vpop.xlane.xlu0 %224 }
 0x18c   :  { %v236_v40 = vmul.f32 0.03125, %v225_v39 }
 0x18e   :  { %v242_v41 = vsub.f32 %v6545_v14, %v236_v40 }
 0x18f   :  { %v227_v42 = vpop.xlane.xlu0 %226 }
 0x190   :  { %v237_v43 = vmul.f32 0.03125, %v227_v42  ;;  %v6589_v44 = vsel %vm62_vm1, %v242_v41, 0.0 }
 0x191   :  { %v256_v45 = vmul.f32 %v6589_v44, %v6589_v44 }
 0x192   :  { %v243_v46 = vsub.f32 %v6551_v19, %v237_v43 }
 0x193   :  { %v229_v47 = vpop.xlane.xlu1 %228  ;;  %262 = vadd.xlane.f32.xlu0 %v256_v45 }
 0x194   :  { %v238_v48 = vmul.f32 0.03125, %v229_v47  ;;  %v6596_v49 = vsel %vm62_vm1, %v243_v46, 0.0 }
 0x195   :  { %v257_v50 = vmul.f32 %v6596_v49, %v6596_v49 }
 0x196   :  { %v244_v51 = vsub.f32 %v6557_v22, %v238_v48 }
 0x197   :  { %v231_v52 = vpop.xlane.xlu1 %230  ;;  %264 = vadd.xlane.f32.xlu1 %v257_v50 }
 0x198   :  { %v239_v53 = vmul.f32 0.03125, %v231_v52  ;;  %v6603_v54 = vsel %vm62_vm1, %v244_v51, 0.0 }
 0x199   :  { %v258_v55 = vmul.f32 %v6603_v54, %v6603_v54 }
 0x19a   :  { %v245_v56 = vsub.f32 %v6560_v26, %v239_v53  ;;  %v4943_v53 = vld [vmem:[%s8563_s4] ss:$0 sm:$0xff] }
 0x19b   :  { %266 = vadd.xlane.f32.xlu0 %v258_v55  ;;  %v233_v57 = vpop.xlane.xlu0 %232 }
 0x19c   :  { %v240_v58 = vmul.f32 0.03125, %v233_v57  ;;  %v6610_v59 = vsel %vm62_vm1, %v245_v56, 0.0 }
 0x19d   :  { %v235_v60 = vpop.xlane.xlu1 %234  ;;  %v259_v61 = vmul.f32 %v6610_v59, %v6610_v59 }
 0x19e   :  { %v246_v62 = vsub.f32 %v6563_v28, %v240_v58  ;;  %v241_v63 = vmul.f32 0.03125, %v235_v60 }
 0x19f   :  { %268 = vadd.xlane.f32.xlu1 %v259_v61 }
 0x1a0   :  { %v247_v3 = vsub.f32 %v6565_v31, %v241_v63  ;;  %v6624_v4 = vsel %vm62_vm1, %v246_v62, 0.0  ;;  %v4944_v63 = vld [vmem:[%s8564_s5] ss:$0 sm:$0xff] }
 0x1a1   :  { %v260_v5 = vmul.f32 %v6624_v4, %v6624_v4 }
 0x1a2   :  { %v6630_v6 = vsel %vm62_vm1, %v247_v3, 0.0 }
 0x1a3   :  { %270 = vadd.xlane.f32.xlu0 %v260_v5  ;;  %v261_v8 = vmul.f32 %v6630_v6, %v6630_v6 }
 0x1a5   :  { %272 = vadd.xlane.f32.xlu1 %v261_v8 }
 0x220   :  { %v263_v33 = vpop.xlane.xlu0 %262 }
 0x221   :  { %v274_v34 = vmul.f32 0.03125, %v263_v33 }
 0x223   :  { %v280_v35 = vadd.f32 1e-06, %v274_v34 }
 0x224   :  { %v265_v36 = vpop.xlane.xlu1 %264 }
 0x225   :  { %6084 = vrsqrt.f32 %v280_v35  ;;  %v275_v39 = vmul.f32 0.03125, %v265_v36 }
 0x227   :  { %v281_v40 = vadd.f32 1e-06, %v275_v39 }
 0x228   :  { %v267_v41 = vpop.xlane.xlu0 %266 }
 0x229   :  { %6086 = vrsqrt.f32 %v281_v40  ;;  %v276_v42 = vmul.f32 0.03125, %v267_v41  ;;  %v6743_v41 = vld [vmem:[%s8566_s3] ss:$0 sm:$0xff] }
 0x22b   :  { %v282_v43 = vadd.f32 1e-06, %v276_v42  ;;  %v6748_v42 = vld [vmem:[%s8566_s3 + $0x1] ss:$0 sm:$0xff] }
 0x22c   :  { %v269_v45 = vpop.xlane.xlu1 %268 }
 0x22d   :  { %6088 = vrsqrt.f32 %v282_v43  ;;  %v277_v46 = vmul.f32 0.03125, %v269_v45 }
 0x22f   :  { %v6085_v47 = vpop.eup %6084  ;;  %v283_v48 = vadd.f32 1e-06, %v277_v46 }
 0x230   :  { %v271_v50 = vpop.xlane.xlu0 %270  ;;  %v292_v51 = vmul.f32 %v6085_v47, %v6589_v44  ;;  %v6754_v47 = vld [vmem:[%s8566_s3 + $0x2] ss:$0 sm:$0xff] }
 0x231   :  { %6090 = vrsqrt.f32 %v283_v48  ;;  %v278_v52 = vmul.f32 0.03125, %v271_v50 }
 0x232   :  { %v273_v55 = vpop.xlane.xlu1 %272  ;;  %v304_v61 = vmul.f32 %v4943_v53, %v292_v51 }
 0x233   :  { %v6087_v56 = vpop.eup %6086  ;;  %v284_v57 = vadd.f32 1e-06, %v278_v52  ;;  %v279_v58 = vmul.f32 0.03125, %v273_v55 }
 0x234   :  { %v293_v60 = vmul.f32 %v6087_v56, %v6596_v49  ;;  %v316_v2 = vadd.f32 %v4944_v63, %v304_v61 }
 0x235   :  { %6092 = vrsqrt.f32 %v284_v57  ;;  %v285_v62 = vadd.f32 1e-06, %v279_v58 }
 0x236   :  { %v305_v44 = vmul.f32 %v4943_v53, %v293_v60 }
 0x237   :  { %v6089_v1 = vpop.eup %6088  ;;  %6094 = vrsqrt.f32 %v285_v62 }
 0x238   :  { %v317_v3 = vadd.f32 %v4944_v63, %v305_v44  ;;  %v294_v5 = vmul.f32 %v6089_v1, %v6603_v54 }
 0x23a   :  { %v322_v7 = vpack.c.bf16 %v317_v3, %v316_v2  ;;  %v306_v9 = vmul.f32 %v4943_v53, %v294_v5 }
 0x23b   :  { %v6091_v8 = vpop.eup %6090 }
 0x23c   :  { %535 = vmatmul.mubr.bf16.vlgmr.msra.gmra.mrb[0].mxu1 %v322_v7  ;;  %5455 = vmatmul.mubr.bf16.vlgmr.msra.gmra.mrb[12].mxu0 %v322_v7  ;;  %v295_v49 = vmul.f32 %v6091_v8, %v6610_v59  ;;  %v318_v12 = vadd.f32 %v4944_v63, %v306_v9 }
 0x23d   :  { %544 = vmatprep.mubr.bf16.mxu1 %v8582_v32  ;;  %5458 = vmatprep.mubr.msk.bf16.mxu0 %vm6395_vm0, %v8584_v0 }
 0x23e   :  { %v307_v10 = vmul.f32 %v4943_v53, %v295_v49 }
 0x23f   :  { %v6093_v11 = vpop.eup %6092 }
 0x240   :  { %v319_v13 = vadd.f32 %v4944_v63, %v307_v10  ;;  %v296_v15 = vmul.f32 %v6093_v11, %v6624_v4  ;;  %v6714_v4 = vshrl.u32 %v60_v37, 7 }
 0x241   :  { %v6095_v16 = vpop.eup %6094 }
 0x242   :  { %v323_v54 = vpack.c.bf16 %v319_v13, %v318_v12  ;;  %v297_v17 = vmul.f32 %v6095_v16, %v6630_v6  ;;  %v308_v18 = vmul.f32 %v4943_v53, %v296_v15  ;;  %v6717_v24 = vsub.s32 0, %v6714_v4  ;;  %v6796_v16 = vld [vmem:[%s8566_s3 + $0x3] ss:$0 sm:$0xff] }
 0x243   :  { %v8581_v6 = vsub.s32 2, %v6714_v4  ;;  %v6724_v27 = vsub.s32 1, %v6714_v4 }
 0x244   :  { %545 = vmatmul.mubr.bf16.gmra.mrb[4].mxu1 %v323_v54  ;;  %5459 = vmatmul.mubr.bf16.gmra.mrb[16].mxu0 %v323_v54  ;;  %v309_v59 = vmul.f32 %v4943_v53, %v297_v17  ;;  %v320_v21 = vadd.f32 %v4944_v63, %v308_v18  ;;  %v6727_v29 = vrot.slane %v357_v25, %v6717_v24 }
 0x245   :  { %554 = vmatprep.mubr.bf16.mxu1 %v8582_v32  ;;  %5462 = vmatprep.mubr.msk.bf16.mxu0 %vm6395_vm0, %v8584_v0  ;;  %v6731_v30 = vrot.slane %v357_v25, %v8581_v6  ;;  %v6734_v37 = vrot.slane %v357_v25, %v6724_v27 }
 0x246   :  { %v321_v20 = vadd.f32 %v4944_v63, %v309_v59 }
 0x248   :  { %v324_v23 = vpack.c.bf16 %v321_v20, %v320_v21 }
 0x24c   :  { %555 = vmatmul.mubr.bf16.gmra.mrb[8].mxu1 %v324_v23  ;;  %5463 = vmatmul.mubr.bf16.gmra.mrb[20].mxu0 %v324_v23 }
 0x30f   :  { %v536_v33 = vpop.f32.mrb[0].mxu1  ;;  %v599_v34 = vpop.f32.mrb[12].mxu0 }
 0x310   :  { %v537_v35 = vadd.f32 %v536_v33, %v6727_v29  ;;  %v6738_v36 = vadd.f32 %v599_v34, %v6731_v30  ;;  %v538_v39 = vpop.f32.mrb[1].mxu1  ;;  %v5456_v40 = vpop.f32.mrb[13].mxu0 }
 0x311   :  { %v539_v43 = vadd.f32 %v538_v39, %v6734_v37  ;;  %v540_v45 = vpop.f32.mrb[2].mxu1  ;;  %v602_v46 = vpop.f32.mrb[14].mxu0 }
 0x312   :  { %v622_v48 = vmul.f32 0.35355338, %v537_v35  ;;  %v541_v50 = vadd.f32 %v540_v45, %v6727_v29  ;;  %v6758_v51 = vadd.f32 %v602_v46, %v6731_v30  ;;  %v542_v52 = vpop.f32.mrb[3].mxu1  ;;  %v5457_v53 = vpop.f32.mrb[15].mxu0  ;;  %v732_v58 = vmul.f32 %v6743_v41, %v6738_v36 }
 0x313   :  { %v543_v55 = vadd.f32 %v542_v52, %v6734_v37  ;;  %v692_v56 = vmul.f32 %v6743_v41, %v539_v43  ;;  %v695_v57 = vmul.f32 %v6748_v42, %v539_v43  ;;  %v698_v63 = vmul.f32 %v6754_v47, %v539_v43 }
 0x314   :  { %v623_v60 = vmul.f32 0.35355338, %v541_v50  ;;  %v652_v61 = vmul.f32 %v6743_v41, %v622_v48  ;;  %v6767_v62 = vmul.f32 %v6748_v42, %v622_v48  ;;  %v733_v3 = vmul.f32 %v6743_v41, %v6758_v51 }
 0x315   :  { %v693_v44 = vmul.f32 %v6743_v41, %v543_v55  ;;  %v696_v1 = vmul.f32 %v6748_v42, %v543_v55  ;;  %v699_v2 = vmul.f32 %v6754_v47, %v543_v55  ;;  %v6780_v8 = vmul.f32 %v6754_v47, %v622_v48 }
 0x316   :  { %v653_v5 = vmul.f32 %v6743_v41, %v623_v60  ;;  %v6777_v7 = vmul.f32 %v6748_v42, %v623_v60  ;;  %v6783_v49 = vmul.f32 %v6754_v47, %v623_v60  ;;  %v6791_v15 = vpack.c.bf16 %v733_v3, %v732_v58 }
 0x317   :  { %v546_v9 = vpop.f32.mrb[4].mxu1  ;;  %v6785_v10 = vpop.f32.mrb[16].mxu0  ;;  %v716_v11 = vpack.c.bf16 %v693_v44, %v692_v56  ;;  %v6787_v12 = vpack.c.bf16 %v696_v1, %v695_v57  ;;  %v6789_v13 = vpack.c.bf16 %v699_v2, %v698_v63  ;;  %v702_v33 = vmul.f32 %v6796_v16, %v543_v55 }
 0x318   :  { %v548_v54 = vpop.f32.mrb[5].mxu1  ;;  %v5460_v17 = vpop.f32.mrb[17].mxu0  ;;  %v676_v18 = vpack.c.bf16 %v653_v5, %v652_v61  ;;  %v678_v59 = vpack.c.bf16 %v6777_v7, %v6767_v62  ;;  %v680_v25 = vpack.c.bf16 %v6783_v49, %v6780_v8  ;;  %v547_v34 = vadd.f32 %v546_v9, %v6727_v29 }
 0x319   :  { %v6801_v20 = vadd.f32 %v548_v54, %v6734_v37  ;;  %v550_v21 = vpop.f32.mrb[6].mxu1  ;;  %v610_v23 = vpop.f32.mrb[18].mxu0  ;;  %5466 = vmatprep.subr.bf16.mxu1 %v716_v11  ;;  %v701_v40 = vmul.f32 %v6796_v16, %v539_v43  ;;  %v6817_v58 = vmul.f32 %v6796_v16, %v622_v48  ;;  %v6820_v43 = vmul.f32 %v6796_v16, %v623_v60 }
 0x31a   :  { %v552_v35 = vpop.f32.mrb[7].mxu1  ;;  %v5461_v39 = vpop.f32.mrb[19].mxu0  ;;  %5467 = vmatpush3.bf16.xpose.msra.mxu1 %v716_v11  ;;  %5470 = vmatprep.mubr.bf16.mxu1 %v676_v18  ;;  %v551_v46 = vadd.f32 %v550_v21, %v6727_v29  ;;  %v6813_v53 = vmul.f32 0.35355338, %v547_v34 }
 0x31b   :  { %v694_v45 = vmul.f32 %v6743_v41, %v6801_v20  ;;  %v6811_v50 = vpack.c.bf16 %v702_v33, %v701_v40  ;;  %v553_v55 = vadd.f32 %v552_v35, %v6734_v37  ;;  %v697_v9 = vmul.f32 %v6748_v42, %v6801_v20 }
 0x31c   :  { %v625_v61 = vmul.f32 0.35355338, %v551_v46  ;;  %v682_v48 = vpack.c.bf16 %v6820_v43, %v6817_v58  ;;  %v654_v60 = vmul.f32 %v6743_v41, %v6813_v53  ;;  %v736_v39 = vmul.f32 %v6748_v42, %v6758_v51 }
 0x31d   :  { %v717_v52 = vpack.c.bf16 %v694_v45, %v694_v45  ;;  %v704_v18 = vmul.f32 %v6743_v41, %v553_v55  ;;  %v710_v21 = vmul.f32 %v6754_v47, %v553_v55 }
 0x31e   :  { %v664_v40 = vmul.f32 %v6743_v41, %v625_v61  ;;  %v6845_v46 = vmul.f32 %v6754_v47, %v625_v61 }
 0x31f   :  { %v556_v56 = vpop.f32.mrb[8].mxu1  ;;  %v615_v57 = vpop.f32.mrb[20].mxu0  ;;  %5468 = vmatprep.subr.bf16.mxu1 %v717_v52 }
 0x320   :  { %v557_v63 = vadd.f32 %v556_v56, %v6727_v29  ;;  %v558_v44 = vpop.f32.mrb[9].mxu1  ;;  %v5464_v1 = vpop.f32.mrb[21].mxu0 }
 0x321   :  { %v559_v2 = vadd.f32 %v558_v44, %v6734_v37  ;;  %v560_v3 = vpop.f32.mrb[10].mxu1  ;;  %v6824_v5 = vpop.f32.mrb[22].mxu0  ;;  %v735_v44 = vmul.f32 %v6748_v42, %v6738_v36  ;;  %v677_v1 = vpack.c.bf16 %v654_v60, %v654_v60  ;;  %v719_v60 = vpack.c.bf16 %v697_v9, %v697_v9 }
 0x322   :  { %v626_v11 = vmul.f32 0.35355338, %v557_v63  ;;  %v562_v54 = vpop.f32.mrb[11].mxu1  ;;  %v5465_v17 = vpop.f32.mrb[23].mxu0  ;;  %5469 = vmatpush3.bf16.xpose.msra.mxu1 %v717_v52  ;;  %v6880_v9 = vmul.f32 %v6796_v16, %v625_v61 }
 0x323   :  { %v6835_v33 = vadd.f32 %v562_v54, %v6734_v37  ;;  %5474 = vmatprep.subr.bf16.mxu1 %v6787_v12  ;;  %v705_v34 = vmul.f32 %v6743_v41, %v559_v2  ;;  %v711_v35 = vmul.f32 %v6754_v47, %v559_v2  ;;  %v611_v54 = vadd.f32 %v610_v23, %v6731_v30 }
 0x324   :  { %v665_v45 = vmul.f32 %v6743_v41, %v626_v11  ;;  %v6848_v52 = vmul.f32 %v6754_v47, %v626_v11  ;;  %v6857_v0 = vpack.c.bf16 %v736_v39, %v735_v44  ;;  %v6869_v39 = vmul.f32 %v6748_v42, %v626_v11 }
 0x325   :  { %v724_v37 = vpack.c.bf16 %v705_v34, %v704_v18  ;;  %v706_v56 = vmul.f32 %v6743_v41, %v6835_v33  ;;  %v728_v63 = vpack.c.bf16 %v711_v35, %v710_v21  ;;  %v707_v18 = vmul.f32 %v6748_v42, %v553_v55 }
 0x326   :  { %v684_v17 = vpack.c.bf16 %v665_v45, %v664_v40  ;;  %v688_v6 = vpack.c.bf16 %v6848_v52, %v6845_v46  ;;  %v708_v34 = vmul.f32 %v6748_v42, %v559_v2  ;;  %v616_v21 = vadd.f32 %v615_v57, %v6731_v30 }
 0x327   :  { %5498 = vmatprep.subr.bf16.mxu0 %v724_v37  ;;  %v725_v32 = vpack.c.bf16 %v706_v56, %v706_v56  ;;  %v561_v35 = vadd.f32 %v560_v3, %v6727_v29  ;;  %v6866_v40 = vmul.f32 %v6748_v42, %v625_v61  ;;  %v713_v57 = vmul.f32 %v6796_v16, %v553_v55 }
 0x328   :  { %5499 = vmatpush3.bf16.xpose.msra.mxu0 %v724_v37  ;;  %5502 = vmatprep.mubr.bf16.mxu0 %v684_v17  ;;  %v6863_v23 = vpack.c.bf16 %v708_v34, %v707_v18  ;;  %v714_v3 = vmul.f32 %v6796_v16, %v559_v2  ;;  %v6883_v45 = vmul.f32 %v6796_v16, %v626_v11 }
 0x329   :  { %5471 = vmatmul.mubr.bf16.vlgmr.msra.gmra.mrb[12].mxu1 %v677_v1  ;;  %5500 = vmatprep.subr.bf16.mxu0 %v725_v32  ;;  %v686_v29 = vpack.c.bf16 %v6869_v39, %v6866_v40  ;;  %v6885_v46 = vmul.f32 0.35355338, %v561_v35  ;;  %v744_v62 = vmul.f32 %v6743_v41, %v611_v54  ;;  %v745_v7 = vmul.f32 %v6743_v41, %v616_v21 }
 0x32a   :  { %5475 = vmatpush3.bf16.xpose.msra.mxu1 %v6787_v12  ;;  %5478 = vmatprep.mubr.bf16.mxu1 %v678_v59  ;;  %v6887_v12 = vpack.c.bf16 %v714_v3, %v713_v57  ;;  %v690_v59 = vpack.c.bf16 %v6883_v45, %v6880_v9  ;;  %v747_v2 = vmul.f32 %v6748_v42, %v611_v54 }
 0x32b   :  { %5476 = vmatprep.subr.bf16.mxu1 %v719_v60  ;;  %v6893_v55 = vpack.c.bf16 %v745_v7, %v744_v62  ;;  %v748_v61 = vmul.f32 %v6748_v42, %v616_v21  ;;  %v738_v11 = vmul.f32 %v6754_v47, %v6738_v36  ;;  %v739_v52 = vmul.f32 %v6754_v47, %v6758_v51 }
 0x32c   :  { %v666_v37 = vmul.f32 %v6743_v41, %v6885_v46  ;;  %v741_v1 = vmul.f32 %v6796_v16, %v6738_v36  ;;  %v657_v17 = vmul.f32 %v6748_v42, %v6813_v53  ;;  %v712_v18 = vmul.f32 %v6754_v47, %v6835_v33 }
 0x32d   :  { %v6903_v56 = vpack.c.bf16 %v748_v61, %v747_v2  ;;  %v6905_v44 = vpack.c.bf16 %v739_v52, %v738_v11  ;;  %v750_v34 = vmul.f32 %v6754_v47, %v611_v54  ;;  %v751_v35 = vmul.f32 %v6754_v47, %v616_v21 }
 0x32e   :  { %v685_v36 = vpack.c.bf16 %v666_v37, %v666_v37  ;;  %v754_v62 = vmul.f32 %v6796_v16, %v616_v21  ;;  %v679_v7 = vpack.c.bf16 %v657_v17, %v657_v17  ;;  %v729_v2 = vpack.c.bf16 %v712_v18, %v712_v18 }
 0x32f   :  { %v6922_v3 = vpack.c.bf16 %v751_v35, %v750_v34  ;;  %v669_v58 = vmul.f32 %v6748_v42, %v6885_v46 }
 0x330   :  { %5501 = vmatpush3.bf16.xpose.msra.mxu0 %v725_v32  ;;  %v742_v32 = vmul.f32 %v6796_v16, %v6758_v51  ;;  %v753_v51 = vmul.f32 %v6796_v16, %v611_v54  ;;  %v6934_v54 = vadd.f32 %v6785_v10, %v6731_v30  ;;  %v703_v10 = vmul.f32 %v6796_v16, %v6801_v20 }
 0x331   :  { %5514 = vmatprep.subr.bf16.mxu0 %v728_v63  ;;  %v687_v43 = vpack.c.bf16 %v669_v58, %v669_v58 }
 0x332   :  { %5477 = vmatpush3.bf16.xpose.msra.mxu1 %v719_v60  ;;  %v700_v60 = vmul.f32 %v6754_v47, %v6801_v20  ;;  %v6920_v57 = vpack.c.bf16 %v742_v32, %v741_v1  ;;  %v6926_v61 = vpack.c.bf16 %v754_v62, %v753_v51  ;;  %v734_v8 = vmul.f32 %v6743_v41, %v6934_v54 }
 0x333   :  { %5482 = vmatprep.subr.bf16.mxu1 %v6789_v13  ;;  %v723_v21 = vpack.c.bf16 %v703_v10, %v703_v10  ;;  %v709_v20 = vmul.f32 %v6748_v42, %v6835_v33  ;;  %v675_v42 = vmul.f32 %v6796_v16, %v6885_v46 }
 0x334   :  { %v721_v11 = vpack.c.bf16 %v700_v60, %v700_v60 }
 0x335   :  { %v727_v52 = vpack.c.bf16 %v709_v20, %v709_v20  ;;  %v691_v40 = vpack.c.bf16 %v675_v42, %v675_v42 }
 0x337   :  { %5503 = vmatmul.mubr.bf16.vlgmr.msra.gmra.mrb[24].mxu0 %v685_v36 }
 0x338   :  { %5515 = vmatpush3.bf16.xpose.msra.mxu0 %v728_v63  ;;  %5518 = vmatprep.mubr.bf16.mxu0 %v688_v6  ;;  %v672_v6 = vmul.f32 %v6754_v47, %v6885_v46  ;;  %v757_v63 = vpack.c.bf16 %v734_v8, %v734_v8 }
 0x339   :  { %5479 = vmatmul.mubr.bf16.vlgmr.msra.gmra.mrb[16].mxu1 %v679_v7  ;;  %5516 = vmatprep.subr.bf16.mxu0 %v729_v2 }
 0x33a   :  { %5483 = vmatpush3.bf16.xpose.msra.mxu1 %v6789_v13  ;;  %5486 = vmatprep.mubr.bf16.mxu1 %v680_v25  ;;  %v660_v13 = vmul.f32 %v6754_v47, %v6813_v53  ;;  %v689_v49 = vpack.c.bf16 %v672_v6, %v672_v6  ;;  %v1471_v47 = vsel %vm1469_vm2, %v757_v63, 0 }
 0x33b   :  { %5484 = vmatprep.subr.bf16.mxu1 %v721_v11 }
 0x33c   :  { %v681_v25 = vpack.c.bf16 %v660_v13, %v660_v13 }
 0x340   :  { %5517 = vmatpush3.bf16.xpose.msra.mxu0 %v729_v2 }
 0x341   :  { %5530 = vmatprep.subr.bf16.mxu0 %v6791_v15 }
 0x342   :  { %5485 = vmatpush3.bf16.xpose.msra.mxu1 %v721_v11 }
 0x343   :  { %5490 = vmatprep.subr.bf16.mxu1 %v6811_v50 }
 0x347   :  { %5519 = vmatmul.mubr.bf16.vlgmr.msra.gmra.mrb[28].mxu0 %v689_v49 }
 0x348   :  { %5531 = vmatpush3.bf16.msra.mxu0 %v6791_v15  ;;  %v663_v15 = vmul.f32 %v6796_v16, %v6813_v53  ;;  %v715_v53 = vmul.f32 %v6796_v16, %v6835_v33 }
 0x349   :  { %5487 = vmatmul.mubr.bf16.vlgmr.msra.gmra.mrb[20].mxu1 %v681_v25  ;;  %5910 = vmatprep.subr.msk.bf16.mxu0 %vm1469_vm2, %v757_v63 }
 0x34a   :  { %5491 = vmatpush3.bf16.xpose.msra.mxu1 %v6811_v50  ;;  %5494 = vmatprep.mubr.bf16.mxu1 %v682_v48  ;;  %v683_v50 = vpack.c.bf16 %v663_v15, %v663_v15  ;;  %v731_v48 = vpack.c.bf16 %v715_v53, %v715_v53 }
 0x34b   :  { %5492 = vmatprep.subr.bf16.mxu1 %v723_v21 }
 0x34c   :  { %5533 = vmatpush3.bf16.msra.mxu0 %v1471_v47 }
 0x34d   :  { %5538 = vmatprep.subr.bf16.mxu0 %v6857_v0 }
 0x352   :  { %5493 = vmatpush3.bf16.xpose.msra.mxu1 %v723_v21 }
 0x353   :  { %5506 = vmatprep.subr.bf16.mxu1 %v6863_v23 }
 0x359   :  { %5495 = vmatmul.mubr.bf16.vlgmr.msra.gmra.mrb[24].mxu1 %v683_v50 }
 0x35a   :  { %5507 = vmatpush3.bf16.xpose.msra.mxu1 %v6863_v23  ;;  %5510 = vmatprep.mubr.bf16.mxu1 %v686_v29  ;;  %v6974_v23 = vadd.f32 %v6824_v5, %v6731_v30 }
 0x35b   :  { %5508 = vmatprep.subr.bf16.mxu1 %v727_v52 }
 0x35c   :  { %v746_v33 = vmul.f32 %v6743_v41, %v6974_v23 }
 0x35e   :  { %v765_v39 = vpack.c.bf16 %v746_v33, %v746_v33 }
 0x360   :  { %v1699_v29 = vsel %vm1469_vm2, %v765_v39, 0 }
 0x362   :  { %5509 = vmatpush3.bf16.xpose.msra.mxu1 %v727_v52 }
 0x363   :  { %5522 = vmatprep.subr.bf16.mxu1 %v6887_v12 }
 0x369   :  { %5511 = vmatmul.mubr.bf16.vlgmr.msra.gmra.mrb[28].mxu1 %v687_v43 }
 0x36a   :  { %5523 = vmatpush3.bf16.xpose.msra.mxu1 %v6887_v12  ;;  %5526 = vmatprep.mubr.bf16.mxu1 %v690_v59 }
 0x36b   :  { %5524 = vmatprep.subr.bf16.mxu1 %v731_v48 }
 0x372   :  { %5525 = vmatpush3.bf16.xpose.msra.mxu1 %v731_v48 }
 0x373   :  { %5562 = vmatprep.subr.bf16.mxu1 %v6893_v55 }
 0x379   :  { %5527 = vmatmul.mubr.bf16.vlgmr.msra.gmra.mrb[32].mxu1 %v691_v40 }
 0x37a   :  { %5563 = vmatpush3.bf16.msra.mxu1 %v6893_v55 }
 0x37b   :  { %5914 = vmatprep.subr.msk.bf16.mxu1 %vm1469_vm2, %v765_v39 }
 0x37e   :  { %5565 = vmatpush3.bf16.msra.mxu1 %v1699_v29 }
 0x37f   :  { %5570 = vmatprep.subr.bf16.mxu1 %v6903_v56 }
 0x3fc   :  { %v5472_v30 = vpop.f32.mrb[12].mxu1 }
 0x3fd   :  { %v806_v16 = vpop.f32.mrb[13].mxu1  ;;  %v6994_v46 = vsel %vm63_vm3, %v5472_v30, -1e+30 }
 0x3fe   :  { %v6988_v41 = vsel %vm63_vm3, %v806_v16, -1e+30  ;;  %v5473_v5 = vpop.f32.mrb[14].mxu1  ;;  %v1189_v55 = vsel %vm1182_vm4, %v6994_v46, -inf }
 0x3ff   :  { %v809_v9 = vpop.f32.mrb[15].mxu1  ;;  %v1183_v45 = vsel %vm1182_vm4, %v6988_v41, -inf }
 0x400   :  { %v6998_v12 = vsel %vm63_vm3, %v809_v9, -1e+30  ;;  %1184 = vmax.xlane.f32.xlu0 %v1183_v45 }
 0x401   :  { %v1186_v59 = vsel %vm1182_vm4, %v6998_v12, -inf }
 0x402   :  { %1187 = vmax.xlane.f32.xlu1 %v1186_v59 }
 0x404   :  { %1190 = vmax.xlane.f32.xlu0 %v1189_v55 }
 0x40a   :  { %v5504_v37 = vpop.f32.mrb[24].mxu0 }
 0x40b   :  { %v998_v1 = vpop.f32.mrb[25].mxu0  ;;  %v7034_v49 = vsel %vm63_vm3, %v5504_v37, -1e+30 }
 0x40c   :  { %v7006_v32 = vsel %vm63_vm3, %v998_v1, -1e+30  ;;  %v5480_v17 = vpop.f32.mrb[16].mxu1  ;;  %v5505_v18 = vpop.f32.mrb[26].mxu0  ;;  %v1225_v25 = vsel %vm1182_vm4, %v7034_v49, -inf }
 0x40d   :  { %v854_v34 = vpop.f32.mrb[17].mxu1  ;;  %v1001_v35 = vpop.f32.mrb[27].mxu0  ;;  %v1219_v60 = vsel %vm1182_vm4, %v7006_v32, -inf  ;;  %v7028_v13 = vsel %vm63_vm3, %v5480_v17, -1e+30 }
 0x40e   :  { %v7012_v36 = vsel %vm63_vm3, %v854_v34, -1e+30  ;;  %v7016_v51 = vsel %vm63_vm3, %v1001_v35, -1e+30  ;;  %v5481_v62 = vpop.f32.mrb[18].mxu1  ;;  %1220 = vmax.xlane.f32.xlu1 %v1219_v60  ;;  %v1198_v10 = vsel %vm1182_vm4, %v7028_v13, -inf }
 0x40f   :  { %v857_v7 = vpop.f32.mrb[19].mxu1  ;;  %v1222_v2 = vsel %vm1182_vm4, %v7016_v51, -inf  ;;  %v1192_v6 = vsel %vm1182_vm4, %v7012_v36, -inf }
 0x410   :  { %v7022_v11 = vsel %vm63_vm3, %v857_v7, -1e+30  ;;  %1223 = vmax.xlane.f32.xlu0 %v1222_v2 }
 0x411   :  { %v1195_v8 = vsel %vm1182_vm4, %v7022_v11, -inf }
 0x412   :  { %1193 = vmax.xlane.f32.xlu1 %v1192_v6 }
 0x414   :  { %1196 = vmax.xlane.f32.xlu0 %v1195_v8 }
 0x416   :  { %1199 = vmax.xlane.f32.xlu1 %v1198_v10 }
 0x418   :  { %1226 = vmax.xlane.f32.xlu0 %v1225_v25 }
 0x41a   :  { %v5520_v63 = vpop.f32.mrb[28].mxu0 }
 0x41b   :  { %v1094_v21 = vpop.f32.mrb[29].mxu0 }
 0x41c   :  { %v5488_v47 = vpop.f32.mrb[20].mxu1  ;;  %v5521_v15 = vpop.f32.mrb[30].mxu0  ;;  %v7088_v7 = vsel %vm63_vm3, %v1094_v21, -1e+30 }
 0x41d   :  { %v902_v20 = vpop.f32.mrb[21].mxu1  ;;  %v1097_v50 = vpop.f32.mrb[31].mxu0  ;;  %v7060_v55 = vsel %vm63_vm3, %v5488_v47, -1e+30  ;;  %v1237_v8 = vsel %vm1182_vm4, %v7088_v7, -inf }
 0x41e   :  { %v7042_v52 = vsel %vm63_vm3, %v902_v20, -1e+30  ;;  %v5489_v58 = vpop.f32.mrb[22].mxu1  ;;  %v1207_v18 = vsel %vm1182_vm4, %v7060_v55, -inf  ;;  %v7094_v6 = vsel %vm63_vm3, %v1097_v50, -1e+30 }
 0x41f   :  { %v905_v53 = vpop.f32.mrb[23].mxu1  ;;  %v1201_v43 = vsel %vm1182_vm4, %v7042_v52, -inf  ;;  %v1240_v47 = vsel %vm1182_vm4, %v7094_v6, -inf  ;;  %v7106_v15 = vsel %vm63_vm3, %v5520_v63, -1e+30 }
 0x420   :  { %v7048_v48 = vsel %vm63_vm3, %v905_v53, -1e+30  ;;  %1202 = vmax.xlane.f32.xlu1 %v1201_v43  ;;  %v1243_v43 = vsel %vm1182_vm4, %v7106_v15, -inf }
 0x421   :  { %v1204_v42 = vsel %vm1182_vm4, %v7048_v48, -inf }
 0x422   :  { %1205 = vmax.xlane.f32.xlu0 %v1204_v42 }
 0x42c   :  { %v5496_v33 = vpop.f32.mrb[24].mxu1 }
 0x42d   :  { %v950_v40 = vpop.f32.mrb[25].mxu1  ;;  %v7100_v10 = vsel %vm63_vm3, %v5496_v33, -1e+30 }
 0x42e   :  { %v5497_v39 = vpop.f32.mrb[26].mxu1  ;;  %v7076_v34 = vsel %vm63_vm3, %v950_v40, -1e+30  ;;  %v1216_v58 = vsel %vm1182_vm4, %v7100_v10, -inf }
 0x42f   :  { %v953_v29 = vpop.f32.mrb[27].mxu1  ;;  %v1210_v62 = vsel %vm1182_vm4, %v7076_v34, -inf }
 0x430   :  { %v7082_v60 = vsel %vm63_vm3, %v953_v29, -1e+30 }
 0x431   :  { %v1213_v2 = vsel %vm1182_vm4, %v7082_v60, -inf }
 0x43c   :  { %v5512_v30 = vpop.f32.mrb[28].mxu1 }
 0x43d   :  { %v1046_v16 = vpop.f32.mrb[29].mxu1  ;;  %v7070_v17 = vsel %vm63_vm3, %v5512_v30, -1e+30 }
 0x43e   :  { %v7054_v5 = vsel %vm63_vm3, %v1046_v16, -1e+30  ;;  %v5513_v9 = vpop.f32.mrb[30].mxu1  ;;  %v1234_v35 = vsel %vm1182_vm4, %v7070_v17, -inf }
 0x43f   :  { %v1049_v45 = vpop.f32.mrb[31].mxu1  ;;  %v1228_v59 = vsel %vm1182_vm4, %v7054_v5, -inf }
 0x440   :  { %v7064_v37 = vsel %vm63_vm3, %v1049_v45, -1e+30  ;;  %1229 = vmax.xlane.f32.xlu1 %v1228_v59 }
 0x441   :  { %v1231_v1 = vsel %vm1182_vm4, %v7064_v37, -inf }
 0x442   :  { %1232 = vmax.xlane.f32.xlu0 %v1231_v1 }
 0x444   :  { %1208 = vmax.xlane.f32.xlu1 %v1207_v18 }
 0x446   :  { %1235 = vmax.xlane.f32.xlu0 %v1234_v35 }
 0x448   :  { %1211 = vmax.xlane.f32.xlu1 %v1210_v62 }
 0x44a   :  { %1214 = vmax.xlane.f32.xlu0 %v1213_v2 }
 0x44c   :  { %v5528_v25 = vpop.f32.mrb[32].mxu1  ;;  %1238 = vmax.xlane.f32.xlu1 %v1237_v8 }
 0x44d   :  { %v1142_v21 = vpop.f32.mrb[33].mxu1  ;;  %v7124_v33 = vsel %vm63_vm3, %v5528_v25, -1e+30 }
 0x44e   :  { %v5529_v20 = vpop.f32.mrb[34].mxu1  ;;  %1241 = vmax.xlane.f32.xlu0 %v1240_v47  ;;  %v7112_v53 = vsel %vm63_vm3, %v1142_v21, -1e+30  ;;  %v1252_v39 = vsel %vm1182_vm4, %v7124_v33, -inf }
 0x44f   :  { %v1145_v50 = vpop.f32.mrb[35].mxu1  ;;  %v1246_v63 = vsel %vm1182_vm4, %v7112_v53, -inf }
 0x450   :  { %1217 = vmax.xlane.f32.xlu1 %v1216_v58  ;;  %v7118_v42 = vsel %vm63_vm3, %v1145_v50, -1e+30 }
 0x451   :  { %v1249_v40 = vsel %vm1182_vm4, %v7118_v42, -inf }
 0x452   :  { %1244 = vmax.xlane.f32.xlu0 %v1243_v43 }
 0x454   :  { %1247 = vmax.xlane.f32.xlu1 %v1246_v63 }
 0x456   :  { %1250 = vmax.xlane.f32.xlu0 %v1249_v40 }
 0x458   :  { %1253 = vmax.xlane.f32.xlu1 %v1252_v39 }
 0x48d   :  { %v1185_v29 = vpop.xlane.xlu0 %1184 }
 0x48e   :  { %v1255_v30 = vsub.f32 %v6988_v41, %v1185_v29 }
 0x48f   :  { %v1188_v16 = vpop.xlane.xlu1 %1187 }
 0x490   :  { %v1279_v9 = vmul.f32 1.442695, %v1255_v30  ;;  %v1256_v45 = vsub.f32 %v6998_v12, %v1188_v16 }
 0x491   :  { %v1191_v59 = vpop.xlane.xlu0 %1190 }
 0x492   :  { %6096 = vpow2.f32 %v1279_v9  ;;  %v1281_v1 = vmul.f32 1.442695, %v1256_v45  ;;  %v1257_v18 = vsub.f32 %v6994_v46, %v1191_v59 }
 0x494   :  { %6098 = vpow2.f32 %v1281_v1  ;;  %v1283_v35 = vmul.f32 1.442695, %v1257_v18 }
 0x496   :  { %6100 = vpow2.f32 %v1283_v35 }
 0x49b   :  { %v1221_v62 = vpop.xlane.xlu1 %1220 }
 0x49c   :  { %v7133_v2 = vpop.eup %6096  ;;  %v1267_v8 = vsub.f32 %v7006_v32, %v1221_v62 }
 0x49d   :  { %v1224_v25 = vpop.xlane.xlu0 %1223  ;;  %v1327_v41 = vsel %vm1182_vm4, %v7133_v2, 0.0 }
 0x49e   :  { %v7138_v21 = vpop.eup %6098  ;;  %v1303_v12 = vmul.f32 1.442695, %v1267_v8  ;;  %v1268_v47 = vsub.f32 %v7016_v51, %v1224_v25  ;;  %1328 = vadd.xlane.f32.xlu0 %v1327_v41 }
 0x49f   :  { %v1194_v20 = vpop.xlane.xlu1 %1193  ;;  %v1330_v46 = vsel %vm1182_vm4, %v7138_v21, 0.0 }
 0x4a0   :  { %v7143_v50 = vpop.eup %6100  ;;  %6102 = vpow2.f32 %v1303_v12  ;;  %v1305_v58 = vmul.f32 1.442695, %v1268_v47  ;;  %v1258_v32 = vsub.f32 %v7012_v36, %v1194_v20  ;;  %1331 = vadd.xlane.f32.xlu1 %v1330_v46 }
 0x4a1   :  { %v1197_v43 = vpop.xlane.xlu0 %1196  ;;  %v1333_v63 = vsel %vm1182_vm4, %v7143_v50, 0.0 }
 0x4a2   :  { %6104 = vpow2.f32 %v1305_v58  ;;  %v1285_v40 = vmul.f32 1.442695, %v1258_v32  ;;  %v1259_v51 = vsub.f32 %v7022_v11, %v1197_v43  ;;  %1334 = vadd.xlane.f32.xlu0 %v1333_v63 }
 0x4a3   :  { %v1200_v39 = vpop.xlane.xlu1 %1199 }
 0x4a4   :  { %6106 = vpow2.f32 %v1285_v40  ;;  %v1287_v29 = vmul.f32 1.442695, %v1259_v51  ;;  %v1260_v30 = vsub.f32 %v7028_v13, %v1200_v39 }
 0x4a5   :  { %v1227_v16 = vpop.xlane.xlu0 %1226 }
 0x4a6   :  { %6108 = vpow2.f32 %v1287_v29  ;;  %v1289_v9 = vmul.f32 1.442695, %v1260_v30  ;;  %v1269_v36 = vsub.f32 %v7034_v49, %v1227_v16 }
 0x4a8   :  { %6110 = vpow2.f32 %v1289_v9  ;;  %v1307_v45 = vmul.f32 1.442695, %v1269_v36 }
 0x4aa   :  { %v7151_v59 = vpop.eup %6102  ;;  %6112 = vpow2.f32 %v1307_v45 }
 0x4ab   :  { %v1363_v1 = vsel %vm1182_vm4, %v7151_v59, 0.0 }
 0x4ac   :  { %v7155_v11 = vpop.eup %6104  ;;  %1364 = vadd.xlane.f32.xlu1 %v1363_v1 }
 0x4ad   :  { %v1203_v18 = vpop.xlane.xlu1 %1202  ;;  %v1366_v13 = vsel %vm1182_vm4, %v7155_v11, 0.0 }
 0x4ae   :  { %v7159_v35 = vpop.eup %6106  ;;  %v1261_v62 = vsub.f32 %v7042_v52, %v1203_v18  ;;  %1367 = vadd.xlane.f32.xlu0 %v1366_v13 }
 0x4af   :  { %v1206_v49 = vpop.xlane.xlu0 %1205  ;;  %v1336_v8 = vsel %vm1182_vm4, %v7159_v35, 0.0 }
 0x4b0   :  { %v7164_v25 = vpop.eup %6108  ;;  %v1291_v41 = vmul.f32 1.442695, %v1261_v62  ;;  %v1262_v12 = vsub.f32 %v7048_v48, %v1206_v49  ;;  %1337 = vadd.xlane.f32.xlu1 %v1336_v8 }
 0x4b1   :  { %v1339_v47 = vsel %vm1182_vm4, %v7164_v25, 0.0 }
 0x4b2   :  { %v7169_v20 = vpop.eup %6110  ;;  %6114 = vpow2.f32 %v1291_v41  ;;  %v1293_v46 = vmul.f32 1.442695, %v1262_v12  ;;  %1340 = vadd.xlane.f32.xlu0 %v1339_v47 }
 0x4b3   :  { %v1342_v52 = vsel %vm1182_vm4, %v7169_v20, 0.0 }
 0x4b4   :  { %v7173_v58 = vpop.eup %6112  ;;  %6116 = vpow2.f32 %v1293_v46  ;;  %1343 = vadd.xlane.f32.xlu1 %v1342_v52 }
 0x4b5   :  { %v1369_v32 = vsel %vm1182_vm4, %v7173_v58, 0.0 }
 0x4b6   :  { %1370 = vadd.xlane.f32.xlu0 %v1369_v32 }
 0x4bc   :  { %v7177_v48 = vpop.eup %6114 }
 0x4bd   :  { %v1345_v43 = vsel %vm1182_vm4, %v7177_v48, 0.0 }
 0x4be   :  { %v7181_v63 = vpop.eup %6116  ;;  %1346 = vadd.xlane.f32.xlu1 %v1345_v43 }
 0x4bf   :  { %v1348_v40 = vsel %vm1182_vm4, %v7181_v63, 0.0 }
 0x4c0   :  { %1349 = vadd.xlane.f32.xlu0 %v1348_v40 }
 0x4cd   :  { %v1230_v51 = vpop.xlane.xlu1 %1229 }
 0x4ce   :  { %v1270_v39 = vsub.f32 %v7054_v5, %v1230_v51 }
 0x4cf   :  { %v1233_v29 = vpop.xlane.xlu0 %1232 }
 0x4d0   :  { %v1309_v30 = vmul.f32 1.442695, %v1270_v39  ;;  %v1271_v16 = vsub.f32 %v7064_v37, %v1233_v29 }
 0x4d1   :  { %v1209_v9 = vpop.xlane.xlu1 %1208 }
 0x4d2   :  { %6118 = vpow2.f32 %v1309_v30  ;;  %v1311_v36 = vmul.f32 1.442695, %v1271_v16  ;;  %v1263_v45 = vsub.f32 %v7060_v55, %v1209_v9 }
 0x4d3   :  { %v1236_v1 = vpop.xlane.xlu0 %1235 }
 0x4d4   :  { %6120 = vpow2.f32 %v1311_v36  ;;  %v1295_v18 = vmul.f32 1.442695, %v1263_v45  ;;  %v1272_v13 = vsub.f32 %v7070_v17, %v1236_v1 }
 0x4d5   :  { %v1212_v62 = vpop.xlane.xlu1 %1211 }
 0x4d6   :  { %6122 = vpow2.f32 %v1295_v18  ;;  %v1313_v49 = vmul.f32 1.442695, %v1272_v13  ;;  %v1264_v8 = vsub.f32 %v7076_v34, %v1212_v62 }
 0x4d7   :  { %v1215_v5 = vpop.xlane.xlu0 %1214 }
 0x4d8   :  { %6124 = vpow2.f32 %v1313_v49  ;;  %v1297_v41 = vmul.f32 1.442695, %v1264_v8  ;;  %v1265_v37 = vsub.f32 %v7082_v60, %v1215_v5 }
 0x4d9   :  { %v1239_v12 = vpop.xlane.xlu1 %1238 }
 0x4da   :  { %6126 = vpow2.f32 %v1297_v41  ;;  %v1299_v47 = vmul.f32 1.442695, %v1265_v37  ;;  %v1273_v55 = vsub.f32 %v7088_v7, %v1239_v12 }
 0x4db   :  { %v1242_v46 = vpop.xlane.xlu0 %1241 }
 0x4dc   :  { %v7192_v52 = vpop.eup %6118  ;;  %6128 = vpow2.f32 %v1299_v47  ;;  %v1315_v17 = vmul.f32 1.442695, %v1273_v55  ;;  %v1274_v32 = vsub.f32 %v7094_v6, %v1242_v46 }
 0x4dd   :  { %v1218_v43 = vpop.xlane.xlu1 %1217  ;;  %v1372_v34 = vsel %vm1182_vm4, %v7192_v52, 0.0 }
 0x4de   :  { %v7197_v40 = vpop.eup %6120  ;;  %6130 = vpow2.f32 %v1315_v17  ;;  %v1317_v60 = vmul.f32 1.442695, %v1274_v32  ;;  %v1266_v51 = vsub.f32 %v7100_v10, %v1218_v43  ;;  %1373 = vadd.xlane.f32.xlu1 %v1372_v34 }
 0x4df   :  { %v1245_v39 = vpop.xlane.xlu0 %1244  ;;  %v1375_v7 = vsel %vm1182_vm4, %v7197_v40, 0.0 }
 0x4e0   :  { %v7202_v29 = vpop.eup %6122  ;;  %6132 = vpow2.f32 %v1317_v60  ;;  %v1301_v30 = vmul.f32 1.442695, %v1266_v51  ;;  %v1275_v6 = vsub.f32 %v7106_v15, %v1245_v39  ;;  %1376 = vadd.xlane.f32.xlu0 %v1375_v7 }
 0x4e1   :  { %v1248_v16 = vpop.xlane.xlu1 %1247  ;;  %v1351_v9 = vsel %vm1182_vm4, %v7202_v29, 0.0 }
 0x4e2   :  { %v7207_v36 = vpop.eup %6124  ;;  %6134 = vpow2.f32 %v1301_v30  ;;  %v1319_v10 = vmul.f32 1.442695, %v1275_v6  ;;  %v1276_v45 = vsub.f32 %v7112_v53, %v1248_v16  ;;  %1352 = vadd.xlane.f32.xlu1 %v1351_v9 }
 0x4e3   :  { %v1251_v1 = vpop.xlane.xlu0 %1250  ;;  %v1378_v18 = vsel %vm1182_vm4, %v7207_v36, 0.0 }
 0x4e4   :  { %v7212_v13 = vpop.eup %6126  ;;  %6136 = vpow2.f32 %v1319_v10  ;;  %v1321_v15 = vmul.f32 1.442695, %v1276_v45  ;;  %v1277_v62 = vsub.f32 %v7118_v42, %v1251_v1  ;;  %1379 = vadd.xlane.f32.xlu0 %v1378_v18 }
 0x4e5   :  { %v1254_v49 = vpop.xlane.xlu1 %1253  ;;  %v1354_v8 = vsel %vm1182_vm4, %v7212_v13, 0.0 }
 0x4e6   :  { %v7217_v5 = vpop.eup %6128  ;;  %6138 = vpow2.f32 %v1321_v15  ;;  %v1323_v53 = vmul.f32 1.442695, %v1277_v62  ;;  %v1278_v41 = vsub.f32 %v7124_v33, %v1254_v49  ;;  %1355 = vadd.xlane.f32.xlu1 %v1354_v8 }
 0x4e7   :  { %v1357_v37 = vsel %vm1182_vm4, %v7217_v5, 0.0 }
 0x4e8   :  { %v7222_v12 = vpop.eup %6130  ;;  %6140 = vpow2.f32 %v1323_v53  ;;  %v1325_v47 = vmul.f32 1.442695, %v1278_v41  ;;  %1358 = vadd.xlane.f32.xlu0 %v1357_v37  ;;  %v6384_v41 = vld [vmem:[%s8566_s3 + $0x1] ss:$0 sm:$0xff] }
 0x4e9   :  { %v1381_v42 = vsel %vm1182_vm4, %v7222_v12, 0.0  ;;  %v737_v37 = vmul.f32 %v6384_v41, %v6934_v54 }
 0x4ea   :  { %v7226_v55 = vpop.eup %6132  ;;  %6142 = vpow2.f32 %v1325_v47  ;;  %1382 = vadd.xlane.f32.xlu1 %v1381_v42 }
 0x4eb   :  { %v1384_v46 = vsel %vm1182_vm4, %v7226_v55, 0.0 }
 0x4ec   :  { %v7230_v33 = vpop.eup %6134  ;;  %1385 = vadd.xlane.f32.xlu0 %v1384_v46 }
 0x4ed   :  { %v1360_v17 = vsel %vm1182_vm4, %v7230_v33, 0.0 }
 0x4ee   :  { %v7234_v32 = vpop.eup %6136  ;;  %1361 = vadd.xlane.f32.xlu1 %v1360_v17 }
 0x4ef   :  { %v1387_v43 = vsel %vm1182_vm4, %v7234_v32, 0.0 }
 0x4f0   :  { %v7238_v34 = vpop.eup %6138  ;;  %1388 = vadd.xlane.f32.xlu0 %v1387_v43 }
 0x4f1   :  { %v1390_v60 = vsel %vm1182_vm4, %v7238_v34, 0.0 }
 0x4f2   :  { %v7242_v51 = vpop.eup %6140  ;;  %1391 = vadd.xlane.f32.xlu1 %v1390_v60 }
 0x4f3   :  { %v1393_v39 = vsel %vm1182_vm4, %v7242_v51, 0.0 }
 0x4f4   :  { %v7246_v7 = vpop.eup %6142  ;;  %1394 = vadd.xlane.f32.xlu0 %v1393_v39 }
 0x4f5   :  { %v1396_v30 = vsel %vm1182_vm4, %v7246_v7, 0.0 }
 0x4f6   :  { %1397 = vadd.xlane.f32.xlu1 %v1396_v30 }
 0x52b   :  { %v1329_v6 = vpop.xlane.xlu0 %1328 }
 0x52c   :  { %6144 = vrcp.f32 %v1329_v6 }
 0x52d   :  { %v1332_v16 = vpop.xlane.xlu1 %1331 }
 0x52e   :  { %6146 = vrcp.f32 %v1332_v16 }
 0x52f   :  { %v1335_v9 = vpop.xlane.xlu0 %1334 }
 0x530   :  { %6148 = vrcp.f32 %v1335_v9 }
 0x536   :  { %v6145_v10 = vpop.eup %6144 }
 0x537   :  { %v1423_v18 = vmul.f32 %v6145_v10, %v7133_v2 }
 0x538   :  { %v6147_v45 = vpop.eup %6146 }
 0x539   :  { %v1365_v1 = vpop.xlane.xlu1 %1364  ;;  %v1424_v15 = vmul.f32 %v6147_v45, %v7138_v21  ;;  %v759_v21 = vpack.c.bf16 %v737_v37, %v737_v37 }
 0x53a   :  { %v6149_v62 = vpop.eup %6148  ;;  %6150 = vrcp.f32 %v1365_v1 }
 0x53b   :  { %v1368_v49 = vpop.xlane.xlu0 %1367  ;;  %v1447_v8 = vpack.c.bf16 %v1424_v15, %v1423_v18  ;;  %v1425_v53 = vmul.f32 %v6149_v62, %v7143_v50  ;;  %v1528_v46 = vsel %vm1469_vm2, %v759_v21, 0 }
 0x53c   :  { %6152 = vrcp.f32 %v1368_v49 }
 0x53d   :  { %v1338_v47 = vpop.xlane.xlu1 %1337  ;;  %5534 = vmatprep.mubr.msk.bf16.mxu0 %vm1182_vm4, %v1447_v8  ;;  %v1448_v42 = vpack.c.bf16 %v1425_v53, %v1425_v53 }
 0x53e   :  { %6154 = vrcp.f32 %v1338_v47 }
 0x53f   :  { %5535 = vmatmul.mubr.msk.bf16.vlgmr.msra.gmra.mrb[32].mxu0 %vm1182_vm4, %v1448_v42  ;;  %v1341_v2 = vpop.xlane.xlu0 %1340 }
 0x540   :  { %5539 = vmatpush3.bf16.msra.mxu0 %v6857_v0  ;;  %6156 = vrcp.f32 %v1341_v2 }
 0x541   :  { %5911 = vmatprep.subr.msk.bf16.mxu0 %vm1469_vm2, %v759_v21  ;;  %v1344_v50 = vpop.xlane.xlu1 %1343 }
 0x542   :  { %6158 = vrcp.f32 %v1344_v50 }
 0x543   :  { %v1371_v17 = vpop.xlane.xlu0 %1370 }
 0x544   :  { %v6151_v43 = vpop.eup %6150  ;;  %5541 = vmatpush3.bf16.msra.mxu0 %v1528_v46  ;;  %6160 = vrcp.f32 %v1371_v17 }
 0x545   :  { %5546 = vmatprep.subr.bf16.mxu0 %v6905_v44  ;;  %v1435_v39 = vmul.f32 %v6151_v43, %v7151_v59  ;;  %v6385_v59 = vld [vmem:[%s8566_s3 + $0x2] ss:$0 sm:$0xff] }
 0x546   :  { %v6153_v60 = vpop.eup %6152 }
 0x547   :  { %v1436_v30 = vmul.f32 %v6153_v60, %v7155_v11  ;;  %v740_v11 = vmul.f32 %v6385_v59, %v6934_v54 }
 0x548   :  { %v6155_v6 = vpop.eup %6154 }
 0x549   :  { %v1455_v0 = vpack.c.bf16 %v1436_v30, %v1435_v39  ;;  %v1426_v10 = vmul.f32 %v6155_v6, %v7159_v35  ;;  %v761_v53 = vpack.c.bf16 %v740_v11, %v740_v11  ;;  %v752_v11 = vmul.f32 %v6385_v59, %v6974_v23 }
 0x54a   :  { %v6157_v16 = vpop.eup %6156 }
 0x54b   :  { %v1347_v9 = vpop.xlane.xlu1 %1346  ;;  %5566 = vmatprep.mubr.msk.bf16.mxu1 %vm1182_vm4, %v1455_v0  ;;  %v1427_v45 = vmul.f32 %v6157_v16, %v7164_v25  ;;  %v749_v25 = vmul.f32 %v6384_v41, %v6974_v23  ;;  %v1585_v47 = vsel %vm1469_vm2, %v761_v53, 0 }
 0x54c   :  { %v6159_v1 = vpop.eup %6158  ;;  %6162 = vrcp.f32 %v1347_v9 }
 0x54d   :  { %v1350_v18 = vpop.xlane.xlu0 %1349  ;;  %v1449_v15 = vpack.c.bf16 %v1427_v45, %v1426_v10  ;;  %v1428_v62 = vmul.f32 %v6159_v1, %v7169_v20  ;;  %v767_v20 = vpack.c.bf16 %v749_v25, %v749_v25  ;;  %v6386_v1 = vld [vmem:[%s8566_s3 + $0x3] ss:$0 sm:$0xff] }
 0x54e   :  { %v6161_v49 = vpop.eup %6160  ;;  %6164 = vrcp.f32 %v1350_v18  ;;  %v743_v18 = vmul.f32 %v6386_v1, %v6934_v54 }
 0x54f   :  { %5542 = vmatprep.mubr.msk.bf16.mxu0 %vm1182_vm4, %v1449_v15  ;;  %v1450_v8 = vpack.c.bf16 %v1428_v62, %v1428_v62  ;;  %v1437_v35 = vmul.f32 %v6161_v49, %v7173_v58  ;;  %v1756_v41 = vsel %vm1469_vm2, %v767_v20, 0 }
 0x551   :  { %5543 = vmatmul.mubr.msk.bf16.vlgmr.msra.gmra.mrb[32].mxu0 %vm1182_vm4, %v1450_v8  ;;  %v1456_v37 = vpack.c.bf16 %v1437_v35, %v1437_v35 }
 0x552   :  { %5547 = vmatpush3.bf16.msra.mxu0 %v6905_v44 }
 0x553   :  { %5912 = vmatprep.subr.msk.bf16.mxu0 %vm1469_vm2, %v761_v53  ;;  %5567 = vmatmul.mubr.msk.bf16.vlgmr.msra.gmra.mrb[36].mxu1 %vm1182_vm4, %v1456_v37  ;;  %v769_v53 = vpack.c.bf16 %v752_v11, %v752_v11 }
 0x554   :  { %5571 = vmatpush3.bf16.msra.mxu1 %v6903_v56 }
 0x555   :  { %5915 = vmatprep.subr.msk.bf16.mxu1 %vm1469_vm2, %v767_v20 }
 0x556   :  { %v6163_v58 = vpop.eup %6162  ;;  %5549 = vmatpush3.bf16.msra.mxu0 %v1585_v47 }
 0x557   :  { %5554 = vmatprep.subr.bf16.mxu0 %v6920_v57  ;;  %v1429_v44 = vmul.f32 %v6163_v58, %v7177_v48 }
 0x558   :  { %v6165_v42 = vpop.eup %6164  ;;  %5573 = vmatpush3.bf16.msra.mxu1 %v1756_v41  ;;  %v1813_v41 = vsel %vm1469_vm2, %v769_v53, 0 }
 0x559   :  { %5578 = vmatprep.subr.bf16.mxu1 %v6922_v3  ;;  %v1430_v2 = vmul.f32 %v6165_v42, %v7181_v63  ;;  %v8592_v42 = vmov 0.0  }
 0x55b   :  { %v1451_v21 = vpack.c.bf16 %v1430_v2, %v1429_v44 }
 0x55d   :  { %5550 = vmatprep.mubr.msk.bf16.mxu0 %vm1182_vm4, %v1451_v21 }
 0x56b   :  { %v1374_v56 = vpop.xlane.xlu1 %1373 }
 0x56c   :  { %6166 = vrcp.f32 %v1374_v56  ;;  %v5972_v56 = vld [vmem:[%s8567_s8] sm:$0xff]  }
 0x56d   :  { %v1377_v50 = vpop.xlane.xlu0 %1376 }
 0x56e   :  { %6168 = vrcp.f32 %v1377_v50  ;;  %v755_v50 = vmul.f32 %v6386_v1, %v6974_v23 }
 0x56f   :  { %v1353_v46 = vpop.xlane.xlu1 %1352 }
 0x570   :  { %6170 = vrcp.f32 %v1353_v46 }
 0x571   :  { %v1380_v17 = vpop.xlane.xlu0 %1379 }
 0x572   :  { %6172 = vrcp.f32 %v1380_v17 }
 0x573   :  { %v1356_v43 = vpop.xlane.xlu1 %1355 }
 0x574   :  { %6174 = vrcp.f32 %v1356_v43 }
 0x575   :  { %v1359_v60 = vpop.xlane.xlu0 %1358 }
 0x576   :  { %v6167_v39 = vpop.eup %6166  ;;  %6176 = vrcp.f32 %v1359_v60  ;;  %v771_v60 = vpack.c.bf16 %v755_v50, %v755_v50  ;;  %v5982_v50 = vld [vmem:[%s8569_s12 + $0x4] ss:$8 sps:$4 sm:$0xff]  }
 0x577   :  { %v1383_v30 = vpop.xlane.xlu1 %1382  ;;  %v1438_v6 = vmul.f32 %v6167_v39, %v7192_v52 }
 0x578   :  { %v6169_v48 = vpop.eup %6168  ;;  %6178 = vrcp.f32 %v1383_v30 }
 0x579   :  { %v1386_v63 = vpop.xlane.xlu0 %1385  ;;  %v1439_v0 = vmul.f32 %v6169_v48, %v7197_v40  ;;  %v5974_v48 = vld [vmem:[%s8567_s8 + $0x10] sm:$0xff]  }
 0x57a   :  { %v6171_v16 = vpop.eup %6170  ;;  %6180 = vrcp.f32 %v1386_v63  ;;  %v1870_v63 = vsel %vm1469_vm2, %v771_v60, 0 }
 0x57b   :  { %v1362_v9 = vpop.xlane.xlu1 %1361  ;;  %v1457_v10 = vpack.c.bf16 %v1439_v0, %v1438_v6  ;;  %v1431_v45 = vmul.f32 %v6171_v16, %v7202_v29  ;;  %v763_v29 = vpack.c.bf16 %v743_v18, %v743_v18  ;;  %v5976_v6 = vld [vmem:[%s8567_s8 + $0x20] sm:$0xff]   ;;  %v8593_v0 = vmov 0   ;;  %v5978_v16 = vld [vmem:[%s8567_s8 + $0x30] sm:$0xff]  }
 0x57c   :  { %v6173_v15 = vpop.eup %6172  ;;  %6182 = vrcp.f32 %v1362_v9  ;;  %v5979_v9 = vld [vmem:[%s8567_s8 + $0x38] sm:$0xff]  }
 0x57d   :  { %5574 = vmatprep.mubr.msk.bf16.mxu1 %vm1182_vm4, %v1457_v10  ;;  %v1389_v62 = vpop.xlane.xlu0 %1388  ;;  %v1452_v52 = vpack.c.bf16 %v1431_v45, %v1431_v45  ;;  %v1440_v40 = vmul.f32 %v6173_v15, %v7207_v36  ;;  %v1642_v47 = vsel %vm1469_vm2, %v763_v29, 0 }
 0x57e   :  { %v6175_v49 = vpop.eup %6174  ;;  %6184 = vrcp.f32 %v1389_v62 }
 0x57f   :  { %v1392_v8 = vpop.xlane.xlu1 %1391  ;;  %5551 = vmatmul.mubr.msk.bf16.vlgmr.msra.gmra.mrb[32].mxu0 %vm1182_vm4, %v1452_v52  ;;  %v1458_v35 = vpack.c.bf16 %v1440_v40, %v1440_v40  ;;  %v1432_v36 = vmul.f32 %v6175_v49, %v7212_v13 }
 0x580   :  { %v6177_v25 = vpop.eup %6176  ;;  %6186 = vrcp.f32 %v1392_v8  ;;  %5555 = vmatpush3.bf16.msra.mxu0 %v6920_v57 }
 0x581   :  { %5913 = vmatprep.subr.msk.bf16.mxu0 %vm1469_vm2, %v763_v29  ;;  %5575 = vmatmul.mubr.msk.bf16.vlgmr.msra.gmra.mrb[36].mxu1 %vm1182_vm4, %v1458_v35  ;;  %v1395_v54 = vpop.xlane.xlu0 %1394  ;;  %v1433_v59 = vmul.f32 %v6177_v25, %v7217_v5  ;;  %v4989_v29 = vld [vmem:[%s8568_s9] ss:$0 sm:$0xff] }
 0x582   :  { %v6179_v37 = vpop.eup %6178  ;;  %5579 = vmatpush3.bf16.msra.mxu1 %v6922_v3  ;;  %6188 = vrcp.f32 %v1395_v54 }
 0x583   :  { %5916 = vmatprep.subr.msk.bf16.mxu1 %vm1469_vm2, %v769_v53  ;;  %v1398_v20 = vpop.xlane.xlu1 %1397  ;;  %v1453_v57 = vpack.c.bf16 %v1433_v59, %v1432_v36  ;;  %v1441_v13 = vmul.f32 %v6179_v37, %v7222_v12 }
 0x584   :  { %v6181_v58 = vpop.eup %6180  ;;  %5557 = vmatpush3.bf16.msra.mxu0 %v1642_v47  ;;  %6190 = vrcp.f32 %v1398_v20 }
 0x585   :  { %5558 = vmatprep.mubr.msk.bf16.mxu0 %vm1182_vm4, %v1453_v57  ;;  %v1442_v5 = vmul.f32 %v6181_v58, %v7226_v55  ;;  %5594 = vmatprep.subr.bf16.mxu0 %v8592_v42 }
 0x586   :  { %v6183_v3 = vpop.eup %6182  ;;  %5581 = vmatpush3.bf16.msra.mxu1 %v1813_v41 }
 0x587   :  { %5586 = vmatprep.subr.bf16.mxu1 %v6926_v61  ;;  %v1459_v44 = vpack.c.bf16 %v1442_v5, %v1441_v13  ;;  %v1434_v2 = vmul.f32 %v6183_v3, %v7230_v33  ;;  %v5973_v33 = vld [vmem:[%s8567_s8 + $0x8] sm:$0xff]  }
 0x588   :  { %v6185_v21 = vpop.eup %6184 }
 0x589   :  { %5582 = vmatprep.mubr.msk.bf16.mxu1 %vm1182_vm4, %v1459_v44  ;;  %v1454_v12 = vpack.c.bf16 %v1434_v2, %v1434_v2  ;;  %v1443_v55 = vmul.f32 %v6185_v21, %v7234_v32 }
 0x58a   :  { %v6187_v46 = vpop.eup %6186 }
 0x58b   :  { %5559 = vmatmul.mubr.msk.bf16.vlgmr.msra.gmra.mrb[32].mxu0 %vm1182_vm4, %v1454_v12  ;;  %v1460_v17 = vpack.c.bf16 %v1443_v55, %v1443_v55  ;;  %v1444_v32 = vmul.f32 %v6187_v46, %v7238_v34 }
 0x58c   :  { %v6189_v43 = vpop.eup %6188  ;;  %5595 = vmatpush3.bf16.msra.mxu0 %v5972_v56  ;;  %5610 = vmatprep.mubr.msk.bf16.mxu0 %vm6395_vm0, %v8592_v42 }
 0x58d   :  { %5583 = vmatmul.mubr.msk.bf16.vlgmr.msra.gmra.mrb[36].mxu1 %vm1182_vm4, %v1460_v17  ;;  %v1445_v23 = vmul.f32 %v6189_v43, %v7242_v51  ;;  %5596 = vmatprep.subr.bf16.mxu0 %v8592_v42 }
 0x58e   :  { %5587 = vmatpush3.bf16.msra.mxu1 %v6926_v61  ;;  %v6191_v30 = vpop.eup %6190  ;;  %v5975_v61 = vld [vmem:[%s8567_s8 + $0x18] sm:$0xff]  }
 0x58f   :  { %5917 = vmatprep.subr.msk.bf16.mxu1 %vm1469_vm2, %v771_v60  ;;  %v1461_v39 = vpack.c.bf16 %v1445_v23, %v1444_v32  ;;  %v1446_v34 = vmul.f32 %v6191_v30, %v7246_v7  ;;  %v5977_v7 = vld [vmem:[%s8567_s8 + $0x28] sm:$0xff]  }
 0x590   :  { %5597 = vmatpush3.bf16.msra.mxu0 %v5973_v33 }
 0x591   :  { %5590 = vmatprep.mubr.msk.bf16.mxu1 %vm1182_vm4, %v1461_v39  ;;  %5598 = vmatprep.subr.bf16.mxu0 %v8592_v42  ;;  %v1462_v51 = vpack.c.bf16 %v1446_v34, %v1446_v34 }
 0x592   :  { %5589 = vmatpush3.bf16.msra.mxu1 %v1870_v63 }
 0x593   :  { %2284 = vmatprep.subr.bf16.mxu1 %v5982_v50 }
 0x594   :  { %5599 = vmatpush3.bf16.msra.mxu0 %v5974_v48 }
 0x595   :  { %5600 = vmatprep.subr.bf16.mxu0 %v8592_v42 }
 0x598   :  { %5601 = vmatpush3.bf16.msra.mxu0 %v5975_v61 }
 0x599   :  { %5591 = vmatmul.mubr.msk.bf16.vlgmr.msra.gmra.mrb[36].mxu1 %vm1182_vm4, %v1462_v51  ;;  %5602 = vmatprep.subr.bf16.mxu0 %v8592_v42 }
 0x59a   :  { %2316 = vmatprep.mubr.bf16.mxu1 %v8593_v0 }
 0x59c   :  { %5603 = vmatpush3.bf16.msra.mxu0 %v5976_v6 }
 0x59d   :  { %5604 = vmatprep.subr.bf16.mxu0 %v8592_v42 }
 0x5a0   :  { %5605 = vmatpush3.bf16.msra.mxu0 %v5977_v7 }
 0x5a1   :  { %5606 = vmatprep.subr.bf16.mxu0 %v8592_v42 }
 0x5a4   :  { %5607 = vmatpush3.bf16.msra.mxu0 %v5978_v16 }
 0x5a5   :  { %5608 = vmatprep.subr.bf16.mxu0 %v8592_v42 }
 0x5a8   :  { %5609 = vmatpush3.bf16.msra.mxu0 %v5979_v9 }
 0x5a9   :  { %5622 = vmatprep.subr.bf16.mxu0 %v8592_v42 }
 0x65e   :  { %v5560_v10 = vpop.f32.mrb[32].mxu0 }
 0x65f   :  { %v1678_v45 = vpop.f32.mrb[33].mxu0 }
 0x660   :  { %v5561_v1 = vpop.f32.mrb[34].mxu0 }
 0x661   :  { %v1681_v18 = vpop.f32.mrb[35].mxu0 }
 0x662   :  { %v1938_v15 = vpack.c.bf16 %v1681_v18, %v1678_v45 }
 0x664   :  { %5611 = vmatmul.mubr.bf16.vlgmr.msra.gmra.mrb[36].mxu0 %v1938_v15 }
 0x665   :  { %5614 = vmatprep.mubr.msk.bf16.mxu0 %vm6395_vm0, %v8592_v42 }
 0x66c   :  { %v5592_v62 = vpop.f32.mrb[36].mxu1 }
 0x66d   :  { %v1906_v52 = vpop.f32.mrb[37].mxu1 }
 0x66e   :  { %v1939_v40 = vpack.c.bf16 %v1906_v52, %v5560_v10  ;;  %v5593_v11 = vpop.f32.mrb[38].mxu1 }
 0x66f   :  { %v1909_v49 = vpop.f32.mrb[39].mxu1 }
 0x670   :  { %v1940_v8 = vpack.c.bf16 %v5592_v62, %v1909_v49  ;;  %5615 = vmatmul.mubr.bf16.gmra.mrb[40].mxu0 %v1939_v40 }
 0x671   :  { %5618 = vmatprep.mubr.msk.bf16.mxu0 %vm6395_vm0, %v8592_v42 }
 0x678   :  { %5619 = vmatmul.mubr.bf16.gmra.mrb[44].mxu0 %v1940_v8 }
 0x679   :  { %5638 = vmatprep.mubr.msk.bf16.mxu0 %vm6395_vm0, %v8592_v42 }
 0x737   :  { %v2046_v35 = vpop.f32.mrb[36].mxu0 }
 0x738   :  { %v2047_v25 = vadd.f32 %v4989_v29, %v2046_v35  ;;  %v5612_v54 = vpop.f32.mrb[37].mxu0  ;;  %v5986_v35 = vld [vmem:[%s8569_s12 + $0x20] ss:$8 sps:$4 sm:$0xff]  }
 0x739   :  { %v2049_v53 = vpop.f32.mrb[38].mxu0  ;;  %v5991_v54 = vld [vmem:[%s8569_s12 + $0x34] ss:$8 sps:$4 sm:$0xff]  }
 0x73a   :  { %v7373_v36 = vadd.f32 %v2047_v25, %v6545_v14  ;;  %v2050_v59 = vadd.f32 %v4989_v29, %v2049_v53  ;;  %v5613_v37 = vpop.f32.mrb[39].mxu0  ;;  %v5988_v25 = vld [vmem:[%s8569_s12 + $0x24] ss:$8 sps:$4 sm:$0xff]   ;;  %v5989_v53 = vld [vmem:[%s8569_s12 + $0x30] ss:$8 sps:$4 sm:$0xff]  }
 0x73b   :  { %v5992_v37 = vld [vmem:[%s8569_s12 + $0x40] ss:$8 sps:$4 sm:$0xff]  }
 0x73c   :  { %v7376_v20 = vadd.f32 %v2050_v59, %v6551_v19  ;;  %2077 = vadd.xlane.f32.xlu0 %v7373_v36  ;;  %v5994_v59 = vld [vmem:[%s8569_s12 + $0x44] ss:$8 sps:$4 sm:$0xff]  }
 0x73e   :  { %2079 = vadd.xlane.f32.xlu1 %v7376_v20 }
 0x743   :  { %v2054_v47 = vpop.f32.mrb[40].mxu0 }
 0x744   :  { %v2055_v57 = vadd.f32 %v4989_v29, %v2054_v47  ;;  %v5616_v58 = vpop.f32.mrb[41].mxu0  ;;  %v5997_v47 = vld [vmem:[%s8569_s12 + $0x54] ss:$8 sps:$4 sm:$0xff]  }
 0x745   :  { %v2057_v41 = vpop.f32.mrb[42].mxu0  ;;  %v6000_v58 = vld [vmem:[%s8569_s12 + $0x64] ss:$8 sps:$4 sm:$0xff]  }
 0x746   :  { %v7381_v13 = vadd.f32 %v2055_v57, %v6557_v22  ;;  %v2058_v5 = vadd.f32 %v4989_v29, %v2057_v41  ;;  %v5617_v3 = vpop.f32.mrb[43].mxu0  ;;  %v5995_v57 = vld [vmem:[%s8569_s12 + $0x50] ss:$8 sps:$4 sm:$0xff]   ;;  %v5998_v41 = vld [vmem:[%s8569_s12 + $0x60] ss:$8 sps:$4 sm:$0xff]  }
 0x747   :  { %v6001_v3 = vld [vmem:[%s8569_s12 + $0x70] ss:$8 sps:$4 sm:$0xff]  }
 0x748   :  { %v7384_v14 = vadd.f32 %v2058_v5, %v6560_v26  ;;  %2081 = vadd.xlane.f32.xlu0 %v7381_v13  ;;  %v5980_v26 = vld [vmem:[%s8569_s12] ss:$8 sps:$4 sm:$0xff]   ;;  %v6003_v5 = vld [vmem:[%s8569_s12 + $0x74] ss:$8 sps:$4 sm:$0xff]  }
 0x749   :  { %2285 = vmatpush1.bf16.msra.mxu1 %v5980_v26 }
 0x74a   :  { %2083 = vadd.xlane.f32.xlu1 %v7384_v14 }
 0x74b   :  { %v2062_v19 = vpop.f32.mrb[44].mxu0 }
 0x74c   :  { %v2063_v44 = vadd.f32 %v4989_v29, %v2062_v19  ;;  %v5620_v2 = vpop.f32.mrb[45].mxu0 }
 0x74d   :  { %v2065_v21 = vpop.f32.mrb[46].mxu0 }
 0x74e   :  { %v7389_v56 = vadd.f32 %v2063_v44, %v6563_v28  ;;  %v2066_v12 = vadd.f32 %v4989_v29, %v2065_v21  ;;  %v5621_v55 = vpop.f32.mrb[47].mxu0  ;;  %v5983_v28 = vld [vmem:[%s8569_s12 + $0x10] ss:$8 sps:$4 sm:$0xff]  }
 0x750   :  { %v7392_v22 = vadd.f32 %v2066_v12, %v6565_v31  ;;  %2085 = vadd.xlane.f32.xlu0 %v7389_v56  ;;  %v5985_v31 = vld [vmem:[%s8569_s12 + $0x14] ss:$8 sps:$4 sm:$0xff]  }
 0x751   :  { %2286 = vmatprep.subr.bf16.mxu1 %v5985_v31 }
 0x752   :  { %2087 = vadd.xlane.f32.xlu1 %v7392_v22  ;;  %2287 = vmatpush1.bf16.msra.mxu1 %v5983_v28 }
 0x753   :  { %2288 = vmatprep.subr.bf16.mxu1 %v5988_v25 }
 0x756   :  { %2289 = vmatpush1.bf16.msra.mxu1 %v5986_v35 }
 0x757   :  { %2290 = vmatprep.subr.bf16.mxu1 %v5991_v54 }
 0x75a   :  { %2291 = vmatpush1.bf16.msra.mxu1 %v5989_v53 }
 0x75b   :  { %2292 = vmatprep.subr.bf16.mxu1 %v5994_v59 }
 0x75e   :  { %2293 = vmatpush1.bf16.msra.mxu1 %v5992_v37 }
 0x75f   :  { %2294 = vmatprep.subr.bf16.mxu1 %v5997_v47 }
 0x762   :  { %2295 = vmatpush1.bf16.msra.mxu1 %v5995_v57 }
 0x763   :  { %2296 = vmatprep.subr.bf16.mxu1 %v6000_v58 }
 0x766   :  { %2297 = vmatpush1.bf16.msra.mxu1 %v5998_v41 }
 0x767   :  { %2298 = vmatprep.subr.bf16.mxu1 %v6003_v5  ;;  %v6007_v5 = vld [vmem:[%s8572_s14 + $0x18] sm:$0xff]  }
 0x76a   :  { %2299 = vmatpush1.bf16.msra.mxu1 %v6001_v3  ;;  %v6008_v3 = vld [vmem:[%s8572_s14 + $0x20] sm:$0xff]  }
 0x7c9   :  { %v2078_v46 = vpop.xlane.xlu0 %2077 }
 0x7ca   :  { %v2089_v17 = vmul.f32 0.03125, %v2078_v46 }
 0x7cb   :  { %v2080_v43 = vpop.xlane.xlu1 %2079 }
 0x7cc   :  { %v2095_v33 = vsub.f32 %v7373_v36, %v2089_v17  ;;  %v2090_v60 = vmul.f32 0.03125, %v2080_v43  ;;  %v4998_v43 = vld [vmem:[%s8570_s10] ss:$0 sm:$0xff] }
 0x7ce   :  { %v2096_v32 = vsub.f32 %v7376_v20, %v2090_v60  ;;  %v7412_v23 = vsel %vm62_vm1, %v2095_v33, 0.0 }
 0x7cf   :  { %v2107_v39 = vmul.f32 %v7412_v23, %v7412_v23 }
 0x7d0   :  { %v7418_v30 = vsel %vm62_vm1, %v2096_v32, 0.0 }
 0x7d1   :  { %2113 = vadd.xlane.f32.xlu0 %v2107_v39  ;;  %v2108_v48 = vmul.f32 %v7418_v30, %v7418_v30 }
 0x7d3   :  { %2115 = vadd.xlane.f32.xlu1 %v2108_v48 }
 0x7d5   :  { %v2082_v63 = vpop.xlane.xlu0 %2081 }
 0x7d6   :  { %v2091_v34 = vmul.f32 0.03125, %v2082_v63  ;;  %v4999_v63 = vld [vmem:[%s8571_s11] ss:$0 sm:$0xff] }
 0x7d7   :  { %v2084_v61 = vpop.xlane.xlu1 %2083 }
 0x7d8   :  { %v2097_v51 = vsub.f32 %v7381_v13, %v2091_v34  ;;  %v2092_v6 = vmul.f32 0.03125, %v2084_v61 }
 0x7da   :  { %v2098_v7 = vsub.f32 %v7384_v14, %v2092_v6  ;;  %v7426_v16 = vsel %vm62_vm1, %v2097_v51, 0.0 }
 0x7db   :  { %v2109_v9 = vmul.f32 %v7426_v16, %v7426_v16 }
 0x7dc   :  { %v7432_v10 = vsel %vm62_vm1, %v2098_v7, 0.0 }
 0x7dd   :  { %2117 = vadd.xlane.f32.xlu0 %v2109_v9  ;;  %v2086_v45 = vpop.xlane.xlu0 %2085  ;;  %v2110_v1 = vmul.f32 %v7432_v10, %v7432_v10 }
 0x7de   :  { %v2093_v18 = vmul.f32 0.03125, %v2086_v45 }
 0x7df   :  { %2119 = vadd.xlane.f32.xlu1 %v2110_v1  ;;  %v2088_v15 = vpop.xlane.xlu1 %2087 }
 0x7e0   :  { %v2099_v62 = vsub.f32 %v7389_v56, %v2093_v18  ;;  %v2094_v52 = vmul.f32 0.03125, %v2088_v15 }
 0x7e2   :  { %v2100_v40 = vsub.f32 %v7392_v22, %v2094_v52  ;;  %v7440_v11 = vsel %vm62_vm1, %v2099_v62, 0.0 }
 0x7e3   :  { %v2111_v49 = vmul.f32 %v7440_v11, %v7440_v11 }
 0x7e4   :  { %v7446_v8 = vsel %vm62_vm1, %v2100_v40, 0.0 }
 0x7e5   :  { %2121 = vadd.xlane.f32.xlu0 %v2111_v49  ;;  %v2112_v29 = vmul.f32 %v7446_v8, %v7446_v8 }
 0x7e7   :  { %2123 = vadd.xlane.f32.xlu1 %v2112_v29 }
 0x85e   :  { %v2114_v19 = vpop.xlane.xlu0 %2113 }
 0x85f   :  { %v2125_v44 = vmul.f32 0.03125, %v2114_v19  ;;  %v6009_v19 = vld [vmem:[%s8572_s14 + $0x28] sm:$0xff]  }
 0x860   :  { %v2116_v2 = vpop.xlane.xlu1 %2115 }
 0x861   :  { %v2131_v21 = vadd.f32 1e-06, %v2125_v44  ;;  %v2126_v12 = vmul.f32 0.03125, %v2116_v2  ;;  %v6010_v44 = vld [vmem:[%s8572_s14 + $0x30] sm:$0xff]   ;;  %v6011_v2 = vld [vmem:[%s8572_s14 + $0x38] sm:$0xff]  }
 0x863   :  { %6192 = vrsqrt.f32 %v2131_v21  ;;  %v2132_v55 = vadd.f32 1e-06, %v2126_v12  ;;  %v2192_v21 = vld [vmem:[%s8573_s13] sm:$0x3] }
 0x864   :  { %v2197_v12 = vrot.slane %v2192_v21, %v6717_v24 }
 0x865   :  { %6194 = vrsqrt.f32 %v2132_v55 }
 0x86a   :  { %v2118_v26 = vpop.xlane.xlu0 %2117 }
 0x86b   :  { %v2127_v50 = vmul.f32 0.03125, %v2118_v26 }
 0x86c   :  { %v2120_v28 = vpop.xlane.xlu1 %2119 }
 0x86d   :  { %v6193_v31 = vpop.eup %6192  ;;  %v2133_v46 = vadd.f32 1e-06, %v2127_v50  ;;  %v2128_v17 = vmul.f32 0.03125, %v2120_v28 }
 0x86e   :  { %v2143_v33 = vmul.f32 %v6193_v31, %v7412_v23 }
 0x86f   :  { %v6195_v60 = vpop.eup %6194  ;;  %6196 = vrsqrt.f32 %v2133_v46  ;;  %v2134_v32 = vadd.f32 1e-06, %v2128_v17 }
 0x870   :  { %v2144_v39 = vmul.f32 %v6195_v60, %v7418_v30  ;;  %v2155_v48 = vmul.f32 %v4998_v43, %v2143_v33 }
 0x871   :  { %6198 = vrsqrt.f32 %v2134_v32 }
 0x872   :  { %v2122_v34 = vpop.xlane.xlu0 %2121  ;;  %v2156_v61 = vmul.f32 %v4998_v43, %v2144_v39  ;;  %v2167_v7 = vadd.f32 %v4999_v63, %v2155_v48 }
 0x873   :  { %v2129_v51 = vmul.f32 0.03125, %v2122_v34 }
 0x874   :  { %v2124_v6 = vpop.xlane.xlu1 %2123  ;;  %v2168_v9 = vadd.f32 %v4999_v63, %v2156_v61 }
 0x875   :  { %v2135_v45 = vadd.f32 1e-06, %v2129_v51  ;;  %v2130_v1 = vmul.f32 0.03125, %v2124_v6 }
 0x876   :  { %v2173_v23 = vpack.c.bf16 %v2168_v9, %v2167_v7 }
 0x877   :  { %6200 = vrsqrt.f32 %v2135_v45  ;;  %v2136_v18 = vadd.f32 1e-06, %v2130_v1 }
 0x878   :  { %2317 = vmatmul.mubr.bf16.vlgmr.msra.gmra.mrb[40].mxu1 %v2173_v23 }
 0x879   :  { %v6197_v15 = vpop.eup %6196  ;;  %6202 = vrsqrt.f32 %v2136_v18  ;;  %2326 = vmatprep.mubr.bf16.mxu1 %v8593_v0 }
 0x87a   :  { %v2145_v30 = vmul.f32 %v6197_v15, %v7426_v16 }
 0x87b   :  { %v6199_v62 = vpop.eup %6198 }
 0x87c   :  { %v2146_v52 = vmul.f32 %v6199_v62, %v7432_v10  ;;  %v2157_v40 = vmul.f32 %v4998_v43, %v2145_v30  ;;  %v6004_v10 = vld [vmem:[%s8572_s14] sm:$0xff]  }
 0x87d   :  { %5623 = vmatpush3.bf16.msra.mxu0 %v6004_v10 }
 0x87e   :  { %v2158_v49 = vmul.f32 %v4998_v43, %v2146_v52  ;;  %v2169_v29 = vadd.f32 %v4999_v63, %v2157_v40  ;;  %5624 = vmatprep.subr.bf16.mxu0 %v8592_v42  ;;  %v2201_v52 = vrot.slane %v2192_v21, %v6724_v27 }
 0x880   :  { %v2170_v35 = vadd.f32 %v4999_v63, %v2158_v49 }
 0x881   :  { %v6201_v25 = vpop.eup %6200 }
 0x882   :  { %v2174_v54 = vpack.c.bf16 %v2170_v35, %v2169_v29  ;;  %v2147_v53 = vmul.f32 %v6201_v25, %v7440_v11  ;;  %v6005_v11 = vld [vmem:[%s8572_s14 + $0x8] sm:$0xff]  }
 0x883   :  { %v6203_v59 = vpop.eup %6202  ;;  %5625 = vmatpush3.bf16.msra.mxu0 %v6005_v11 }
 0x884   :  { %2327 = vmatmul.mubr.bf16.gmra.mrb[44].mxu1 %v2174_v54  ;;  %v2148_v37 = vmul.f32 %v6203_v59, %v7446_v8  ;;  %v2159_v47 = vmul.f32 %v4998_v43, %v2147_v53  ;;  %5626 = vmatprep.subr.bf16.mxu0 %v8592_v42  ;;  %v6006_v8 = vld [vmem:[%s8572_s14 + $0x10] sm:$0xff]  }
 0x885   :  { %2336 = vmatprep.mubr.bf16.mxu1 %v8593_v0 }
 0x886   :  { %v2160_v57 = vmul.f32 %v4998_v43, %v2148_v37  ;;  %v2171_v16 = vadd.f32 %v4999_v63, %v2159_v47 }
 0x887   :  { %5627 = vmatpush3.bf16.msra.mxu0 %v6006_v8 }
 0x888   :  { %v2172_v58 = vadd.f32 %v4999_v63, %v2160_v57  ;;  %5628 = vmatprep.subr.bf16.mxu0 %v8592_v42 }
 0x88a   :  { %v2175_v41 = vpack.c.bf16 %v2172_v58, %v2171_v16 }
 0x88b   :  { %5629 = vmatpush3.bf16.msra.mxu0 %v6007_v5 }
 0x88c   :  { %2337 = vmatmul.mubr.bf16.gmra.mrb[48].mxu1 %v2175_v41  ;;  %5630 = vmatprep.subr.bf16.mxu0 %v8592_v42 }
 0x88d   :  { %2846 = vmatprep.mubr.bf16.mxu1 %v8593_v0 }
 0x88f   :  { %5631 = vmatpush3.bf16.msra.mxu0 %v6008_v3 }
 0x890   :  { %5632 = vmatprep.subr.bf16.mxu0 %v8592_v42 }
 0x893   :  { %5633 = vmatpush3.bf16.msra.mxu0 %v6009_v19 }
 0x894   :  { %5634 = vmatprep.subr.bf16.mxu0 %v8592_v42 }
 0x897   :  { %5635 = vmatpush3.bf16.msra.mxu0 %v6010_v44 }
 0x898   :  { %5636 = vmatprep.subr.bf16.mxu0 %v8592_v42 }
 0x89b   :  { %5637 = vmatpush3.bf16.msra.mxu0 %v6011_v2 }
 0x89c   :  { %5650 = vmatprep.subr.bf16.mxu0 %v8592_v42 }
 0x94b   :  { %v2318_v55 = vpop.f32.mrb[40].mxu1 }
 0x94c   :  { %v2319_v26 = vadd.f32 %v2318_v55, %v2197_v12  ;;  %v2320_v50 = vpop.f32.mrb[41].mxu1 }
 0x94d   :  { %v2322_v28 = vpop.f32.mrb[42].mxu1  ;;  %v2321_v53 = vadd.f32 %v2320_v50, %v2201_v52 }
 0x94e   :  { %v5016_v31 = vmul.f32 -1.442695, %v2319_v26  ;;  %v2323_v46 = vadd.f32 %v2322_v28, %v2197_v12  ;;  %v2324_v17 = vpop.f32.mrb[43].mxu1 }
 0x94f   :  { %v2325_v16 = vadd.f32 %v2324_v17, %v2201_v52 }
 0x950   :  { %6204 = vpow2.f32 %v5016_v31  ;;  %v5017_v43 = vmul.f32 -1.442695, %v2323_v46 }
 0x952   :  { %6206 = vpow2.f32 %v5017_v43 }
 0x957   :  { %v2328_v33 = vpop.f32.mrb[44].mxu1 }
 0x958   :  { %v2329_v60 = vadd.f32 %v2328_v33, %v2197_v12  ;;  %v2330_v32 = vpop.f32.mrb[45].mxu1 }
 0x959   :  { %v2332_v39 = vpop.f32.mrb[46].mxu1  ;;  %v2331_v44 = vadd.f32 %v2330_v32, %v2201_v52  ;;  %v5022_v32 = vld [vmem:[%s8574_s15] ss:$0 sm:$0xff] }
 0x95a   :  { %v6205_v48 = vpop.eup %6204  ;;  %v5018_v63 = vmul.f32 -1.442695, %v2329_v60  ;;  %v2333_v34 = vadd.f32 %v2332_v39, %v2197_v12  ;;  %v2334_v61 = vpop.f32.mrb[47].mxu1 }
 0x95b   :  { %v2365_v51 = vadd.f32 1.0, %v6205_v48  ;;  %v2335_v55 = vadd.f32 %v2334_v61, %v2201_v52 }
 0x95c   :  { %v6207_v6 = vpop.eup %6206  ;;  %6208 = vpow2.f32 %v5018_v63  ;;  %v5019_v7 = vmul.f32 -1.442695, %v2333_v34 }
 0x95d   :  { %6210 = vrcp.f32 %v2365_v51  ;;  %v2366_v9 = vadd.f32 1.0, %v6207_v6 }
 0x95e   :  { %6212 = vpow2.f32 %v5019_v7 }
 0x95f   :  { %6214 = vrcp.f32 %v2366_v9  ;;  %v2338_v45 = vpop.f32.mrb[48].mxu1 }
 0x960   :  { %v2339_v1 = vadd.f32 %v2338_v45, %v2197_v12  ;;  %v2340_v23 = vpop.f32.mrb[49].mxu1 }
 0x961   :  { %v2342_v18 = vpop.f32.mrb[50].mxu1 }
 0x962   :  { %v5020_v15 = vmul.f32 -1.442695, %v2339_v1  ;;  %v2343_v30 = vadd.f32 %v2342_v18, %v2197_v12  ;;  %v2344_v62 = vpop.f32.mrb[51].mxu1 }
 0x963   :  { %v2345_v39 = vadd.f32 %v2344_v62, %v2201_v52 }
 0x964   :  { %6216 = vpow2.f32 %v5020_v15  ;;  %v5021_v40 = vmul.f32 -1.442695, %v2343_v30 }
 0x966   :  { %v6209_v49 = vpop.eup %6208  ;;  %6218 = vpow2.f32 %v5021_v40 }
 0x967   :  { %v6211_v29 = vpop.eup %6210  ;;  %v2367_v35 = vadd.f32 1.0, %v6209_v49 }
 0x968   :  { %v6213_v25 = vpop.eup %6212  ;;  %v2383_v54 = vmul.f32 %v6211_v29, %v2319_v26 }
 0x969   :  { %v6215_v59 = vpop.eup %6214  ;;  %6220 = vrcp.f32 %v2367_v35  ;;  %v2368_v37 = vadd.f32 1.0, %v6213_v25 }
 0x96a   :  { %v2389_v47 = vmul.f32 %v2383_v54, %v2321_v53  ;;  %v2384_v57 = vmul.f32 %v6215_v59, %v2323_v46  ;;  %v2341_v46 = vadd.f32 %v2340_v23, %v2201_v52  ;;  %v6014_v53 = vld [vmem:[%s8562_s6 + $0xc4] ss:$12 sps:$4 sm:$0xff]   ;;  %v6019_v59 = vld [vmem:[%s8562_s6 + $0xe0] ss:$12 sps:$4 sm:$0xff]  }
 0x96b   :  { %6222 = vrcp.f32 %v2368_v37  ;;  %2814 = vmatprep.subr.bf16.mxu1 %v6014_v53  ;;  %v6016_v37 = vld [vmem:[%s8562_s6 + $0xd8] ss:$12 sps:$4 sm:$0xff]   ;;  %v6043_v53 = vld [vmem:[%s8562_s6 + $0x170] ss:$12 sps:$4 sm:$0xff]  }
 0x96c   :  { %v2390_v58 = vmul.f32 %v2384_v57, %v2325_v16 }
 0x96e   :  { %v6217_v41 = vpop.eup %6216  ;;  %v2395_v10 = vpack.c.bf16 %v2390_v58, %v2389_v47 }
 0x96f   :  { %v2369_v11 = vadd.f32 1.0, %v6217_v41 }
 0x970   :  { %v6219_v8 = vpop.eup %6218  ;;  %5639 = vmatmul.mubr.bf16.vlgmr.msra.gmra.mrb[48].mxu0 %v2395_v10 }
 0x971   :  { %6224 = vrcp.f32 %v2369_v11  ;;  %v2370_v5 = vadd.f32 1.0, %v6219_v8  ;;  %5642 = vmatprep.mubr.msk.bf16.mxu0 %vm6395_vm0, %v8592_v42 }
 0x973   :  { %v6221_v3 = vpop.eup %6220  ;;  %6226 = vrcp.f32 %v2370_v5 }
 0x974   :  { %v2385_v19 = vmul.f32 %v6221_v3, %v2329_v60 }
 0x975   :  { %v6223_v2 = vpop.eup %6222 }
 0x976   :  { %v2391_v21 = vmul.f32 %v2385_v19, %v2331_v44  ;;  %v2386_v12 = vmul.f32 %v6223_v2, %v2333_v34 }
 0x978   :  { %v2392_v26 = vmul.f32 %v2386_v12, %v2335_v55 }
 0x97a   :  { %v2396_v50 = vpack.c.bf16 %v2392_v26, %v2391_v21 }
 0x97b   :  { %v6225_v28 = vpop.eup %6224 }
 0x97c   :  { %v2387_v31 = vmul.f32 %v6225_v28, %v2339_v1  ;;  %5643 = vmatmul.mubr.bf16.gmra.mrb[52].mxu0 %v2396_v50 }
 0x97d   :  { %v6227_v17 = vpop.eup %6226  ;;  %5646 = vmatprep.mubr.msk.bf16.mxu0 %vm6395_vm0, %v8592_v42 }
 0x97e   :  { %v2393_v43 = vmul.f32 %v2387_v31, %v2341_v46  ;;  %v2388_v33 = vmul.f32 %v6227_v17, %v2343_v30 }
 0x980   :  { %v2394_v48 = vmul.f32 %v2388_v33, %v2345_v39 }
 0x982   :  { %v2397_v60 = vpack.c.bf16 %v2394_v48, %v2393_v43 }
 0x984   :  { %5647 = vmatmul.mubr.bf16.gmra.mrb[56].mxu0 %v2397_v60 }
 0x985   :  { %5666 = vmatprep.mubr.msk.bf16.mxu0 %vm6395_vm0, %v8592_v42 }
 0xa43   :  { %v2503_v63 = vpop.f32.mrb[48].mxu0 }
 0xa44   :  { %v2504_v34 = vadd.f32 %v5022_v32, %v2503_v63  ;;  %v5640_v61 = vpop.f32.mrb[49].mxu0 }
 0xa45   :  { %v2506_v51 = vpop.f32.mrb[50].mxu0  ;;  %v6020_v61 = vld [vmem:[%s8562_s6 + $0xf0] ss:$12 sps:$4 sm:$0xff]  }
 0xa46   :  { %v7548_v6 = vadd.f32 %v2504_v34, %v7373_v36  ;;  %v2507_v7 = vadd.f32 %v5022_v32, %v2506_v51  ;;  %v5641_v9 = vpop.f32.mrb[51].mxu0  ;;  %v6022_v51 = vld [vmem:[%s8562_s6 + $0xf4] ss:$12 sps:$4 sm:$0xff]  }
 0xa47   :  { %v6026_v9 = vld [vmem:[%s8562_s6 + $0x10c] ss:$12 sps:$4 sm:$0xff]  }
 0xa48   :  { %v7551_v45 = vadd.f32 %v2507_v7, %v7376_v20  ;;  %2536 = vadd.xlane.f32.xlu0 %v7548_v6  ;;  %v6023_v7 = vld [vmem:[%s8562_s6 + $0xf8] ss:$12 sps:$4 sm:$0xff]  }
 0xa4a   :  { %2538 = vadd.xlane.f32.xlu1 %v7551_v45 }
 0xa4f   :  { %v2511_v1 = vpop.f32.mrb[52].mxu0 }
 0xa50   :  { %v2512_v23 = vadd.f32 %v5022_v32, %v2511_v1  ;;  %v5644_v18 = vpop.f32.mrb[53].mxu0  ;;  %v6024_v1 = vld [vmem:[%s8562_s6 + $0x108] ss:$12 sps:$4 sm:$0xff]  }
 0xa51   :  { %v2514_v15 = vpop.f32.mrb[54].mxu0  ;;  %v6030_v18 = vld [vmem:[%s8562_s6 + $0x124] ss:$12 sps:$4 sm:$0xff]  }
 0xa52   :  { %v7556_v30 = vadd.f32 %v2512_v23, %v7381_v13  ;;  %v2515_v62 = vadd.f32 %v5022_v32, %v2514_v15  ;;  %v5645_v52 = vpop.f32.mrb[55].mxu0  ;;  %v6027_v23 = vld [vmem:[%s8562_s6 + $0x110] ss:$12 sps:$4 sm:$0xff]   ;;  %v6028_v15 = vld [vmem:[%s8562_s6 + $0x120] ss:$12 sps:$4 sm:$0xff]  }
 0xa53   :  { %v6034_v52 = vld [vmem:[%s8562_s6 + $0x13c] ss:$12 sps:$4 sm:$0xff]  }
 0xa54   :  { %v7559_v36 = vadd.f32 %v2515_v62, %v7384_v14  ;;  %2540 = vadd.xlane.f32.xlu0 %v7556_v30  ;;  %v6012_v14 = vld [vmem:[%s8562_s6 + $0xc0] ss:$12 sps:$4 sm:$0xff]   ;;  %v6031_v62 = vld [vmem:[%s8562_s6 + $0x128] ss:$12 sps:$4 sm:$0xff]  }
 0xa55   :  { %2815 = vmatpush1.bf16.msra.mxu1 %v6012_v14  ;;  %v6040_v14 = vld [vmem:[%s8562_s6 + $0x168] ss:$12 sps:$4 sm:$0xff]  }
 0xa56   :  { %2542 = vadd.xlane.f32.xlu1 %v7559_v36 }
 0xa57   :  { %v2519_v20 = vpop.f32.mrb[56].mxu0 }
 0xa58   :  { %v2520_v40 = vadd.f32 %v5022_v32, %v2519_v20  ;;  %v5648_v49 = vpop.f32.mrb[57].mxu0  ;;  %v6032_v20 = vld [vmem:[%s8562_s6 + $0x138] ss:$12 sps:$4 sm:$0xff]  }
 0xa59   :  { %v2522_v29 = vpop.f32.mrb[58].mxu0  ;;  %v6038_v49 = vld [vmem:[%s8562_s6 + $0x154] ss:$12 sps:$4 sm:$0xff]  }
 0xa5a   :  { %v7564_v35 = vadd.f32 %v2520_v40, %v7389_v56  ;;  %v2523_v25 = vadd.f32 %v5022_v32, %v2522_v29  ;;  %v5649_v54 = vpop.f32.mrb[59].mxu0  ;;  %v6015_v56 = vld [vmem:[%s8562_s6 + $0xc8] ss:$12 sps:$4 sm:$0xff]   ;;  %v6035_v40 = vld [vmem:[%s8562_s6 + $0x140] ss:$12 sps:$4 sm:$0xff]  }
 0xa5b   :  { %5651 = vmatpush3.bf16.msra.mxu0 %v6015_v56  ;;  %v6036_v29 = vld [vmem:[%s8562_s6 + $0x150] ss:$12 sps:$4 sm:$0xff]   ;;  %v6042_v54 = vld [vmem:[%s8562_s6 + $0x16c] ss:$12 sps:$4 sm:$0xff]  }
 0xa5c   :  { %v7567_v13 = vadd.f32 %v2523_v25, %v7392_v22  ;;  %2544 = vadd.xlane.f32.xlu0 %v7564_v35  ;;  %v6018_v22 = vld [vmem:[%s8562_s6 + $0xdc] ss:$12 sps:$4 sm:$0xff]   ;;  %5652 = vmatprep.subr.bf16.mxu0 %v8592_v42  ;;  %v6039_v25 = vld [vmem:[%s8562_s6 + $0x158] ss:$12 sps:$4 sm:$0xff]  }
 0xa5d   :  { %2816 = vmatprep.subr.bf16.mxu1 %v6018_v22 }
 0xa5e   :  { %2546 = vadd.xlane.f32.xlu1 %v7567_v13  ;;  %2817 = vmatpush1.bf16.msra.mxu1 %v6016_v37 }
 0xa5f   :  { %5653 = vmatpush3.bf16.msra.mxu0 %v6019_v59  ;;  %2818 = vmatprep.subr.bf16.mxu1 %v6022_v51 }
 0xa60   :  { %5654 = vmatprep.subr.bf16.mxu0 %v8592_v42 }
 0xa62   :  { %2819 = vmatpush1.bf16.msra.mxu1 %v6020_v61 }
 0xa63   :  { %5655 = vmatpush3.bf16.msra.mxu0 %v6023_v7  ;;  %2820 = vmatprep.subr.bf16.mxu1 %v6026_v9 }
 0xa64   :  { %5656 = vmatprep.subr.bf16.mxu0 %v8592_v42 }
 0xa66   :  { %2821 = vmatpush1.bf16.msra.mxu1 %v6024_v1 }
 0xa67   :  { %5657 = vmatpush3.bf16.msra.mxu0 %v6027_v23  ;;  %2822 = vmatprep.subr.bf16.mxu1 %v6030_v18 }
 0xa68   :  { %5658 = vmatprep.subr.bf16.mxu0 %v8592_v42 }
 0xa6a   :  { %2823 = vmatpush1.bf16.msra.mxu1 %v6028_v15 }
 0xa6b   :  { %5659 = vmatpush3.bf16.msra.mxu0 %v6031_v62  ;;  %2824 = vmatprep.subr.bf16.mxu1 %v6034_v52 }
 0xa6c   :  { %5660 = vmatprep.subr.bf16.mxu0 %v8592_v42 }
 0xa6e   :  { %2825 = vmatpush1.bf16.msra.mxu1 %v6032_v20 }
 0xa6f   :  { %5661 = vmatpush3.bf16.msra.mxu0 %v6035_v40  ;;  %2826 = vmatprep.subr.bf16.mxu1 %v6038_v49 }
 0xa70   :  { %5662 = vmatprep.subr.bf16.mxu0 %v8592_v42 }
 0xa72   :  { %2827 = vmatpush1.bf16.msra.mxu1 %v6036_v29 }
 0xa73   :  { %5663 = vmatpush3.bf16.msra.mxu0 %v6039_v25  ;;  %2828 = vmatprep.subr.bf16.mxu1 %v6042_v54 }
 0xa74   :  { %5664 = vmatprep.subr.bf16.mxu0 %v8592_v42 }
 0xa76   :  { %2829 = vmatpush1.bf16.msra.mxu1 %v6040_v14 }
 0xa77   :  { %5665 = vmatpush3.bf16.msra.mxu0 %v6043_v53 }
 0xad5   :  { %v2537_v47 = vpop.xlane.xlu0 %2536 }
 0xad6   :  { %v2548_v57 = vmul.f32 0.03125, %v2537_v47 }
 0xad7   :  { %v2539_v16 = vpop.xlane.xlu1 %2538 }
 0xad8   :  { %v2554_v58 = vsub.f32 %v7548_v6, %v2548_v57  ;;  %v2549_v41 = vmul.f32 0.03125, %v2539_v16 }
 0xada   :  { %v2555_v10 = vsub.f32 %v7551_v45, %v2549_v41  ;;  %v7595_v11 = vsel %vm62_vm1, %v2554_v58, 0.0 }
 0xadb   :  { %v2566_v8 = vmul.f32 %v7595_v11, %v7595_v11 }
 0xadc   :  { %v7601_v5 = vsel %vm62_vm1, %v2555_v10, 0.0 }
 0xadd   :  { %2572 = vadd.xlane.f32.xlu0 %v2566_v8  ;;  %v2567_v3 = vmul.f32 %v7601_v5, %v7601_v5  ;;  %v5033_v8 = vld [vmem:[%s8563_s4 + $0x1] ss:$0 sm:$0xff] }
 0xadf   :  { %2574 = vadd.xlane.f32.xlu1 %v2567_v3 }
 0xae1   :  { %v2541_v19 = vpop.xlane.xlu0 %2540 }
 0xae2   :  { %v2550_v44 = vmul.f32 0.03125, %v2541_v19 }
 0xae3   :  { %v2543_v2 = vpop.xlane.xlu1 %2542 }
 0xae4   :  { %v2556_v21 = vsub.f32 %v7556_v30, %v2550_v44  ;;  %v2551_v12 = vmul.f32 0.03125, %v2543_v2 }
 0xae6   :  { %v2557_v55 = vsub.f32 %v7559_v36, %v2551_v12  ;;  %v7609_v26 = vsel %vm62_vm1, %v2556_v21, 0.0  ;;  %v5034_v21 = vld [vmem:[%s8564_s5 + $0x1] ss:$0 sm:$0xff] }
 0xae7   :  { %v2568_v50 = vmul.f32 %v7609_v26, %v7609_v26 }
 0xae8   :  { %v7615_v28 = vsel %vm62_vm1, %v2557_v55, 0.0 }
 0xae9   :  { %2576 = vadd.xlane.f32.xlu0 %v2568_v50  ;;  %v2545_v31 = vpop.xlane.xlu0 %2544  ;;  %v2569_v46 = vmul.f32 %v7615_v28, %v7615_v28 }
 0xaea   :  { %v2552_v17 = vmul.f32 0.03125, %v2545_v31 }
 0xaeb   :  { %2578 = vadd.xlane.f32.xlu1 %v2569_v46  ;;  %v2547_v43 = vpop.xlane.xlu1 %2546 }
 0xaec   :  { %v2558_v33 = vsub.f32 %v7564_v35, %v2552_v17  ;;  %v2553_v39 = vmul.f32 0.03125, %v2547_v43 }
 0xaee   :  { %v2559_v48 = vsub.f32 %v7567_v13, %v2553_v39  ;;  %v7623_v60 = vsel %vm62_vm1, %v2558_v33, 0.0 }
 0xaef   :  { %v2570_v32 = vmul.f32 %v7623_v60, %v7623_v60 }
 0xaf0   :  { %v7629_v63 = vsel %vm62_vm1, %v2559_v48, 0.0 }
 0xaf1   :  { %2580 = vadd.xlane.f32.xlu0 %v2570_v32  ;;  %v2571_v34 = vmul.f32 %v7629_v63, %v7629_v63 }
 0xaf3   :  { %2582 = vadd.xlane.f32.xlu1 %v2571_v34 }
 0xb6a   :  { %v2573_v56 = vpop.xlane.xlu0 %2572 }
 0xb6b   :  { %v2584_v22 = vmul.f32 0.03125, %v2573_v56 }
 0xb6c   :  { %v2575_v59 = vpop.xlane.xlu1 %2574 }
 0xb6d   :  { %v2590_v37 = vadd.f32 1e-06, %v2584_v22  ;;  %v2585_v47 = vmul.f32 0.03125, %v2575_v59 }
 0xb6f   :  { %6228 = vrsqrt.f32 %v2590_v37  ;;  %v2591_v57 = vadd.f32 1e-06, %v2585_v47 }
 0xb71   :  { %6230 = vrsqrt.f32 %v2591_v57 }
 0xb76   :  { %v2577_v16 = vpop.xlane.xlu0 %2576 }
 0xb77   :  { %v2586_v58 = vmul.f32 0.03125, %v2577_v16 }
 0xb78   :  { %v2579_v41 = vpop.xlane.xlu1 %2578 }
 0xb79   :  { %v6229_v10 = vpop.eup %6228  ;;  %v2592_v3 = vadd.f32 1e-06, %v2586_v58  ;;  %v2587_v19 = vmul.f32 0.03125, %v2579_v41 }
 0xb7a   :  { %v2602_v44 = vmul.f32 %v6229_v10, %v7595_v11 }
 0xb7b   :  { %v6231_v2 = vpop.eup %6230  ;;  %6232 = vrsqrt.f32 %v2592_v3  ;;  %v2593_v12 = vadd.f32 1e-06, %v2587_v19 }
 0xb7c   :  { %v2614_v55 = vmul.f32 %v5033_v8, %v2602_v44  ;;  %v2603_v50 = vmul.f32 %v6231_v2, %v7601_v5  ;;  %v7735_v44 = vld [vmem:[%s8566_s3] ss:$0 sm:$0xff] }
 0xb7d   :  { %6234 = vrsqrt.f32 %v2593_v12 }
 0xb7e   :  { %v2615_v31 = vmul.f32 %v5033_v8, %v2603_v50  ;;  %v2581_v46 = vpop.xlane.xlu0 %2580  ;;  %v2626_v17 = vadd.f32 %v5034_v21, %v2614_v55  ;;  %v7744_v55 = vld [vmem:[%s8566_s3 + $0x2] ss:$0 sm:$0xff] }
 0xb7f   :  { %v2588_v43 = vmul.f32 0.03125, %v2581_v46 }
 0xb80   :  { %v2583_v33 = vpop.xlane.xlu1 %2582  ;;  %v2627_v39 = vadd.f32 %v5034_v21, %v2615_v31  ;;  %v7750_v31 = vld [vmem:[%s8566_s3 + $0x1] ss:$0 sm:$0xff] }
 0xb81   :  { %v2594_v48 = vadd.f32 1e-06, %v2588_v43  ;;  %v2589_v32 = vmul.f32 0.03125, %v2583_v33 }
 0xb82   :  { %v2632_v11 = vpack.c.bf16 %v2627_v39, %v2626_v17 }
 0xb83   :  { %6236 = vrsqrt.f32 %v2594_v48  ;;  %v2595_v34 = vadd.f32 1e-06, %v2589_v32 }
 0xb84   :  { %2847 = vmatmul.mubr.bf16.vlgmr.msra.gmra.mrb[52].mxu1 %v2632_v11  ;;  %5667 = vmatmul.mubr.bf16.vlgmr.msra.gmra.mrb[60].mxu0 %v2632_v11 }
 0xb85   :  { %v6233_v61 = vpop.eup %6232  ;;  %6238 = vrsqrt.f32 %v2595_v34  ;;  %2856 = vmatprep.mubr.bf16.mxu1 %v8593_v0  ;;  %5670 = vmatprep.mubr.msk.bf16.mxu0 %vm6395_vm0, %v8592_v42  ;;  %v7764_v34 = vld [vmem:[%s8566_s3 + $0x3] ss:$0 sm:$0xff] }
 0xb86   :  { %v2604_v5 = vmul.f32 %v6233_v61, %v7609_v26 }
 0xb87   :  { %v6235_v51 = vpop.eup %6234 }
 0xb88   :  { %v2605_v7 = vmul.f32 %v6235_v51, %v7615_v28  ;;  %v2616_v9 = vmul.f32 %v5033_v8, %v2604_v5 }
 0xb8a   :  { %v2617_v1 = vmul.f32 %v5033_v8, %v2605_v7  ;;  %v2628_v23 = vadd.f32 %v5034_v21, %v2616_v9 }
 0xb8c   :  { %v2629_v18 = vadd.f32 %v5034_v21, %v2617_v1 }
 0xb8d   :  { %v6237_v15 = vpop.eup %6236 }
 0xb8e   :  { %v2633_v62 = vpack.c.bf16 %v2629_v18, %v2628_v23  ;;  %v2606_v52 = vmul.f32 %v6237_v15, %v7623_v60  ;;  %v5067_v60 = vld [vmem:[%s8565_s7 + $0x3] sm:$0x7] }
 0xb8f   :  { %v6239_v20 = vpop.eup %6238  ;;  %v7714_v54 = vrot.slane %v5067_v60, %v6717_v24  ;;  %v7721_v53 = vrot.slane %v5067_v60, %v6724_v27 }
 0xb90   :  { %2857 = vmatmul.mubr.bf16.gmra.mrb[56].mxu1 %v2633_v62  ;;  %5671 = vmatmul.mubr.bf16.gmra.mrb[64].mxu0 %v2633_v62  ;;  %v2607_v40 = vmul.f32 %v6239_v20, %v7629_v63  ;;  %v2618_v49 = vmul.f32 %v5033_v8, %v2606_v52  ;;  %v8594_v63 = vsub.s32 2, %v6714_v4 }
 0xb91   :  { %2866 = vmatprep.mubr.bf16.mxu1 %v8593_v0  ;;  %5674 = vmatprep.mubr.msk.bf16.mxu0 %vm6395_vm0, %v8592_v42 }
 0xb92   :  { %v2619_v26 = vmul.f32 %v5033_v8, %v2607_v40  ;;  %v2630_v28 = vadd.f32 %v5034_v21, %v2618_v49  ;;  %v7718_v14 = vrot.slane %v5067_v60, %v8594_v63 }
 0xb94   :  { %v2631_v29 = vadd.f32 %v5034_v21, %v2619_v26 }
 0xb96   :  { %v2634_v25 = vpack.c.bf16 %v2631_v29, %v2630_v28 }
 0xb98   :  { %2867 = vmatmul.mubr.bf16.gmra.mrb[60].mxu1 %v2634_v25  ;;  %5675 = vmatmul.mubr.bf16.gmra.mrb[68].mxu0 %v2634_v25 }
 0xc57   :  { %v2848_v56 = vpop.f32.mrb[52].mxu1  ;;  %v2911_v22 = vpop.f32.mrb[60].mxu0 }
 0xc58   :  { %v2849_v59 = vadd.f32 %v2848_v56, %v7714_v54  ;;  %v7725_v37 = vadd.f32 %v2911_v22, %v7718_v14  ;;  %v2850_v47 = vpop.f32.mrb[53].mxu1  ;;  %v5668_v57 = vpop.f32.mrb[61].mxu0 }
 0xc59   :  { %v2851_v16 = vadd.f32 %v2850_v47, %v7721_v53  ;;  %v2852_v58 = vpop.f32.mrb[54].mxu1  ;;  %v2914_v41 = vpop.f32.mrb[62].mxu0 }
 0xc5a   :  { %v2934_v10 = vmul.f32 0.35355338, %v2849_v59  ;;  %v2853_v4 = vadd.f32 %v2852_v58, %v7714_v54  ;;  %v7730_v8 = vadd.f32 %v2914_v41, %v7718_v14  ;;  %v2854_v3 = vpop.f32.mrb[55].mxu1  ;;  %v5669_v19 = vpop.f32.mrb[63].mxu0  ;;  %v3020_v2 = vmul.f32 %v7735_v44, %v7725_v37 }
 0xc5b   :  { %v2855_v21 = vadd.f32 %v2854_v3, %v7721_v53  ;;  %v2980_v12 = vmul.f32 %v7735_v44, %v2851_v16  ;;  %v2986_v50 = vmul.f32 %v7744_v55, %v2851_v16  ;;  %v2983_v46 = vmul.f32 %v7750_v31, %v2851_v16 }
 0xc5c   :  { %v2935_v17 = vmul.f32 0.35355338, %v2853_v4  ;;  %v2940_v43 = vmul.f32 %v7735_v44, %v2934_v10  ;;  %v2946_v33 = vmul.f32 %v7744_v55, %v2934_v10  ;;  %v7756_v39 = vmul.f32 %v7750_v31, %v2934_v10 }
 0xc5d   :  { %v2981_v48 = vmul.f32 %v7735_v44, %v2855_v21  ;;  %v2987_v32 = vmul.f32 %v7744_v55, %v2855_v21  ;;  %v2984_v11 = vmul.f32 %v7750_v31, %v2855_v21  ;;  %v2989_v61 = vmul.f32 %v7764_v34, %v2851_v16 }
 0xc5e   :  { %v2941_v5 = vmul.f32 %v7735_v44, %v2935_v17  ;;  %v2947_v51 = vmul.f32 %v7744_v55, %v2935_v17  ;;  %v7770_v7 = vmul.f32 %v7750_v31, %v2935_v17  ;;  %v2990_v9 = vmul.f32 %v7764_v34, %v2855_v21 }
 0xc5f   :  { %v3004_v1 = vpack.c.bf16 %v2981_v48, %v2980_v12  ;;  %v3008_v23 = vpack.c.bf16 %v2987_v32, %v2986_v50  ;;  %v7773_v18 = vpack.c.bf16 %v2984_v11, %v2983_v46  ;;  %v7776_v15 = vmul.f32 %v7764_v34, %v2934_v10 }
 0xc60   :  { %v2964_v62 = vpack.c.bf16 %v2941_v5, %v2940_v43  ;;  %v2968_v52 = vpack.c.bf16 %v2947_v51, %v2946_v33  ;;  %v7780_v40 = vpack.c.bf16 %v2990_v9, %v2989_v61  ;;  %v7783_v49 = vmul.f32 %v7764_v34, %v2935_v17 }
 0xc61   :  { %5678 = vmatprep.subr.bf16.mxu1 %v3004_v1  ;;  %5694 = vmatprep.subr.bf16.mxu0 %v3008_v23  ;;  %v3021_v26 = vmul.f32 %v7735_v44, %v7730_v8  ;;  %v3023_v28 = vmul.f32 %v7750_v31, %v7725_v37  ;;  %v3024_v29 = vmul.f32 %v7750_v31, %v7730_v8 }
 0xc62   :  { %5679 = vmatpush3.bf16.xpose.msra.mxu1 %v3004_v1  ;;  %5682 = vmatprep.mubr.bf16.mxu1 %v2964_v62  ;;  %v3026_v25 = vmul.f32 %v7744_v55, %v7725_v37  ;;  %v3027_v60 = vmul.f32 %v7744_v55, %v7730_v8 }
 0xc63   :  { %5695 = vmatpush3.bf16.xpose.msra.mxu0 %v3008_v23  ;;  %5698 = vmatprep.mubr.bf16.mxu0 %v2968_v52  ;;  %v2858_v63 = vpop.f32.mrb[56].mxu1  ;;  %v7795_v56 = vpop.f32.mrb[64].mxu0  ;;  %v7799_v59 = vpack.c.bf16 %v3021_v26, %v3020_v2  ;;  %v7802_v58 = vpack.c.bf16 %v3024_v29, %v3023_v28 }
 0xc64   :  { %v2859_v47 = vadd.f32 %v2858_v63, %v7714_v54  ;;  %v2860_v57 = vpop.f32.mrb[57].mxu1  ;;  %v5672_v16 = vpop.f32.mrb[65].mxu0  ;;  %v7804_v41 = vpack.c.bf16 %v3027_v60, %v3026_v25 }
 0xc65   :  { %v7807_v10 = vadd.f32 %v2860_v57, %v7721_v53  ;;  %v2862_v4 = vpop.f32.mrb[58].mxu1  ;;  %v2922_v3 = vpop.f32.mrb[66].mxu0 }
 0xc66   :  { %v7809_v19 = vmul.f32 0.35355338, %v2859_v47  ;;  %v2863_v21 = vadd.f32 %v2862_v4, %v7714_v54  ;;  %v2864_v12 = vpop.f32.mrb[59].mxu1  ;;  %v5673_v2 = vpop.f32.mrb[67].mxu0 }
 0xc67   :  { %v2982_v50 = vmul.f32 %v7735_v44, %v7807_v10  ;;  %v2988_v46 = vmul.f32 %v7744_v55, %v7807_v10  ;;  %v2865_v17 = vadd.f32 %v2864_v12, %v7721_v53  ;;  %v2985_v28 = vmul.f32 %v7750_v31, %v7807_v10 }
 0xc68   :  { %v2942_v48 = vmul.f32 %v7735_v44, %v7809_v19  ;;  %v2937_v32 = vmul.f32 0.35355338, %v2863_v21  ;;  %v2948_v1 = vmul.f32 %v7744_v55, %v7809_v19 }
 0xc69   :  { %v3005_v43 = vpack.c.bf16 %v2982_v50, %v2982_v50  ;;  %v3009_v33 = vpack.c.bf16 %v2988_v46, %v2988_v46  ;;  %v2992_v26 = vmul.f32 %v7735_v44, %v2865_v17  ;;  %v2998_v57 = vmul.f32 %v7744_v55, %v2865_v17 }
 0xc6a   :  { %v2965_v29 = vpack.c.bf16 %v2942_v48, %v2942_v48  ;;  %v2952_v47 = vmul.f32 %v7735_v44, %v2937_v32  ;;  %v7839_v50 = vmul.f32 %v7744_v55, %v2937_v32 }
 0xc6b   :  { %v2868_v11 = vpop.f32.mrb[60].mxu1  ;;  %v2927_v61 = vpop.f32.mrb[68].mxu0  ;;  %5680 = vmatprep.subr.bf16.mxu1 %v3005_v43  ;;  %5696 = vmatprep.subr.bf16.mxu0 %v3009_v33 }
 0xc6c   :  { %v2869_v5 = vadd.f32 %v2868_v11, %v7714_v54  ;;  %v2870_v51 = vpop.f32.mrb[61].mxu1  ;;  %v5676_v9 = vpop.f32.mrb[69].mxu0  ;;  %5681 = vmatpush3.bf16.xpose.msra.mxu1 %v3005_v43  ;;  %5697 = vmatpush3.bf16.xpose.msra.mxu0 %v3009_v33  ;;  %v2995_v43 = vmul.f32 %v7750_v31, %v2865_v17  ;;  %v2969_v33 = vpack.c.bf16 %v2948_v1, %v2948_v1 }
 0xc6d   :  { %v2871_v23 = vadd.f32 %v2870_v51, %v7721_v53  ;;  %v2872_v62 = vpop.f32.mrb[62].mxu1  ;;  %v7823_v52 = vpop.f32.mrb[70].mxu0  ;;  %5686 = vmatprep.subr.bf16.mxu1 %v7773_v18  ;;  %v2928_v20 = vadd.f32 %v2927_v61, %v7718_v14  ;;  %v7855_v1 = vmul.f32 %v7750_v31, %v2937_v32 }
 0xc6e   :  { %v2938_v25 = vmul.f32 0.35355338, %v2869_v5  ;;  %v2874_v60 = vpop.f32.mrb[63].mxu1  ;;  %v5677_v63 = vpop.f32.mrb[71].mxu0  ;;  %v2873_v61 = vadd.f32 %v2872_v62, %v7714_v54  ;;  %v3030_v54 = vmul.f32 %v7764_v34, %v7730_v8  ;;  %v3029_v62 = vmul.f32 %v7764_v34, %v7725_v37 }
 0xc6f   :  { %v7832_v16 = vadd.f32 %v2874_v60, %v7721_v53  ;;  %v2993_v4 = vmul.f32 %v7735_v44, %v2871_v23  ;;  %v2999_v21 = vmul.f32 %v7744_v55, %v2871_v23  ;;  %v2996_v12 = vmul.f32 %v7750_v31, %v2871_v23 }
 0xc70   :  { %v2953_v2 = vmul.f32 %v7735_v44, %v2938_v25  ;;  %v7842_v46 = vmul.f32 %v7744_v55, %v2938_v25  ;;  %v2923_v60 = vadd.f32 %v2922_v3, %v7718_v14  ;;  %v3007_v63 = vpack.c.bf16 %v2985_v28, %v2985_v28 }
 0xc71   :  { %v3012_v48 = vpack.c.bf16 %v2993_v4, %v2992_v26  ;;  %v2994_v53 = vmul.f32 %v7735_v44, %v7832_v16  ;;  %v3016_v11 = vpack.c.bf16 %v2999_v21, %v2998_v57  ;;  %v7849_v9 = vpack.c.bf16 %v2996_v12, %v2995_v43 }
 0xc72   :  { %v2972_v5 = vpack.c.bf16 %v2953_v2, %v2952_v47  ;;  %v2976_v51 = vpack.c.bf16 %v7842_v46, %v7839_v50  ;;  %v7858_v26 = vmul.f32 %v7750_v31, %v2938_v25  ;;  %v8595_v47 = vpack.c.bf16 %v7770_v7, %v7756_v39 }
 0xc73   :  { %5683 = vmatmul.mubr.bf16.vlgmr.msra.gmra.mrb[64].mxu1 %v2965_v29  ;;  %5699 = vmatmul.mubr.bf16.vlgmr.msra.gmra.mrb[72].mxu0 %v2969_v33  ;;  %v3013_v22 = vpack.c.bf16 %v2994_v53, %v2994_v53  ;;  %v3001_v3 = vmul.f32 %v7764_v34, %v2865_v17  ;;  %v3002_v28 = vmul.f32 %v7764_v34, %v2871_v23  ;;  %v7884_v4 = vmul.f32 0.35355338, %v2873_v61 }
 0xc74   :  { %5710 = vmatprep.subr.bf16.mxu0 %v3012_v48  ;;  %5687 = vmatpush3.bf16.xpose.msra.mxu1 %v7773_v18  ;;  %v2974_v18 = vpack.c.bf16 %v7858_v26, %v7855_v1  ;;  %v7871_v57 = vmul.f32 %v7764_v34, %v2937_v32  ;;  %v7874_v39 = vmul.f32 %v7764_v34, %v2938_v25 }
 0xc75   :  { %5690 = vmatprep.mubr.bf16.mxu1 %v8595_v47  ;;  %5711 = vmatpush3.bf16.xpose.msra.mxu0 %v3012_v48  ;;  %v7868_v29 = vpack.c.bf16 %v3002_v28, %v3001_v3  ;;  %v3032_v7 = vmul.f32 %v7735_v44, %v2923_v60  ;;  %v3033_v17 = vmul.f32 %v7735_v44, %v2928_v20 }
 0xc76   :  { %5714 = vmatprep.mubr.bf16.mxu0 %v2972_v5  ;;  %5688 = vmatprep.subr.bf16.mxu1 %v3007_v63  ;;  %v2978_v23 = vpack.c.bf16 %v7874_v39, %v7871_v57  ;;  %v3035_v25 = vmul.f32 %v7750_v31, %v2923_v60  ;;  %v3036_v21 = vmul.f32 %v7750_v31, %v2928_v20 }
 0xc77   :  { %5712 = vmatprep.subr.bf16.mxu0 %v3013_v22  ;;  %v7886_v32 = vpack.c.bf16 %v3033_v17, %v3032_v7  ;;  %v3038_v2 = vmul.f32 %v7744_v55, %v2923_v60  ;;  %v3039_v8 = vmul.f32 %v7744_v55, %v2928_v20  ;;  %v7894_v50 = vpack.c.bf16 %v3030_v54, %v3029_v62 }
 0xc78   :  { %v7890_v12 = vpack.c.bf16 %v3036_v21, %v3035_v25  ;;  %v2945_v37 = vmul.f32 %v7750_v31, %v7809_v19  ;;  %v2954_v46 = vmul.f32 %v7735_v44, %v7884_v4  ;;  %v3041_v33 = vmul.f32 %v7764_v34, %v2923_v60 }
 0xc79   :  { %v7901_v43 = vpack.c.bf16 %v3039_v8, %v3038_v2  ;;  %v3042_v48 = vmul.f32 %v7764_v34, %v2928_v20  ;;  %v2991_v53 = vmul.f32 %v7764_v34, %v7807_v10  ;;  %v8596_v60 = vpack.c.bf16 %v7783_v49, %v7776_v15 }
 0xc7a   :  { %v2967_v5 = vpack.c.bf16 %v2945_v37, %v2945_v37  ;;  %v2973_v1 = vpack.c.bf16 %v2954_v46, %v2954_v46  ;;  %v7917_v10 = vadd.f32 %v7795_v56, %v7718_v14  ;;  %v2960_v15 = vmul.f32 %v7744_v55, %v7884_v4 }
 0xc7b   :  { %v3011_v26 = vpack.c.bf16 %v2991_v53, %v2991_v53  ;;  %v2997_v49 = vmul.f32 %v7750_v31, %v7832_v16  ;;  %v7945_v61 = vadd.f32 %v7823_v52, %v7718_v14 }
 0xc7c   :  { %5689 = vmatpush3.bf16.xpose.msra.mxu1 %v3007_v63  ;;  %v7909_v63 = vpack.c.bf16 %v3042_v48, %v3041_v33 }
 0xc7d   :  { %5713 = vmatpush3.bf16.xpose.msra.mxu0 %v3013_v22  ;;  %5702 = vmatprep.subr.bf16.mxu1 %v7780_v40  ;;  %v3000_v22 = vmul.f32 %v7744_v55, %v7832_v16  ;;  %v3015_v47 = vpack.c.bf16 %v2997_v49, %v2997_v49 }
 0xc7e   :  { %5726 = vmatprep.subr.bf16.mxu0 %v3016_v11 }
 0xc7f   :  { %v3017_v20 = vpack.c.bf16 %v3000_v22, %v3000_v22 }
 0xc83   :  { %5691 = vmatmul.mubr.bf16.vlgmr.msra.gmra.mrb[68].mxu1 %v2967_v5 }
 0xc84   :  { %5715 = vmatmul.mubr.bf16.vlgmr.msra.gmra.mrb[76].mxu0 %v2973_v1  ;;  %5703 = vmatpush3.bf16.xpose.msra.mxu1 %v7780_v40  ;;  %v2951_v40 = vmul.f32 %v7764_v34, %v7809_v19  ;;  %v2957_v19 = vmul.f32 %v7750_v31, %v7884_v4 }
 0xc85   :  { %5706 = vmatprep.mubr.bf16.mxu1 %v8596_v60  ;;  %5727 = vmatpush3.bf16.xpose.msra.mxu0 %v3016_v11  ;;  %v3022_v11 = vmul.f32 %v7735_v44, %v7917_v10 }
 0xc86   :  { %5730 = vmatprep.mubr.bf16.mxu0 %v2976_v51  ;;  %5704 = vmatprep.subr.bf16.mxu1 %v3011_v26  ;;  %v2971_v56 = vpack.c.bf16 %v2951_v40, %v2951_v40  ;;  %v2977_v51 = vpack.c.bf16 %v2960_v15, %v2960_v15  ;;  %v2975_v28 = vpack.c.bf16 %v2957_v19, %v2957_v19 }
 0xc87   :  { %5728 = vmatprep.subr.bf16.mxu0 %v3017_v20  ;;  %v3045_v3 = vpack.c.bf16 %v3022_v11, %v3022_v11 }
 0xc89   :  { %v3755_v55 = vsel %vm1469_vm2, %v3045_v3, 0 }
 0xc8c   :  { %5705 = vmatpush3.bf16.xpose.msra.mxu1 %v3011_v26 }
 0xc8d   :  { %5729 = vmatpush3.bf16.xpose.msra.mxu0 %v3017_v20  ;;  %5718 = vmatprep.subr.bf16.mxu1 %v7849_v9 }
 0xc8e   :  { %5742 = vmatprep.subr.bf16.mxu0 %v7799_v59 }
 0xc93   :  { %5707 = vmatmul.mubr.bf16.vlgmr.msra.gmra.mrb[72].mxu1 %v2971_v56 }
 0xc94   :  { %5731 = vmatmul.mubr.bf16.vlgmr.msra.gmra.mrb[80].mxu0 %v2977_v51  ;;  %5719 = vmatpush3.bf16.xpose.msra.mxu1 %v7849_v9  ;;  %v3003_v9 = vmul.f32 %v7764_v34, %v7832_v16  ;;  %v2963_v16 = vmul.f32 %v7764_v34, %v7884_v4 }
 0xc95   :  { %5722 = vmatprep.mubr.bf16.mxu1 %v2974_v18  ;;  %5743 = vmatpush3.bf16.msra.mxu0 %v7799_v59  ;;  %v3034_v18 = vmul.f32 %v7735_v44, %v7945_v61 }
 0xc96   :  { %5720 = vmatprep.subr.bf16.mxu1 %v3015_v47  ;;  %5918 = vmatprep.subr.msk.bf16.mxu0 %vm1469_vm2, %v3045_v3  ;;  %v3019_v59 = vpack.c.bf16 %v3003_v9, %v3003_v9  ;;  %v2979_v7 = vpack.c.bf16 %v2963_v16, %v2963_v16 }
 0xc99   :  { %5745 = vmatpush3.bf16.msra.mxu0 %v3755_v55 }
 0xc9a   :  { %5750 = vmatprep.subr.bf16.mxu0 %v7802_v58 }
 0xc9c   :  { %5721 = vmatpush3.bf16.xpose.msra.mxu1 %v3015_v47 }
 0xc9d   :  { %5734 = vmatprep.subr.bf16.mxu1 %v7868_v29 }
 0xca3   :  { %5723 = vmatmul.mubr.bf16.vlgmr.msra.gmra.mrb[76].mxu1 %v2975_v28 }
 0xca4   :  { %5735 = vmatpush3.bf16.xpose.msra.mxu1 %v7868_v29  ;;  %5738 = vmatprep.mubr.bf16.mxu1 %v2978_v23  ;;  %v3053_v29 = vpack.c.bf16 %v3034_v18, %v3034_v18 }
 0xca5   :  { %5736 = vmatprep.subr.bf16.mxu1 %v3019_v59 }
 0xca6   :  { %v3983_v57 = vsel %vm1469_vm2, %v3053_v29, 0 }
 0xcac   :  { %5737 = vmatpush3.bf16.xpose.msra.mxu1 %v3019_v59 }
 0xcad   :  { %5774 = vmatprep.subr.bf16.mxu1 %v7886_v32 }
 0xcb3   :  { %5739 = vmatmul.mubr.bf16.vlgmr.msra.gmra.mrb[80].mxu1 %v2979_v7 }
 0xcb4   :  { %5775 = vmatpush3.bf16.msra.mxu1 %v7886_v32 }
 0xcb5   :  { %5922 = vmatprep.subr.msk.bf16.mxu1 %vm1469_vm2, %v3053_v29 }
 0xcb8   :  { %5777 = vmatpush3.bf16.msra.mxu1 %v3983_v57 }
 0xcb9   :  { %5782 = vmatprep.subr.bf16.mxu1 %v7890_v12 }
 0xd46   :  { %v5684_v14 = vpop.f32.mrb[64].mxu1  ;;  %v7956_v52 = vpop.f32.mrb[72].mxu0 }
 0xd47   :  { %v3094_v39 = vpop.f32.mrb[65].mxu1  ;;  %v3190_v34 = vpop.f32.mrb[73].mxu0  ;;  %v7966_v4 = vsel %vm63_vm3, %v5684_v14, -1e+30 }
 0xd48   :  { %v7960_v44 = vsel %vm63_vm3, %v3094_v39, -1e+30  ;;  %v5685_v17 = vpop.f32.mrb[66].mxu1  ;;  %v5701_v54 = vpop.f32.mrb[74].mxu0  ;;  %v3474_v2 = vsel %vm1182_vm4, %v7966_v4, -inf }
 0xd49   :  { %v3097_v23 = vpop.f32.mrb[67].mxu1  ;;  %v3468_v62 = vsel %vm1182_vm4, %v7960_v44, -inf  ;;  %v3193_v25 = vpop.f32.mrb[75].mxu0  ;;  %v8014_v55 = vsel %vm63_vm3, %v3190_v34, -1e+30 }
 0xd4a   :  { %v7970_v32 = vsel %vm63_vm3, %v3097_v23, -1e+30  ;;  %3469 = vmax.xlane.f32.xlu0 %v3468_v62  ;;  %v3486_v19 = vsel %vm1182_vm4, %v8014_v55, -inf }
 0xd4b   :  { %v3471_v21 = vsel %vm1182_vm4, %v7970_v32, -inf }
 0xd4c   :  { %3472 = vmax.xlane.f32.xlu1 %v3471_v21 }
 0xd4e   :  { %3475 = vmax.xlane.f32.xlu0 %v3474_v2 }
 0xd56   :  { %v5692_v8 = vpop.f32.mrb[68].mxu1 }
 0xd57   :  { %v5716_v37 = vpop.f32.mrb[76].mxu0  ;;  %v3142_v46 = vpop.f32.mrb[69].mxu1  ;;  %v8002_v56 = vsel %vm63_vm3, %v5692_v8, -1e+30  ;;  %v8037_v8 = vsel %vm63_vm3, %v7956_v52, -1e+30 }
 0xd58   :  { %v7978_v33 = vsel %vm63_vm3, %v5716_v37, -1e+30  ;;  %v7982_v48 = vsel %vm63_vm3, %v3142_v46, -1e+30  ;;  %v3286_v53 = vpop.f32.mrb[77].mxu0  ;;  %v5693_v5 = vpop.f32.mrb[70].mxu1 }
 0xd59   :  { %v5717_v22 = vpop.f32.mrb[78].mxu0  ;;  %v3145_v1 = vpop.f32.mrb[71].mxu1  ;;  %v3510_v26 = vsel %vm1182_vm4, %v7978_v33, -inf  ;;  %v3477_v60 = vsel %vm1182_vm4, %v7982_v48, -inf  ;;  %v7990_v20 = vsel %vm63_vm3, %v3286_v53, -1e+30 }
 0xd5a   :  { %3511 = vmax.xlane.f32.xlu1 %v3510_v26  ;;  %v3289_v40 = vpop.f32.mrb[79].mxu0  ;;  %3478 = vmax.xlane.f32.xlu0 %v3477_v60  ;;  %v3504_v49 = vsel %vm1182_vm4, %v7990_v20, -inf  ;;  %v8006_v51 = vsel %vm63_vm3, %v3145_v1, -1e+30  ;;  %v3483_v3 = vsel %vm1182_vm4, %v8002_v56, -inf  ;;  %v3492_v53 = vsel %vm1182_vm4, %v8037_v8, -inf }
 0xd5b   :  { %v7994_v15 = vsel %vm63_vm3, %v3289_v40, -1e+30  ;;  %v3480_v47 = vsel %vm1182_vm4, %v8006_v51, -inf  ;;  %v8043_v46 = vsel %vm63_vm3, %v3193_v25, -1e+30 }
 0xd5c   :  { %v3507_v11 = vsel %vm1182_vm4, %v7994_v15, -inf  ;;  %v3489_v52 = vsel %vm1182_vm4, %v8043_v46, -inf }
 0xd5e   :  { %3505 = vmax.xlane.f32.xlu1 %v3504_v49  ;;  %3508 = vmax.xlane.f32.xlu0 %v3507_v11 }
 0xd62   :  { %3481 = vmax.xlane.f32.xlu1 %v3480_v47  ;;  %3484 = vmax.xlane.f32.xlu0 %v3483_v3 }
 0xd66   :  { %v5708_v9 = vpop.f32.mrb[72].mxu1  ;;  %3487 = vmax.xlane.f32.xlu0 %v3486_v19 }
 0xd67   :  { %v5732_v28 = vpop.f32.mrb[80].mxu0  ;;  %v3238_v59 = vpop.f32.mrb[73].mxu1  ;;  %v8073_v47 = vsel %vm63_vm3, %v5708_v9, -1e+30 }
 0xd68   :  { %v3382_v16 = vpop.f32.mrb[81].mxu0  ;;  %v5709_v18 = vpop.f32.mrb[74].mxu1  ;;  %v8061_v1 = vsel %vm63_vm3, %v3238_v59, -1e+30  ;;  %v8067_v60 = vsel %vm63_vm3, %v5732_v28, -1e+30 }
 0xd69   :  { %v5733_v7 = vpop.f32.mrb[82].mxu0  ;;  %v3241_v29 = vpop.f32.mrb[75].mxu1  ;;  %v8055_v22 = vsel %vm63_vm3, %v3382_v16, -1e+30  ;;  %v3495_v49 = vsel %vm1182_vm4, %v8061_v1, -inf  ;;  %v3528_v3 = vsel %vm1182_vm4, %v8067_v60, -inf }
 0xd6a   :  { %v3385_v57 = vpop.f32.mrb[83].mxu0  ;;  %v3522_v26 = vsel %vm1182_vm4, %v8055_v22, -inf  ;;  %v8079_v59 = vsel %vm63_vm3, %v3241_v29, -1e+30  ;;  %v3501_v16 = vsel %vm1182_vm4, %v8073_v47, -inf }
 0xd6b   :  { %v8049_v5 = vsel %vm63_vm3, %v3385_v57, -1e+30  ;;  %v3498_v18 = vsel %vm1182_vm4, %v8079_v59, -inf }
 0xd6c   :  { %v3525_v25 = vsel %vm1182_vm4, %v8049_v5, -inf }
 0xd76   :  { %v5724_v14 = vpop.f32.mrb[76].mxu1 }
 0xd77   :  { %v8020_v39 = vsel %vm63_vm3, %v5724_v14, -1e+30  ;;  %v3334_v34 = vpop.f32.mrb[77].mxu1 }
 0xd78   :  { %v5725_v17 = vpop.f32.mrb[78].mxu1  ;;  %v3519_v54 = vsel %vm1182_vm4, %v8020_v39, -inf  ;;  %v8026_v23 = vsel %vm63_vm3, %v3334_v34, -1e+30 }
 0xd79   :  { %v3337_v62 = vpop.f32.mrb[79].mxu1  ;;  %3520 = vmax.xlane.f32.xlu1 %v3519_v54  ;;  %v3513_v37 = vsel %vm1182_vm4, %v8026_v23, -inf }
 0xd7a   :  { %v8030_v21 = vsel %vm63_vm3, %v3337_v62, -1e+30 }
 0xd7b   :  { %v3516_v2 = vsel %vm1182_vm4, %v8030_v21, -inf }
 0xd7c   :  { %3517 = vmax.xlane.f32.xlu0 %v3516_v2 }
 0xd7d   :  { %3514 = vmax.xlane.f32.xlu1 %v3513_v37 }
 0xd80   :  { %3493 = vmax.xlane.f32.xlu0 %v3492_v53 }
 0xd81   :  { %3490 = vmax.xlane.f32.xlu1 %v3489_v52 }
 0xd84   :  { %3526 = vmax.xlane.f32.xlu0 %v3525_v25 }
 0xd85   :  { %3523 = vmax.xlane.f32.xlu1 %v3522_v26 }
 0xd86   :  { %v5740_v40 = vpop.f32.mrb[80].mxu1 }
 0xd87   :  { %v3430_v11 = vpop.f32.mrb[81].mxu1  ;;  %v8099_v14 = vsel %vm63_vm3, %v5740_v40, -1e+30 }
 0xd88   :  { %v5741_v19 = vpop.f32.mrb[82].mxu1  ;;  %3496 = vmax.xlane.f32.xlu0 %v3495_v49  ;;  %v8091_v7 = vsel %vm63_vm3, %v3430_v11, -1e+30  ;;  %v3537_v34 = vsel %vm1182_vm4, %v8099_v14, -inf }
 0xd89   :  { %v3433_v28 = vpop.f32.mrb[83].mxu1  ;;  %3529 = vmax.xlane.f32.xlu1 %v3528_v3  ;;  %v3531_v57 = vsel %vm1182_vm4, %v8091_v7, -inf }
 0xd8a   :  { %v8087_v9 = vsel %vm63_vm3, %v3433_v28, -1e+30 }
 0xd8b   :  { %v3534_v29 = vsel %vm1182_vm4, %v8087_v9, -inf }
 0xd8c   :  { %3502 = vmax.xlane.f32.xlu0 %v3501_v16 }
 0xd8d   :  { %3499 = vmax.xlane.f32.xlu1 %v3498_v18 }
 0xd90   :  { %3535 = vmax.xlane.f32.xlu0 %v3534_v29 }
 0xd91   :  { %3532 = vmax.xlane.f32.xlu1 %v3531_v57 }
 0xd95   :  { %3538 = vmax.xlane.f32.xlu1 %v3537_v34 }
 0xdd7   :  { %v3470_v17 = vpop.xlane.xlu0 %3469 }
 0xdd8   :  { %v3540_v54 = vsub.f32 %v7960_v44, %v3470_v17 }
 0xdd9   :  { %v3473_v62 = vpop.xlane.xlu1 %3472 }
 0xdda   :  { %v3564_v2 = vmul.f32 1.442695, %v3540_v54  ;;  %v3541_v37 = vsub.f32 %v7970_v32, %v3473_v62 }
 0xddb   :  { %v3476_v53 = vpop.xlane.xlu0 %3475 }
 0xddc   :  { %6240 = vpow2.f32 %v3564_v2  ;;  %v3566_v52 = vmul.f32 1.442695, %v3541_v37  ;;  %v3542_v25 = vsub.f32 %v7966_v4, %v3476_v53 }
 0xdde   :  { %6242 = vpow2.f32 %v3566_v52  ;;  %v3568_v26 = vmul.f32 1.442695, %v3542_v25 }
 0xde0   :  { %6244 = vpow2.f32 %v3568_v26 }
 0xde6   :  { %v8106_v40 = vpop.eup %6240 }
 0xde7   :  { %v3512_v49 = vpop.xlane.xlu1 %3511  ;;  %v3479_v11 = vpop.xlane.xlu0 %3478  ;;  %v3612_v3 = vsel %vm1182_vm4, %v8106_v40, 0.0 }
 0xde8   :  { %v8110_v44 = vpop.eup %6242  ;;  %v3554_v19 = vsub.f32 %v7978_v33, %v3512_v49  ;;  %v3543_v32 = vsub.f32 %v7982_v48, %v3479_v11  ;;  %3613 = vadd.xlane.f32.xlu0 %v3612_v3 }
 0xde9   :  { %v3615_v4 = vsel %vm1182_vm4, %v8110_v44, 0.0 }
 0xdea   :  { %v8116_v28 = vpop.eup %6244  ;;  %v3592_v16 = vmul.f32 1.442695, %v3554_v19  ;;  %v3570_v18 = vmul.f32 1.442695, %v3543_v32  ;;  %3616 = vadd.xlane.f32.xlu1 %v3615_v4 }
 0xdeb   :  { %v3506_v29 = vpop.xlane.xlu1 %3505  ;;  %v3509_v57 = vpop.xlane.xlu0 %3508  ;;  %v3618_v34 = vsel %vm1182_vm4, %v8116_v28, 0.0 }
 0xdec   :  { %6246 = vpow2.f32 %v3592_v16  ;;  %v3552_v17 = vsub.f32 %v7990_v20, %v3506_v29  ;;  %v3553_v33 = vsub.f32 %v7994_v15, %v3509_v57  ;;  %3619 = vadd.xlane.f32.xlu0 %v3618_v34 }
 0xded   :  { %6248 = vpow2.f32 %v3570_v18 }
 0xdee   :  { %v3588_v48 = vmul.f32 1.442695, %v3552_v17  ;;  %v3590_v54 = vmul.f32 1.442695, %v3553_v33 }
 0xdef   :  { %v3482_v62 = vpop.xlane.xlu1 %3481  ;;  %v3485_v2 = vpop.xlane.xlu0 %3484 }
 0xdf0   :  { %6250 = vpow2.f32 %v3588_v48  ;;  %v3544_v37 = vsub.f32 %v8006_v51, %v3482_v62  ;;  %v3545_v53 = vsub.f32 %v8002_v56, %v3485_v2 }
 0xdf1   :  { %6252 = vpow2.f32 %v3590_v54 }
 0xdf2   :  { %v3572_v52 = vmul.f32 1.442695, %v3544_v37  ;;  %v3574_v25 = vmul.f32 1.442695, %v3545_v53 }
 0xdf3   :  { %v3488_v26 = vpop.xlane.xlu0 %3487 }
 0xdf4   :  { %6254 = vpow2.f32 %v3572_v52  ;;  %v3546_v20 = vsub.f32 %v8014_v55, %v3488_v26 }
 0xdf5   :  { %6256 = vpow2.f32 %v3574_v25 }
 0xdf6   :  { %v8125_v15 = vpop.eup %6246  ;;  %v3576_v49 = vmul.f32 1.442695, %v3546_v20 }
 0xdf7   :  { %v8127_v11 = vpop.eup %6248  ;;  %v3654_v3 = vsel %vm1182_vm4, %v8125_v15, 0.0 }
 0xdf8   :  { %6258 = vpow2.f32 %v3576_v49  ;;  %3655 = vadd.xlane.f32.xlu1 %v3654_v3  ;;  %v3621_v56 = vsel %vm1182_vm4, %v8127_v11, 0.0 }
 0xdf9   :  { %3622 = vadd.xlane.f32.xlu0 %v3621_v56 }
 0xdfa   :  { %v8133_v51 = vpop.eup %6250 }
 0xdfb   :  { %v8135_v19 = vpop.eup %6252  ;;  %v3648_v55 = vsel %vm1182_vm4, %v8133_v51, 0.0 }
 0xdfc   :  { %3649 = vadd.xlane.f32.xlu1 %v3648_v55  ;;  %v3651_v32 = vsel %vm1182_vm4, %v8135_v19, 0.0 }
 0xdfd   :  { %3652 = vadd.xlane.f32.xlu0 %v3651_v32 }
 0xdfe   :  { %v8141_v4 = vpop.eup %6254 }
 0xdff   :  { %v8143_v16 = vpop.eup %6256  ;;  %v3624_v18 = vsel %vm1182_vm4, %v8141_v4, 0.0 }
 0xe00   :  { %3625 = vadd.xlane.f32.xlu1 %v3624_v18  ;;  %v3627_v29 = vsel %vm1182_vm4, %v8143_v16, 0.0 }
 0xe01   :  { %3628 = vadd.xlane.f32.xlu0 %v3627_v29 }
 0xe02   :  { %v8149_v57 = vpop.eup %6258 }
 0xe03   :  { %v3630_v34 = vsel %vm1182_vm4, %v8149_v57, 0.0 }
 0xe05   :  { %3631 = vadd.xlane.f32.xlu0 %v3630_v34 }
 0xe06   :  { %v3521_v17 = vpop.xlane.xlu1 %3520 }
 0xe07   :  { %v3557_v33 = vsub.f32 %v8020_v39, %v3521_v17 }
 0xe09   :  { %v3598_v48 = vmul.f32 1.442695, %v3557_v33  ;;  %v3518_v54 = vpop.xlane.xlu0 %3517 }
 0xe0a   :  { %v3556_v62 = vsub.f32 %v8030_v21, %v3518_v54  ;;  %v3515_v2 = vpop.xlane.xlu1 %3514 }
 0xe0b   :  { %6260 = vpow2.f32 %v3598_v48  ;;  %v3555_v37 = vsub.f32 %v8026_v23, %v3515_v2 }
 0xe0c   :  { %v3596_v53 = vmul.f32 1.442695, %v3556_v62 }
 0xe0d   :  { %v3594_v52 = vmul.f32 1.442695, %v3555_v37  ;;  %v3494_v25 = vpop.xlane.xlu0 %3493 }
 0xe0e   :  { %6262 = vpow2.f32 %v3596_v53  ;;  %v3548_v26 = vsub.f32 %v8037_v8, %v3494_v25  ;;  %v3491_v20 = vpop.xlane.xlu1 %3490 }
 0xe0f   :  { %6264 = vpow2.f32 %v3594_v52  ;;  %v3547_v49 = vsub.f32 %v8043_v46, %v3491_v20 }
 0xe10   :  { %v3580_v3 = vmul.f32 1.442695, %v3548_v26 }
 0xe11   :  { %v3578_v39 = vmul.f32 1.442695, %v3547_v49  ;;  %v3527_v56 = vpop.xlane.xlu0 %3526 }
 0xe12   :  { %6266 = vpow2.f32 %v3580_v3  ;;  %v3559_v21 = vsub.f32 %v8049_v5, %v3527_v56  ;;  %v3524_v55 = vpop.xlane.xlu1 %3523 }
 0xe13   :  { %6268 = vpow2.f32 %v3578_v39  ;;  %v3558_v23 = vsub.f32 %v8055_v22, %v3524_v55 }
 0xe14   :  { %v3602_v32 = vmul.f32 1.442695, %v3559_v21 }
 0xe15   :  { %v8160_v18 = vpop.eup %6260  ;;  %v3600_v29 = vmul.f32 1.442695, %v3558_v23  ;;  %v3497_v34 = vpop.xlane.xlu0 %3496 }
 0xe16   :  { %6270 = vpow2.f32 %v3602_v32  ;;  %v3549_v8 = vsub.f32 %v8061_v1, %v3497_v34  ;;  %v3530_v17 = vpop.xlane.xlu1 %3529  ;;  %v3663_v46 = vsel %vm1182_vm4, %v8160_v18, 0.0 }
 0xe17   :  { %6272 = vpow2.f32 %v3600_v29  ;;  %v3560_v33 = vsub.f32 %v8067_v60, %v3530_v17  ;;  %3664 = vadd.xlane.f32.xlu1 %v3663_v46 }
 0xe18   :  { %v8166_v5 = vpop.eup %6262  ;;  %v3582_v48 = vmul.f32 1.442695, %v3549_v8 }
 0xe19   :  { %v8168_v22 = vpop.eup %6264  ;;  %v3604_v54 = vmul.f32 1.442695, %v3560_v33  ;;  %v3503_v62 = vpop.xlane.xlu0 %3502  ;;  %v3660_v2 = vsel %vm1182_vm4, %v8166_v5, 0.0 }
 0xe1a   :  { %6274 = vpow2.f32 %v3582_v48  ;;  %v3551_v1 = vsub.f32 %v8073_v47, %v3503_v62  ;;  %v3500_v37 = vpop.xlane.xlu1 %3499  ;;  %3661 = vadd.xlane.f32.xlu0 %v3660_v2  ;;  %v3657_v53 = vsel %vm1182_vm4, %v8168_v22, 0.0 }
 0xe1b   :  { %6276 = vpow2.f32 %v3604_v54  ;;  %v3550_v60 = vsub.f32 %v8079_v59, %v3500_v37  ;;  %3658 = vadd.xlane.f32.xlu1 %v3657_v53 }
 0xe1c   :  { %v8176_v52 = vpop.eup %6266  ;;  %v3586_v25 = vmul.f32 1.442695, %v3551_v1 }
 0xe1d   :  { %v8178_v26 = vpop.eup %6268  ;;  %v3584_v20 = vmul.f32 1.442695, %v3550_v60  ;;  %v3536_v49 = vpop.xlane.xlu0 %3535  ;;  %v3636_v3 = vsel %vm1182_vm4, %v8176_v52, 0.0 }
 0xe1e   :  { %6278 = vpow2.f32 %v3586_v25  ;;  %v3562_v47 = vsub.f32 %v8087_v9, %v3536_v49  ;;  %v3533_v39 = vpop.xlane.xlu1 %3532  ;;  %3637 = vadd.xlane.f32.xlu0 %v3636_v3  ;;  %v3633_v56 = vsel %vm1182_vm4, %v8178_v26, 0.0 }
 0xe1f   :  { %6280 = vpow2.f32 %v3584_v20  ;;  %v3561_v59 = vsub.f32 %v8091_v7, %v3533_v39  ;;  %3634 = vadd.xlane.f32.xlu1 %v3633_v56 }
 0xe20   :  { %v8186_v21 = vpop.eup %6270  ;;  %v3608_v55 = vmul.f32 1.442695, %v3562_v47 }
 0xe21   :  { %v8188_v23 = vpop.eup %6272  ;;  %v3606_v32 = vmul.f32 1.442695, %v3561_v59  ;;  %v3669_v29 = vsel %vm1182_vm4, %v8186_v21, 0.0 }
 0xe22   :  { %6282 = vpow2.f32 %v3608_v55  ;;  %v3539_v9 = vpop.xlane.xlu1 %3538  ;;  %3670 = vadd.xlane.f32.xlu0 %v3669_v29  ;;  %v3666_v34 = vsel %vm1182_vm4, %v8188_v23, 0.0 }
 0xe23   :  { %6284 = vpow2.f32 %v3606_v32  ;;  %v3563_v8 = vsub.f32 %v8099_v14, %v3539_v9  ;;  %3667 = vadd.xlane.f32.xlu1 %v3666_v34 }
 0xe24   :  { %v8195_v7 = vpop.eup %6274 }
 0xe25   :  { %v8197_v17 = vpop.eup %6276  ;;  %v3610_v46 = vmul.f32 1.442695, %v3563_v8  ;;  %v3639_v33 = vsel %vm1182_vm4, %v8195_v7, 0.0  ;;  %v3025_v8 = vmul.f32 %v7750_v31, %v7917_v10 }
 0xe26   :  { %3640 = vadd.xlane.f32.xlu0 %v3639_v33  ;;  %v3672_v48 = vsel %vm1182_vm4, %v8197_v17, 0.0 }
 0xe27   :  { %6286 = vpow2.f32 %v3610_v46  ;;  %3673 = vadd.xlane.f32.xlu1 %v3672_v48 }
 0xe28   :  { %v8203_v54 = vpop.eup %6278 }
 0xe29   :  { %v8205_v62 = vpop.eup %6280  ;;  %v3645_v14 = vsel %vm1182_vm4, %v8203_v54, 0.0 }
 0xe2a   :  { %3646 = vadd.xlane.f32.xlu0 %v3645_v14  ;;  %v3642_v2 = vsel %vm1182_vm4, %v8205_v62, 0.0  ;;  %v3047_v14 = vpack.c.bf16 %v3025_v8, %v3025_v8 }
 0xe2b   :  { %3643 = vadd.xlane.f32.xlu1 %v3642_v2 }
 0xe2c   :  { %v8211_v1 = vpop.eup %6282  ;;  %v3812_v31 = vsel %vm1469_vm2, %v3047_v14, 0 }
 0xe2d   :  { %v8213_v37 = vpop.eup %6284  ;;  %v3678_v53 = vsel %vm1182_vm4, %v8211_v1, 0.0 }
 0xe2e   :  { %3679 = vadd.xlane.f32.xlu0 %v3678_v53  ;;  %v3675_v60 = vsel %vm1182_vm4, %v8213_v37, 0.0 }
 0xe2f   :  { %3676 = vadd.xlane.f32.xlu1 %v3675_v60 }
 0xe31   :  { %v8219_v25 = vpop.eup %6286 }
 0xe32   :  { %v3681_v20 = vsel %vm1182_vm4, %v8219_v25, 0.0 }
 0xe33   :  { %3682 = vadd.xlane.f32.xlu1 %v3681_v20 }
 0xe75   :  { %v3614_v49 = vpop.xlane.xlu0 %3613 }
 0xe76   :  { %6288 = vrcp.f32 %v3614_v49 }
 0xe77   :  { %v3617_v3 = vpop.xlane.xlu1 %3616 }
 0xe78   :  { %6290 = vrcp.f32 %v3617_v3 }
 0xe79   :  { %v3620_v47 = vpop.xlane.xlu0 %3619 }
 0xe7a   :  { %6292 = vrcp.f32 %v3620_v47  ;;  %v6391_v47 = vld [vmem:[%s8566_s3 + $0x1] ss:$0 sm:$0xff] }
 0xe80   :  { %v6289_v39 = vpop.eup %6288 }
 0xe81   :  { %v3708_v59 = vmul.f32 %v6289_v39, %v8106_v40  ;;  %v3037_v39 = vmul.f32 %v6391_v47, %v7945_v61 }
 0xe82   :  { %v6291_v56 = vpop.eup %6290 }
 0xe83   :  { %v3709_v55 = vmul.f32 %v6291_v56, %v8110_v44 }
 0xe84   :  { %v6293_v32 = vpop.eup %6292 }
 0xe85   :  { %v3710_v29 = vmul.f32 %v6293_v32, %v8116_v28  ;;  %v3656_v9 = vpop.xlane.xlu1 %3655  ;;  %v3732_v34 = vpack.c.bf16 %v3709_v55, %v3708_v59 }
 0xe86   :  { %v3623_v46 = vpop.xlane.xlu0 %3622  ;;  %6294 = vrcp.f32 %v3656_v9 }
 0xe87   :  { %5746 = vmatprep.mubr.msk.bf16.mxu0 %vm1182_vm4, %v3732_v34  ;;  %v3733_v33 = vpack.c.bf16 %v3710_v29, %v3710_v29  ;;  %v3055_v34 = vpack.c.bf16 %v3037_v39, %v3037_v39 }
 0xe89   :  { %v3650_v48 = vpop.xlane.xlu1 %3649  ;;  %5747 = vmatmul.mubr.msk.bf16.vlgmr.msra.gmra.mrb[84].mxu0 %vm1182_vm4, %v3733_v33 }
 0xe8a   :  { %6296 = vrcp.f32 %v3650_v48  ;;  %5751 = vmatpush3.bf16.msra.mxu0 %v7802_v58  ;;  %v3653_v40 = vpop.xlane.xlu0 %3652 }
 0xe8b   :  { %6298 = vrcp.f32 %v3653_v40  ;;  %5919 = vmatprep.subr.msk.bf16.mxu0 %vm1469_vm2, %v3047_v14 }
 0xe8c   :  { %6300 = vrcp.f32 %v3623_v46 }
 0xe8d   :  { %v3626_v44 = vpop.xlane.xlu1 %3625 }
 0xe8e   :  { %6302 = vrcp.f32 %v3626_v44  ;;  %5753 = vmatpush3.bf16.msra.mxu0 %v3812_v31  ;;  %v3629_v28 = vpop.xlane.xlu0 %3628 }
 0xe8f   :  { %6304 = vrcp.f32 %v3629_v28  ;;  %5758 = vmatprep.subr.bf16.mxu0 %v7804_v41 }
 0xe90   :  { %v6295_v2 = vpop.eup %6294 }
 0xe91   :  { %v3722_v20 = vmul.f32 %v6295_v2, %v8125_v15 }
 0xe93   :  { %v3741_v32 = vpack.c.bf16 %v3722_v20, %v3722_v20 }
 0xe94   :  { %v6297_v53 = vpop.eup %6296 }
 0xe95   :  { %v6299_v60 = vpop.eup %6298  ;;  %v3720_v58 = vmul.f32 %v6297_v53, %v8133_v51  ;;  %v6392_v51 = vld [vmem:[%s8566_s3 + $0x2] ss:$0 sm:$0xff] }
 0xe96   :  { %v6301_v49 = vpop.eup %6300  ;;  %v3721_v3 = vmul.f32 %v6299_v60, %v8135_v19  ;;  %v3028_v19 = vmul.f32 %v6392_v51, %v7917_v10  ;;  %v3040_v39 = vmul.f32 %v6392_v51, %v7945_v61  ;;  %v6393_v51 = vld [vmem:[%s8566_s3 + $0x3] ss:$0 sm:$0xff] }
 0xe97   :  { %v3711_v29 = vmul.f32 %v6301_v49, %v8127_v11 }
 0xe98   :  { %v6303_v56 = vpop.eup %6302  ;;  %v3740_v59 = vpack.c.bf16 %v3721_v3, %v3720_v58  ;;  %v3049_v11 = vpack.c.bf16 %v3028_v19, %v3028_v19 }
 0xe99   :  { %v6305_v55 = vpop.eup %6304  ;;  %v3712_v9 = vmul.f32 %v6303_v56, %v8141_v4  ;;  %v4040_v4 = vsel %vm1469_vm2, %v3055_v34, 0 }
 0xe9a   :  { %v3713_v15 = vmul.f32 %v6305_v55, %v8143_v16  ;;  %5778 = vmatprep.mubr.msk.bf16.mxu1 %vm1182_vm4, %v3740_v59  ;;  %v3869_v16 = vsel %vm1469_vm2, %v3049_v11, 0 }
 0xe9b   :  { %5779 = vmatmul.mubr.msk.bf16.vlgmr.msra.gmra.mrb[84].mxu1 %vm1182_vm4, %v3741_v32  ;;  %v3734_v8 = vpack.c.bf16 %v3712_v9, %v3711_v29 }
 0xe9c   :  { %5783 = vmatpush3.bf16.msra.mxu1 %v7890_v12  ;;  %v3735_v46 = vpack.c.bf16 %v3713_v15, %v3713_v15  ;;  %v3632_v12 = vpop.xlane.xlu0 %3631  ;;  %v3057_v15 = vpack.c.bf16 %v3040_v39, %v3040_v39  ;;  %v6049_v39 = vld [vmem:[%s8567_s8 + $0x68] sm:$0xff]  }
 0xe9d   :  { %5923 = vmatprep.subr.msk.bf16.mxu1 %vm1469_vm2, %v3055_v34  ;;  %5754 = vmatprep.mubr.msk.bf16.mxu0 %vm1182_vm4, %v3734_v8 }
 0xe9e   :  { %5755 = vmatmul.mubr.msk.bf16.vlgmr.msra.gmra.mrb[84].mxu0 %vm1182_vm4, %v3735_v46 }
 0xe9f   :  { %5759 = vmatpush3.bf16.msra.mxu0 %v7804_v41 }
 0xea0   :  { %5920 = vmatprep.subr.msk.bf16.mxu0 %vm1469_vm2, %v3049_v11  ;;  %5785 = vmatpush3.bf16.msra.mxu1 %v4040_v4 }
 0xea1   :  { %5790 = vmatprep.subr.bf16.mxu1 %v7901_v43 }
 0xea3   :  { %5761 = vmatpush3.bf16.msra.mxu0 %v3869_v16 }
 0xea4   :  { %5766 = vmatprep.subr.bf16.mxu0 %v7894_v50  ;;  %v3665_v33 = vpop.xlane.xlu1 %3664 }
 0xea5   :  { %6306 = vrcp.f32 %v3665_v33 }
 0xea7   :  { %v3662_v48 = vpop.xlane.xlu0 %3661 }
 0xea8   :  { %6308 = vrcp.f32 %v3662_v48  ;;  %v3659_v14 = vpop.xlane.xlu1 %3658 }
 0xea9   :  { %6310 = vrcp.f32 %v3659_v14  ;;  %v3043_v14 = vmul.f32 %v6393_v51, %v7945_v61  ;;  %v6044_v61 = vld [vmem:[%s8567_s8 + $0x40] sm:$0xff]  }
 0xeaa   :  { %6312 = vrcp.f32 %v3632_v12 }
 0xeab   :  { %v3638_v41 = vpop.xlane.xlu0 %3637 }
 0xeac   :  { %6314 = vrcp.f32 %v3638_v41  ;;  %v3635_v40 = vpop.xlane.xlu1 %3634 }
 0xead   :  { %6316 = vrcp.f32 %v3635_v40 }
 0xeaf   :  { %v3671_v44 = vpop.xlane.xlu0 %3670  ;;  %v6307_v31 = vpop.eup %6306 }
 0xeb0   :  { %6318 = vrcp.f32 %v3671_v44  ;;  %v3668_v28 = vpop.xlane.xlu1 %3667  ;;  %v3725_v60 = vmul.f32 %v6307_v31, %v8160_v18 }
 0xeb1   :  { %6320 = vrcp.f32 %v3668_v28  ;;  %v3059_v28 = vpack.c.bf16 %v3043_v14, %v3043_v14 }
 0xeb2   :  { %v6309_v2 = vpop.eup %6308  ;;  %v3743_v9 = vpack.c.bf16 %v3725_v60, %v3725_v60 }
 0xeb3   :  { %v6311_v53 = vpop.eup %6310  ;;  %v3641_v20 = vpop.xlane.xlu0 %3640  ;;  %v3724_v58 = vmul.f32 %v6309_v2, %v8166_v5 }
 0xeb4   :  { %v3674_v49 = vpop.xlane.xlu1 %3673  ;;  %v3723_v3 = vmul.f32 %v6311_v53, %v8168_v22  ;;  %v6313_v47 = vpop.eup %6312 }
 0xeb5   :  { %6322 = vrcp.f32 %v3674_v49  ;;  %v3714_v5 = vmul.f32 %v6313_v47, %v8149_v57  ;;  %v6047_v47 = vld [vmem:[%s8567_s8 + $0x58] sm:$0xff]  }
 0xeb6   :  { %v6315_v56 = vpop.eup %6314  ;;  %v3742_v59 = vpack.c.bf16 %v3724_v58, %v3723_v3  ;;  %6324 = vrcp.f32 %v3641_v20  ;;  %v6045_v58 = vld [vmem:[%s8567_s8 + $0x48] sm:$0xff]   ;;  %v6046_v3 = vld [vmem:[%s8567_s8 + $0x50] sm:$0xff]  }
 0xeb7   :  { %v6317_v55 = vpop.eup %6316  ;;  %v3716_v32 = vmul.f32 %v6315_v56, %v8176_v52  ;;  %v3647_v29 = vpop.xlane.xlu0 %3646  ;;  %v3031_v52 = vmul.f32 %v6393_v51, %v7917_v10  ;;  %v4097_v10 = vsel %vm1469_vm2, %v3057_v15, 0  ;;  %v6050_v56 = vld [vmem:[%s8567_s8 + $0x70] sm:$0xff]  }
 0xeb8   :  { %6326 = vrcp.f32 %v3647_v29  ;;  %v3644_v18 = vpop.xlane.xlu1 %3643  ;;  %5786 = vmatprep.mubr.msk.bf16.mxu1 %vm1182_vm4, %v3742_v59  ;;  %v3715_v22 = vmul.f32 %v6317_v55, %v8178_v26  ;;  %v6051_v59 = vld [vmem:[%s8567_s8 + $0x78] sm:$0xff]  }
 0xeb9   :  { %6328 = vrcp.f32 %v3644_v18  ;;  %5787 = vmatmul.mubr.msk.bf16.vlgmr.msra.gmra.mrb[84].mxu1 %vm1182_vm4, %v3743_v9  ;;  %v3737_v46 = vpack.c.bf16 %v3716_v32, %v3716_v32 }
 0xeba   :  { %v6319_v19 = vpop.eup %6318  ;;  %5791 = vmatpush3.bf16.msra.mxu1 %v7901_v43  ;;  %v3736_v34 = vpack.c.bf16 %v3715_v22, %v3714_v5  ;;  %v3051_v43 = vpack.c.bf16 %v3031_v52, %v3031_v52 }
 0xebb   :  { %v6321_v8 = vpop.eup %6320  ;;  %5924 = vmatprep.subr.msk.bf16.mxu1 %vm1469_vm2, %v3057_v15  ;;  %v3680_v57 = vpop.xlane.xlu0 %3679  ;;  %v3727_v26 = vmul.f32 %v6319_v19, %v8186_v21 }
 0xebc   :  { %6330 = vrcp.f32 %v3680_v57  ;;  %v3677_v11 = vpop.xlane.xlu1 %3676  ;;  %5762 = vmatprep.mubr.msk.bf16.mxu0 %vm1182_vm4, %v3736_v34  ;;  %v3726_v4 = vmul.f32 %v6321_v8, %v8188_v23  ;;  %v3926_v48 = vsel %vm1469_vm2, %v3051_v43, 0  ;;  %v5125_v34 = vld [vmem:[%s8568_s9 + $0x1] ss:$0 sm:$0xff] }
 0xebd   :  { %6332 = vrcp.f32 %v3677_v11  ;;  %5763 = vmatmul.mubr.msk.bf16.vlgmr.msra.gmra.mrb[84].mxu0 %vm1182_vm4, %v3737_v46 }
 0xebe   :  { %5767 = vmatpush3.bf16.msra.mxu0 %v7894_v50  ;;  %5793 = vmatpush3.bf16.msra.mxu1 %v4097_v10  ;;  %v3744_v16 = vpack.c.bf16 %v3727_v26, %v3726_v4 }
 0xebf   :  { %v6323_v12 = vpop.eup %6322  ;;  %5921 = vmatprep.subr.msk.bf16.mxu0 %vm1469_vm2, %v3051_v43  ;;  %5798 = vmatprep.subr.bf16.mxu1 %v7909_v63 }
 0xec0   :  { %v3728_v21 = vmul.f32 %v6323_v12, %v8197_v17  ;;  %v3683_v33 = vpop.xlane.xlu1 %3682  ;;  %5794 = vmatprep.mubr.msk.bf16.mxu1 %vm1182_vm4, %v3744_v16  ;;  %v6325_v23 = vpop.eup %6324 }
 0xec1   :  { %6334 = vrcp.f32 %v3683_v33  ;;  %v3717_v31 = vmul.f32 %v6325_v23, %v8195_v7 }
 0xec2   :  { %v6327_v41 = vpop.eup %6326  ;;  %5769 = vmatpush3.bf16.msra.mxu0 %v3926_v48  ;;  %v3745_v50 = vpack.c.bf16 %v3728_v21, %v3728_v21 }
 0xec3   :  { %v6329_v40 = vpop.eup %6328  ;;  %v3719_v44 = vmul.f32 %v6327_v41, %v8203_v54  ;;  %5806 = vmatprep.subr.bf16.mxu0 %v8592_v42 }
 0xec4   :  { %v3718_v17 = vmul.f32 %v6329_v40, %v8205_v62  ;;  %v4154_v62 = vsel %vm1469_vm2, %v3059_v28, 0 }
 0xec5   :  { %5795 = vmatmul.mubr.msk.bf16.vlgmr.msra.gmra.mrb[84].mxu1 %vm1182_vm4, %v3745_v50  ;;  %v3739_v54 = vpack.c.bf16 %v3719_v44, %v3719_v44 }
 0xec6   :  { %v6331_v2 = vpop.eup %6330  ;;  %5799 = vmatpush3.bf16.msra.mxu1 %v7909_v63  ;;  %v3738_v53 = vpack.c.bf16 %v3718_v17, %v3717_v31 }
 0xec7   :  { %v6333_v60 = vpop.eup %6332  ;;  %5925 = vmatprep.subr.msk.bf16.mxu1 %vm1469_vm2, %v3059_v28  ;;  %v3730_v20 = vmul.f32 %v6331_v2, %v8211_v1  ;;  %v6054_v28 = vld [vmem:[%s8569_s12 + $0x84] ss:$8 sps:$4 sm:$0xff]  }
 0xec8   :  { %5770 = vmatprep.mubr.msk.bf16.mxu0 %vm1182_vm4, %v3738_v53  ;;  %v3729_v7 = vmul.f32 %v6333_v60, %v8213_v37 }
 0xec9   :  { %5771 = vmatmul.mubr.msk.bf16.vlgmr.msra.gmra.mrb[84].mxu0 %vm1182_vm4, %v3739_v54 }
 0xeca   :  { %5801 = vmatpush3.bf16.msra.mxu1 %v4154_v62  ;;  %v3746_v63 = vpack.c.bf16 %v3730_v20, %v3729_v7  ;;  %5807 = vmatpush3.bf16.msra.mxu0 %v6044_v61 }
 0xecb   :  { %v6335_v49 = vpop.eup %6334  ;;  %5808 = vmatprep.subr.bf16.mxu0 %v8592_v42  ;;  %5822 = vmatprep.mubr.msk.bf16.mxu0 %vm6395_vm0, %v8592_v42 }
 0xecc   :  { %v3731_v1 = vmul.f32 %v6335_v49, %v8219_v25  ;;  %5802 = vmatprep.mubr.msk.bf16.mxu1 %vm1182_vm4, %v3746_v63  ;;  %v6048_v25 = vld [vmem:[%s8567_s8 + $0x60] sm:$0xff]   ;;  %4574 = vmatprep.subr.bf16.mxu1 %v6054_v28 }
 0xece   :  { %v3747_v37 = vpack.c.bf16 %v3731_v1, %v3731_v1  ;;  %5809 = vmatpush3.bf16.msra.mxu0 %v6045_v58 }
 0xecf   :  { %5810 = vmatprep.subr.bf16.mxu0 %v8592_v42 }
 0xed1   :  { %5803 = vmatmul.mubr.msk.bf16.vlgmr.msra.gmra.mrb[84].mxu1 %vm1182_vm4, %v3747_v37 }
 0xed2   :  { %5811 = vmatpush3.bf16.msra.mxu0 %v6046_v3  ;;  %4606 = vmatprep.mubr.bf16.mxu1 %v8593_v0 }
 0xed3   :  { %5812 = vmatprep.subr.bf16.mxu0 %v8592_v42 }
 0xed6   :  { %5813 = vmatpush3.bf16.msra.mxu0 %v6047_v47 }
 0xed7   :  { %5814 = vmatprep.subr.bf16.mxu0 %v8592_v42 }
 0xeda   :  { %5815 = vmatpush3.bf16.msra.mxu0 %v6048_v25 }
 0xedb   :  { %5816 = vmatprep.subr.bf16.mxu0 %v8592_v42 }
 0xede   :  { %5817 = vmatpush3.bf16.msra.mxu0 %v6049_v39 }
 0xedf   :  { %5818 = vmatprep.subr.bf16.mxu0 %v8592_v42 }
 0xee2   :  { %5819 = vmatpush3.bf16.msra.mxu0 %v6050_v56 }
 0xee3   :  { %5820 = vmatprep.subr.bf16.mxu0 %v8592_v42 }
 0xee6   :  { %5821 = vmatpush3.bf16.msra.mxu0 %v6051_v59 }
 0xee7   :  { %5834 = vmatprep.subr.bf16.mxu0 %v8592_v42 }
 0xf9c   :  { %v5772_v55 = vpop.f32.mrb[84].mxu0 }
 0xf9d   :  { %v3962_v32 = vpop.f32.mrb[85].mxu0 }
 0xf9e   :  { %v5773_v29 = vpop.f32.mrb[86].mxu0 }
 0xf9f   :  { %v3965_v9 = vpop.f32.mrb[87].mxu0 }
 0xfa0   :  { %v4222_v18 = vpack.c.bf16 %v3965_v9, %v3962_v32 }
 0xfa2   :  { %5823 = vmatmul.mubr.bf16.vlgmr.msra.gmra.mrb[88].mxu0 %v4222_v18 }
 0xfa3   :  { %5826 = vmatprep.mubr.msk.bf16.mxu0 %vm6395_vm0, %v8592_v42 }
 0xfa4   :  { %v5804_v5 = vpop.f32.mrb[84].mxu1 }
 0xfa5   :  { %v4190_v22 = vpop.f32.mrb[85].mxu1 }
 0xfa6   :  { %v4223_v15 = vpack.c.bf16 %v4190_v22, %v5772_v55  ;;  %v5805_v51 = vpop.f32.mrb[86].mxu1 }
 0xfa7   :  { %v4193_v52 = vpop.f32.mrb[87].mxu1 }
 0xfa8   :  { %v4224_v19 = vpack.c.bf16 %v5804_v5, %v4193_v52 }
 0xfaa   :  { %5827 = vmatmul.mubr.bf16.gmra.mrb[92].mxu0 %v4223_v15 }
 0xfab   :  { %5830 = vmatprep.mubr.msk.bf16.mxu0 %vm6395_vm0, %v8592_v42 }
 0xfb2   :  { %5831 = vmatmul.mubr.bf16.gmra.mrb[96].mxu0 %v4224_v19 }
 0xfb3   :  { %5850 = vmatprep.mubr.msk.bf16.mxu0 %vm6395_vm0, %v8592_v42 }
0x1075   :  { %v4332_v8 = vpop.f32.mrb[88].mxu0 }
0x1076   :  { %v4333_v57 = vadd.f32 %v5125_v34, %v4332_v8  ;;  %v5824_v46 = vpop.f32.mrb[89].mxu0  ;;  %v6060_v8 = vld [vmem:[%s8569_s12 + $0xa4] ss:$8 sps:$4 sm:$0xff]  }
0x1077   :  { %v4335_v26 = vpop.f32.mrb[90].mxu0  ;;  %v6061_v46 = vld [vmem:[%s8569_s12 + $0xb0] ss:$8 sps:$4 sm:$0xff]  }
0x1078   :  { %v8347_v11 = vadd.f32 %v4333_v57, %v7548_v6  ;;  %v4336_v4 = vadd.f32 %v5125_v34, %v4335_v26  ;;  %v5825_v10 = vpop.f32.mrb[91].mxu0  ;;  %v6063_v57 = vld [vmem:[%s8569_s12 + $0xb4] ss:$8 sps:$4 sm:$0xff]   ;;  %v6066_v26 = vld [vmem:[%s8569_s12 + $0xc4] ss:$8 sps:$4 sm:$0xff]  }
0x1079   :  { %v6069_v10 = vld [vmem:[%s8569_s12 + $0xd4] ss:$8 sps:$4 sm:$0xff]  }
0x107a   :  { %v8350_v43 = vadd.f32 %v4336_v4, %v7551_v45  ;;  %4365 = vadd.xlane.f32.xlu0 %v8347_v11  ;;  %v6064_v4 = vld [vmem:[%s8569_s12 + $0xc0] ss:$8 sps:$4 sm:$0xff]  }
0x107c   :  { %4367 = vadd.xlane.f32.xlu1 %v8350_v43 }
0x107d   :  { %v4340_v16 = vpop.f32.mrb[92].mxu0 }
0x107e   :  { %v4341_v12 = vadd.f32 %v5125_v34, %v4340_v16  ;;  %v5828_v21 = vpop.f32.mrb[93].mxu0  ;;  %v6067_v16 = vld [vmem:[%s8569_s12 + $0xd0] ss:$8 sps:$4 sm:$0xff]  }
0x107f   :  { %v4343_v33 = vpop.f32.mrb[94].mxu0  ;;  %v6070_v21 = vld [vmem:[%s8569_s12 + $0xe0] ss:$8 sps:$4 sm:$0xff]  }
0x1080   :  { %v8355_v23 = vadd.f32 %v4341_v12, %v7556_v30  ;;  %v4344_v48 = vadd.f32 %v5125_v34, %v4343_v33  ;;  %v5829_v14 = vpop.f32.mrb[95].mxu0  ;;  %v6072_v12 = vld [vmem:[%s8569_s12 + $0xe4] ss:$8 sps:$4 sm:$0xff]   ;;  %v6075_v33 = vld [vmem:[%s8569_s12 + $0xf4] ss:$8 sps:$4 sm:$0xff]  }
0x1082   :  { %v8358_v6 = vadd.f32 %v4344_v48, %v7559_v36  ;;  %4369 = vadd.xlane.f32.xlu0 %v8355_v23  ;;  %v6052_v36 = vld [vmem:[%s8569_s12 + $0x80] ss:$8 sps:$4 sm:$0xff]   ;;  %v6073_v48 = vld [vmem:[%s8569_s12 + $0xf0] ss:$8 sps:$4 sm:$0xff]  }
0x1083   :  { %4575 = vmatpush1.bf16.msra.mxu1 %v6052_v36 }
0x1084   :  { %4371 = vadd.xlane.f32.xlu1 %v8358_v6 }
0x1085   :  { %v4348_v45 = vpop.f32.mrb[96].mxu0 }
0x1086   :  { %v4349_v41 = vadd.f32 %v5125_v34, %v4348_v45  ;;  %v5832_v50 = vpop.f32.mrb[97].mxu0 }
0x1087   :  { %v4351_v40 = vpop.f32.mrb[98].mxu0 }
0x1088   :  { %v8363_v44 = vadd.f32 %v4349_v41, %v7564_v35  ;;  %v4352_v31 = vadd.f32 %v5125_v34, %v4351_v40  ;;  %v5833_v17 = vpop.f32.mrb[99].mxu0  ;;  %v6057_v35 = vld [vmem:[%s8569_s12 + $0x94] ss:$8 sps:$4 sm:$0xff]   ;;  %v6058_v34 = vld [vmem:[%s8569_s12 + $0xa0] ss:$8 sps:$4 sm:$0xff]  }
0x1089   :  { %4576 = vmatprep.subr.bf16.mxu1 %v6057_v35 }
0x108a   :  { %v8366_v30 = vadd.f32 %v4352_v31, %v7567_v13  ;;  %4373 = vadd.xlane.f32.xlu0 %v8363_v44  ;;  %v6055_v13 = vld [vmem:[%s8569_s12 + $0x90] ss:$8 sps:$4 sm:$0xff]  }
0x108b   :  { %4577 = vmatpush1.bf16.msra.mxu1 %v6055_v13 }
0x108c   :  { %4375 = vadd.xlane.f32.xlu1 %v8366_v30  ;;  %4578 = vmatprep.subr.bf16.mxu1 %v6060_v8 }
0x108f   :  { %4579 = vmatpush1.bf16.msra.mxu1 %v6058_v34 }
0x1090   :  { %4580 = vmatprep.subr.bf16.mxu1 %v6063_v57 }
0x1093   :  { %4581 = vmatpush1.bf16.msra.mxu1 %v6061_v46 }
0x1094   :  { %4582 = vmatprep.subr.bf16.mxu1 %v6066_v26 }
0x1097   :  { %4583 = vmatpush1.bf16.msra.mxu1 %v6064_v4 }
0x1098   :  { %4584 = vmatprep.subr.bf16.mxu1 %v6069_v10 }
0x109b   :  { %4585 = vmatpush1.bf16.msra.mxu1 %v6067_v16 }
0x109c   :  { %4586 = vmatprep.subr.bf16.mxu1 %v6072_v12  ;;  %v6076_v12 = vld [vmem:[%s8572_s14 + $0x40] sm:$0xff]  }
0x109d   :  { %5835 = vmatpush3.bf16.msra.mxu0 %v6076_v12 }
0x109e   :  { %5836 = vmatprep.subr.bf16.mxu0 %v8592_v42 }
0x109f   :  { %4587 = vmatpush1.bf16.msra.mxu1 %v6070_v21  ;;  %v6080_v21 = vld [vmem:[%s8572_s14 + $0x60] sm:$0xff]  }
0x10a0   :  { %4588 = vmatprep.subr.bf16.mxu1 %v6075_v33  ;;  %v6081_v33 = vld [vmem:[%s8572_s14 + $0x68] sm:$0xff]  }
0x10a3   :  { %4589 = vmatpush1.bf16.msra.mxu1 %v6073_v48  ;;  %v6082_v48 = vld [vmem:[%s8572_s14 + $0x70] sm:$0xff]  }
0x1107   :  { %v4366_v2 = vpop.xlane.xlu0 %4365 }
0x1108   :  { %v4377_v53 = vmul.f32 0.03125, %v4366_v2 }
0x1109   :  { %v4368_v61 = vpop.xlane.xlu1 %4367 }
0x110a   :  { %v4383_v60 = vsub.f32 %v8347_v11, %v4377_v53  ;;  %v4378_v54 = vmul.f32 0.03125, %v4368_v61  ;;  %v5136_v61 = vld [vmem:[%s8570_s10 + $0x1] ss:$0 sm:$0xff] }
0x110c   :  { %v8385_v20 = vsel %vm62_vm1, %v4383_v60, 0.0  ;;  %v4384_v7 = vsub.f32 %v8350_v43, %v4378_v54 }
0x110d   :  { %v4395_v62 = vmul.f32 %v8385_v20, %v8385_v20 }
0x110e   :  { %v8392_v63 = vsel %vm62_vm1, %v4384_v7, 0.0 }
0x110f   :  { %4401 = vadd.xlane.f32.xlu0 %v4395_v62  ;;  %v4370_v58 = vpop.xlane.xlu0 %4369  ;;  %v4396_v49 = vmul.f32 %v8392_v63, %v8392_v63 }
0x1110   :  { %v4379_v1 = vmul.f32 0.03125, %v4370_v58 }
0x1111   :  { %v4372_v37 = vpop.xlane.xlu1 %4371  ;;  %4403 = vadd.xlane.f32.xlu1 %v4396_v49 }
0x1112   :  { %v4385_v3 = vsub.f32 %v8355_v23, %v4379_v1  ;;  %v4380_v47 = vmul.f32 0.03125, %v4372_v37 }
0x1114   :  { %v8399_v25 = vsel %vm62_vm1, %v4385_v3, 0.0  ;;  %v4386_v39 = vsub.f32 %v8358_v6, %v4380_v47  ;;  %v5137_v47 = vld [vmem:[%s8571_s11 + $0x1] ss:$0 sm:$0xff] }
0x1115   :  { %v4397_v56 = vmul.f32 %v8399_v25, %v8399_v25 }
0x1116   :  { %v8406_v59 = vsel %vm62_vm1, %v4386_v39, 0.0 }
0x1117   :  { %4405 = vadd.xlane.f32.xlu0 %v4397_v56  ;;  %v4374_v55 = vpop.xlane.xlu0 %4373  ;;  %v4398_v32 = vmul.f32 %v8406_v59, %v8406_v59 }
0x1118   :  { %v4381_v29 = vmul.f32 0.03125, %v4374_v55 }
0x1119   :  { %4407 = vadd.xlane.f32.xlu1 %v4398_v32  ;;  %v4376_v9 = vpop.xlane.xlu1 %4375 }
0x111a   :  { %v4387_v18 = vsub.f32 %v8363_v44, %v4381_v29  ;;  %v4382_v5 = vmul.f32 0.03125, %v4376_v9 }
0x111c   :  { %v8413_v22 = vsel %vm62_vm1, %v4387_v18, 0.0  ;;  %v4388_v15 = vsub.f32 %v8366_v30, %v4382_v5 }
0x111d   :  { %v4399_v51 = vmul.f32 %v8413_v22, %v8413_v22 }
0x111e   :  { %v8420_v52 = vsel %vm62_vm1, %v4388_v15, 0.0 }
0x111f   :  { %4409 = vadd.xlane.f32.xlu0 %v4399_v51  ;;  %v4400_v19 = vmul.f32 %v8420_v52, %v8420_v52 }
0x1121   :  { %4411 = vadd.xlane.f32.xlu1 %v4400_v19 }
0x119c   :  { %v4402_v14 = vpop.xlane.xlu0 %4401 }
0x119d   :  { %v4413_v45 = vmul.f32 0.03125, %v4402_v14  ;;  %v6083_v14 = vld [vmem:[%s8572_s14 + $0x78] sm:$0xff]  }
0x119e   :  { %v4404_v41 = vpop.xlane.xlu1 %4403 }
0x119f   :  { %v4419_v50 = vadd.f32 1e-06, %v4413_v45  ;;  %v4414_v40 = vmul.f32 0.03125, %v4404_v41  ;;  %v5154_v45 = vld [vmem:[%s8573_s13 + $0x2] sm:$0x3] }
0x11a0   :  { %v4487_v41 = vrot.slane %v5154_v45, %v6717_v24 }
0x11a1   :  { %6336 = vrsqrt.f32 %v4419_v50  ;;  %v4420_v31 = vadd.f32 1e-06, %v4414_v40 }
0x11a3   :  { %6338 = vrsqrt.f32 %v4420_v31 }
0x11a4   :  { %v4406_v17 = vpop.xlane.xlu0 %4405 }
0x11a5   :  { %v4415_v36 = vmul.f32 0.03125, %v4406_v17 }
0x11a6   :  { %v4408_v28 = vpop.xlane.xlu1 %4407 }
0x11a7   :  { %v4421_v35 = vadd.f32 1e-06, %v4415_v36  ;;  %v4416_v13 = vmul.f32 0.03125, %v4408_v28 }
0x11a9   :  { %6340 = vrsqrt.f32 %v4421_v35  ;;  %v4422_v2 = vadd.f32 1e-06, %v4416_v13 }
0x11ab   :  { %v6337_v53 = vpop.eup %6336  ;;  %6342 = vrsqrt.f32 %v4422_v2 }
0x11ac   :  { %v4431_v60 = vmul.f32 %v6337_v53, %v8385_v20  ;;  %v4410_v54 = vpop.xlane.xlu0 %4409 }
0x11ad   :  { %v6339_v7 = vpop.eup %6338  ;;  %v4417_v62 = vmul.f32 0.03125, %v4410_v54 }
0x11ae   :  { %v4432_v58 = vmul.f32 %v6339_v7, %v8392_v63  ;;  %v4412_v49 = vpop.xlane.xlu1 %4411  ;;  %v4443_v1 = vmul.f32 %v5136_v61, %v4431_v60 }
0x11af   :  { %v4423_v37 = vadd.f32 1e-06, %v4417_v62  ;;  %v4418_v3 = vmul.f32 0.03125, %v4412_v49 }
0x11b0   :  { %v4444_v39 = vmul.f32 %v5136_v61, %v4432_v58  ;;  %v4455_v55 = vadd.f32 %v5137_v47, %v4443_v1 }
0x11b1   :  { %6344 = vrsqrt.f32 %v4423_v37  ;;  %v4424_v56 = vadd.f32 1e-06, %v4418_v3 }
0x11b2   :  { %v4456_v32 = vadd.f32 %v5137_v47, %v4444_v39 }
0x11b3   :  { %v6341_v29 = vpop.eup %6340  ;;  %6346 = vrsqrt.f32 %v4424_v56 }
0x11b4   :  { %v4461_v20 = vpack.c.bf16 %v4456_v32, %v4455_v55  ;;  %v4433_v9 = vmul.f32 %v6341_v29, %v8399_v25 }
0x11b5   :  { %v6343_v18 = vpop.eup %6342 }
0x11b6   :  { %4607 = vmatmul.mubr.bf16.vlgmr.msra.gmra.mrb[88].mxu1 %v4461_v20  ;;  %v4434_v63 = vmul.f32 %v6343_v18, %v8406_v59  ;;  %v4445_v5 = vmul.f32 %v5136_v61, %v4433_v9 }
0x11b7   :  { %4616 = vmatprep.mubr.bf16.mxu1 %v8593_v0 }
0x11b8   :  { %v4446_v15 = vmul.f32 %v5136_v61, %v4434_v63  ;;  %v4457_v51 = vadd.f32 %v5137_v47, %v4445_v5  ;;  %v4491_v5 = vrot.slane %v5154_v45, %v6724_v27 }
0x11ba   :  { %v4458_v19 = vadd.f32 %v5137_v47, %v4446_v15 }
0x11bb   :  { %v6345_v34 = vpop.eup %6344 }
0x11bc   :  { %v4462_v8 = vpack.c.bf16 %v4458_v19, %v4457_v51  ;;  %v4435_v57 = vmul.f32 %v6345_v34, %v8413_v22  ;;  %v6077_v22 = vld [vmem:[%s8572_s14 + $0x48] sm:$0xff]  }
0x11bd   :  { %v6347_v46 = vpop.eup %6346  ;;  %5837 = vmatpush3.bf16.msra.mxu0 %v6077_v22 }
0x11be   :  { %4617 = vmatmul.mubr.bf16.gmra.mrb[92].mxu1 %v4462_v8  ;;  %v4436_v26 = vmul.f32 %v6347_v46, %v8420_v52  ;;  %v4447_v4 = vmul.f32 %v5136_v61, %v4435_v57  ;;  %5838 = vmatprep.subr.bf16.mxu0 %v8592_v42  ;;  %v6079_v52 = vld [vmem:[%s8572_s14 + $0x58] sm:$0xff]  }
0x11bf   :  { %4626 = vmatprep.mubr.bf16.mxu1 %v8593_v0  ;;  %v6078_v0 = vld [vmem:[%s8572_s14 + $0x50] sm:$0xff]  }
0x11c0   :  { %v4448_v25 = vmul.f32 %v5136_v61, %v4436_v26  ;;  %v4459_v10 = vadd.f32 %v5137_v47, %v4447_v4 }
0x11c1   :  { %5839 = vmatpush3.bf16.msra.mxu0 %v6078_v0 }
0x11c2   :  { %v4460_v59 = vadd.f32 %v5137_v47, %v4448_v25  ;;  %5840 = vmatprep.subr.bf16.mxu0 %v8592_v42 }
0x11c4   :  { %v4463_v16 = vpack.c.bf16 %v4460_v59, %v4459_v10 }
0x11c5   :  { %5841 = vmatpush3.bf16.msra.mxu0 %v6079_v52 }
0x11c6   :  { %4627 = vmatmul.mubr.bf16.gmra.mrb[96].mxu1 %v4463_v16  ;;  %5842 = vmatprep.subr.bf16.mxu0 %v8592_v42 }
0x11c9   :  { %5843 = vmatpush3.bf16.msra.mxu0 %v6080_v21 }
0x11ca   :  { %5844 = vmatprep.subr.bf16.mxu0 %v8592_v42 }
0x11cd   :  { %5845 = vmatpush3.bf16.msra.mxu0 %v6081_v33 }
0x11ce   :  { %5846 = vmatprep.subr.bf16.mxu0 %v8592_v42 }
0x11d1   :  { %5847 = vmatpush3.bf16.msra.mxu0 %v6082_v48 }
0x11d2   :  { %5848 = vmatprep.subr.bf16.mxu0 %v8592_v42 }
0x11d5   :  { %5849 = vmatpush3.bf16.msra.mxu0 %v6083_v14 }
0x1289   :  { %v4608_v50 = vpop.f32.mrb[88].mxu1 }
0x128a   :  { %v4609_v40 = vadd.f32 %v4608_v50, %v4487_v41  ;;  %v4610_v31 = vpop.f32.mrb[89].mxu1 }
0x128b   :  { %v4612_v17 = vpop.f32.mrb[90].mxu1  ;;  %v4611_v34 = vadd.f32 %v4610_v31, %v4491_v5 }
0x128c   :  { %v5171_v36 = vmul.f32 -1.442695, %v4609_v40  ;;  %v4613_v28 = vadd.f32 %v4612_v17, %v4487_v41  ;;  %v4614_v35 = vpop.f32.mrb[91].mxu1 }
0x128d   :  { %v4615_v4 = vadd.f32 %v4614_v35, %v4491_v5 }
0x128e   :  { %6348 = vpow2.f32 %v5171_v36  ;;  %v5172_v13 = vmul.f32 -1.442695, %v4613_v28 }
0x1290   :  { %6350 = vpow2.f32 %v5172_v13 }
0x1291   :  { %v4618_v2 = vpop.f32.mrb[92].mxu1 }
0x1292   :  { %v4619_v53 = vadd.f32 %v4618_v2, %v4487_v41  ;;  %v4620_v61 = vpop.f32.mrb[93].mxu1  ;;  %v5194_v2 = vld [vmem:[%s8574_s15 + $0x1] ss:$0 sm:$0xff] }
0x1293   :  { %v4622_v60 = vpop.f32.mrb[94].mxu1  ;;  %v4621_v0 = vadd.f32 %v4620_v61, %v4491_v5 }
0x1294   :  { %v5173_v54 = vmul.f32 -1.442695, %v4619_v53  ;;  %v4623_v7 = vadd.f32 %v4622_v60, %v4487_v41  ;;  %v4624_v62 = vpop.f32.mrb[95].mxu1 }
0x1295   :  { %v4625_v48 = vadd.f32 %v4624_v62, %v4491_v5 }
0x1296   :  { %6352 = vpow2.f32 %v5173_v54  ;;  %v5174_v58 = vmul.f32 -1.442695, %v4623_v7 }
0x1298   :  { %v6349_v24 = vpop.eup %6348  ;;  %6354 = vpow2.f32 %v5174_v58 }
0x1299   :  { %v4655_v49 = vadd.f32 1.0, %v6349_v24  ;;  %v4628_v1 = vpop.f32.mrb[96].mxu1 }
0x129a   :  { %v6351_v37 = vpop.eup %6350  ;;  %v4629_v3 = vadd.f32 %v4628_v1, %v4487_v41  ;;  %v4630_v47 = vpop.f32.mrb[97].mxu1 }
0x129b   :  { %6356 = vrcp.f32 %v4655_v49  ;;  %v4656_v39 = vadd.f32 1.0, %v6351_v37  ;;  %v4632_v56 = vpop.f32.mrb[98].mxu1 }
0x129c   :  { %v5175_v55 = vmul.f32 -1.442695, %v4629_v3  ;;  %v4633_v32 = vadd.f32 %v4632_v56, %v4487_v41  ;;  %v4634_v29 = vpop.f32.mrb[99].mxu1 }
0x129d   :  { %6358 = vrcp.f32 %v4656_v39 }
0x129e   :  { %6360 = vpow2.f32 %v5175_v55  ;;  %v5176_v20 = vmul.f32 -1.442695, %v4633_v32 }
0x12a0   :  { %v6353_v9 = vpop.eup %6352  ;;  %6362 = vpow2.f32 %v5176_v20 }
0x12a1   :  { %v4657_v18 = vadd.f32 1.0, %v6353_v9 }
0x12a2   :  { %v6355_v63 = vpop.eup %6354 }
0x12a3   :  { %6364 = vrcp.f32 %v4657_v18  ;;  %v4658_v15 = vadd.f32 1.0, %v6355_v63 }
0x12a5   :  { %v6357_v51 = vpop.eup %6356  ;;  %6366 = vrcp.f32 %v4658_v15 }
0x12a6   :  { %v4673_v19 = vmul.f32 %v6357_v51, %v4609_v40  ;;  %v4631_v40 = vadd.f32 %v4630_v47, %v4491_v5 }
0x12a7   :  { %v6359_v8 = vpop.eup %6358 }
0x12a8   :  { %v6361_v57 = vpop.eup %6360  ;;  %v4679_v46 = vmul.f32 %v4673_v19, %v4611_v34  ;;  %v4674_v26 = vmul.f32 %v6359_v8, %v4613_v28  ;;  %v4635_v28 = vadd.f32 %v4634_v29, %v4491_v5 }
0x12a9   :  { %v4659_v25 = vadd.f32 1.0, %v6361_v57 }
0x12aa   :  { %v6363_v10 = vpop.eup %6362  ;;  %v4680_v59 = vmul.f32 %v4674_v26, %v4615_v4 }
0x12ab   :  { %6368 = vrcp.f32 %v4659_v25  ;;  %v4660_v16 = vadd.f32 1.0, %v6363_v10 }
0x12ac   :  { %v4685_v12 = vpack.c.bf16 %v4680_v59, %v4679_v46 }
0x12ad   :  { %v6365_v22 = vpop.eup %6364  ;;  %6370 = vrcp.f32 %v4660_v16 }
0x12ae   :  { %v4675_v27 = vmul.f32 %v6365_v22, %v4619_v53  ;;  %5851 = vmatmul.mubr.bf16.vlgmr.msra.gmra.mrb[100].mxu0 %v4685_v12 }
0x12af   :  { %v6367_v52 = vpop.eup %6366  ;;  %5854 = vmatprep.mubr.msk.bf16.mxu0 %vm6395_vm0, %v8592_v42 }
0x12b0   :  { %v4681_v21 = vmul.f32 %v4675_v27, %v4621_v0  ;;  %v4676_v33 = vmul.f32 %v6367_v52, %v4623_v7 }
0x12b2   :  { %v4682_v14 = vmul.f32 %v4676_v33, %v4625_v48 }
0x12b4   :  { %v4686_v45 = vpack.c.bf16 %v4682_v14, %v4681_v21 }
0x12b5   :  { %v6369_v41 = vpop.eup %6368 }
0x12b6   :  { %v4677_v50 = vmul.f32 %v6369_v41, %v4629_v3  ;;  %5855 = vmatmul.mubr.bf16.gmra.mrb[104].mxu0 %v4686_v45 }
0x12b7   :  { %v6371_v31 = vpop.eup %6370  ;;  %5858 = vmatprep.mubr.msk.bf16.mxu0 %vm6395_vm0, %v8592_v42 }
0x12b8   :  { %v4683_v17 = vmul.f32 %v4677_v50, %v4631_v40  ;;  %v4678_v36 = vmul.f32 %v6371_v31, %v4633_v32 }
0x12ba   :  { %v4684_v35 = vmul.f32 %v4678_v36, %v4635_v28 }
0x12bc   :  { %v4687_v13 = vpack.c.bf16 %v4684_v35, %v4683_v17 }
0x12be   :  { %5859 = vmatmul.mubr.bf16.gmra.mrb[108].mxu0 %v4687_v13 }
0x1381   :  { %v4795_v53 = vpop.f32.mrb[100].mxu0 }
0x1382   :  { %v4796_v61 = vadd.f32 %v5194_v2, %v4795_v53  ;;  %v5852_v60 = vpop.f32.mrb[101].mxu0 }
0x1383   :  { %v4798_v54 = vpop.f32.mrb[102].mxu0 }
0x1384   :  { %v4818_v7 = vadd.f32 %v4796_v61, %v8347_v11  ;;  %v4799_v62 = vadd.f32 %v5194_v2, %v4798_v54  ;;  %v5853_v58 = vpop.f32.mrb[103].mxu0  ;;  %v5203_v54 = vld [vmem:[%s8575_s16] ss:$0 sm:$0xff] }
0x1386   :  { %v4819_v42 = vadd.f32 %v4799_v62, %v8350_v43  ;;  %4826 = vadd.xlane.f32.xlu0 %v4818_v7 }
0x1388   :  { %4828 = vadd.xlane.f32.xlu1 %v4819_v42 }
0x1389   :  { %v4803_v24 = vpop.f32.mrb[104].mxu0 }
0x138a   :  { %v4804_v49 = vadd.f32 %v5194_v2, %v4803_v24  ;;  %v5856_v1 = vpop.f32.mrb[105].mxu0 }
0x138b   :  { %v4806_v37 = vpop.f32.mrb[106].mxu0 }
0x138c   :  { %v4820_v3 = vadd.f32 %v4804_v49, %v8355_v23  ;;  %v4807_v47 = vadd.f32 %v5194_v2, %v4806_v37  ;;  %v5857_v39 = vpop.f32.mrb[107].mxu0 }
0x138e   :  { %v4821_v56 = vadd.f32 %v4807_v47, %v8358_v6  ;;  %4830 = vadd.xlane.f32.xlu0 %v4820_v3 }
0x1390   :  { %4832 = vadd.xlane.f32.xlu1 %v4821_v56 }
0x1391   :  { %v4811_v55 = vpop.f32.mrb[108].mxu0 }
0x1392   :  { %v4812_v11 = vadd.f32 %v5194_v2, %v4811_v55  ;;  %v5860_v32 = vpop.f32.mrb[109].mxu0 }
0x1393   :  { %v4814_v29 = vpop.f32.mrb[110].mxu0 }
0x1394   :  { %v4822_v43 = vadd.f32 %v4812_v11, %v8363_v44  ;;  %v4815_v20 = vadd.f32 %v5194_v2, %v4814_v29  ;;  %v5861_v9 = vpop.f32.mrb[111].mxu0 }
0x1396   :  { %v4823_v18 = vadd.f32 %v4815_v20, %v8366_v30  ;;  %4834 = vadd.xlane.f32.xlu0 %v4822_v43 }
0x1398   :  { %4836 = vadd.xlane.f32.xlu1 %v4823_v18 }
0x1413   :  { %v4827_v63 = vpop.xlane.xlu0 %4826 }
0x1414   :  { %v4838_v23 = vmul.f32 0.03125, %v4827_v63 }
0x1415   :  { %v4829_v5 = vpop.xlane.xlu1 %4828 }
0x1416   :  { %v4844_v15 = vsub.f32 %v4818_v7, %v4838_v23  ;;  %v4839_v51 = vmul.f32 0.03125, %v4829_v5 }
0x1418   :  { %v4850_v6 = vsel %vm62_vm1, %v4844_v15, 0.0  ;;  %v4845_v19 = vsub.f32 %v4819_v42, %v4839_v51  ;;  %v5204_v42 = vld [vmem:[%s8576_s17] ss:$0 sm:$0xff] }
0x1419   :  { %v4856_v34 = vmul.f32 %v4850_v6, %v4850_v6 }
0x141a   :  { %v4851_v8 = vsel %vm62_vm1, %v4845_v19, 0.0 }
0x141b   :  { %4862 = vadd.xlane.f32.xlu0 %v4856_v34  ;;  %v4831_v44 = vpop.xlane.xlu0 %4830  ;;  %v4857_v57 = vmul.f32 %v4851_v8, %v4851_v8 }
0x141c   :  { %v4840_v46 = vmul.f32 0.03125, %v4831_v44 }
0x141d   :  { %v4833_v30 = vpop.xlane.xlu1 %4832  ;;  %4864 = vadd.xlane.f32.xlu1 %v4857_v57 }
0x141e   :  { %v4846_v26 = vsub.f32 %v4820_v3, %v4840_v46  ;;  %v4841_v4 = vmul.f32 0.03125, %v4833_v30 }
0x1420   :  { %v4852_v25 = vsel %vm62_vm1, %v4846_v26, 0.0  ;;  %v4847_v10 = vsub.f32 %v4821_v56, %v4841_v4 }
0x1421   :  { %v4858_v59 = vmul.f32 %v4852_v25, %v4852_v25 }
0x1422   :  { %v4853_v16 = vsel %vm62_vm1, %v4847_v10, 0.0 }
0x1423   :  { %4866 = vadd.xlane.f32.xlu0 %v4858_v59  ;;  %v4835_v12 = vpop.xlane.xlu0 %4834  ;;  %v4859_v22 = vmul.f32 %v4853_v16, %v4853_v16 }
0x1424   :  { %v4842_v27 = vmul.f32 0.03125, %v4835_v12 }
0x1425   :  { %4868 = vadd.xlane.f32.xlu1 %v4859_v22  ;;  %v4837_v0 = vpop.xlane.xlu1 %4836 }
0x1426   :  { %v4848_v52 = vsub.f32 %v4822_v43, %v4842_v27  ;;  %v4843_v21 = vmul.f32 0.03125, %v4837_v0 }
0x1428   :  { %v4854_v33 = vsel %vm62_vm1, %v4848_v52, 0.0  ;;  %v4849_v48 = vsub.f32 %v4823_v18, %v4843_v21 }
0x1429   :  { %v4860_v14 = vmul.f32 %v4854_v33, %v4854_v33 }
0x142a   :  { %v4855_v45 = vsel %vm62_vm1, %v4849_v48, 0.0 }
0x142b   :  { %4870 = vadd.xlane.f32.xlu0 %v4860_v14  ;;  %v4861_v41 = vmul.f32 %v4855_v45, %v4855_v45 }
0x142d   :  { %4872 = vadd.xlane.f32.xlu1 %v4861_v41 }
0x14a8   :  { %v4863_v50 = vpop.xlane.xlu0 %4862 }
0x14a9   :  { %v4874_v40 = vmul.f32 0.03125, %v4863_v50 }
0x14aa   :  { %v4865_v31 = vpop.xlane.xlu1 %4864 }
0x14ab   :  { %v4880_v17 = vadd.f32 1e-06, %v4874_v40  ;;  %v4875_v36 = vmul.f32 0.03125, %v4865_v31 }
0x14ad   :  { %6372 = vrsqrt.f32 %v4880_v17  ;;  %v4881_v28 = vadd.f32 1e-06, %v4875_v36 }
0x14af   :  { %6374 = vrsqrt.f32 %v4881_v28 }
0x14b0   :  { %v4867_v35 = vpop.xlane.xlu0 %4866 }
0x14b1   :  { %v4876_v13 = vmul.f32 0.03125, %v4867_v35 }
0x14b2   :  { %v4869_v2 = vpop.xlane.xlu1 %4868 }
0x14b3   :  { %v4882_v53 = vadd.f32 1e-06, %v4876_v13  ;;  %v4877_v61 = vmul.f32 0.03125, %v4869_v2 }
0x14b5   :  { %6376 = vrsqrt.f32 %v4882_v53  ;;  %v4883_v60 = vadd.f32 1e-06, %v4877_v61 }
0x14b7   :  { %v6373_v38 = vpop.eup %6372  ;;  %6378 = vrsqrt.f32 %v4883_v60 }
0x14b8   :  { %v4892_v7 = vmul.f32 %v6373_v38, %v4850_v6  ;;  %v4871_v62 = vpop.xlane.xlu0 %4870 }
0x14b9   :  { %v6375_v58 = vpop.eup %6374  ;;  %v4878_v24 = vmul.f32 0.03125, %v4871_v62 }
0x14ba   :  { %v4904_v49 = vmul.f32 %v5203_v54, %v4892_v7  ;;  %v4893_v1 = vmul.f32 %v6375_v58, %v4851_v8  ;;  %v4873_v37 = vpop.xlane.xlu1 %4872 }
0x14bb   :  { %v4884_v3 = vadd.f32 1e-06, %v4878_v24  ;;  %v4879_v47 = vmul.f32 0.03125, %v4873_v37 }
0x14bc   :  { %v4916_v39 = vadd.f32 %v5204_v42, %v4904_v49  ;;  %v4905_v56 = vmul.f32 %v5203_v54, %v4893_v1 }
0x14bd   :  { %6380 = vrsqrt.f32 %v4884_v3  ;;  %v4885_v55 = vadd.f32 1e-06, %v4879_v47 }
0x14be   :  { %4922 = vst [vmem:[%s8577_s18] sm:$0xff] %v4916_v39  ;;  %v4917_v11 = vadd.f32 %v5204_v42, %v4905_v56 }
0x14bf   :  { %v6377_v32 = vpop.eup %6376  ;;  %6382 = vrsqrt.f32 %v4885_v55 }
0x14c0   :  { %4923 = vst [vmem:[%s8577_s18 + $0x8] sm:$0xff] %v4917_v11  ;;  %v4894_v29 = vmul.f32 %v6377_v32, %v4852_v25 }
0x14c1   :  { %v6379_v43 = vpop.eup %6378 }
0x14c2   :  { %v4906_v20 = vmul.f32 %v5203_v54, %v4894_v29  ;;  %v4895_v9 = vmul.f32 %v6379_v43, %v4853_v16 }
0x14c4   :  { %v4918_v18 = vadd.f32 %v5204_v42, %v4906_v20  ;;  %v4907_v63 = vmul.f32 %v5203_v54, %v4895_v9 }
0x14c6   :  { %4924 = vst [vmem:[%s8577_s18 + $0x10] sm:$0xff] %v4918_v18  ;;  %v4919_v23 = vadd.f32 %v5204_v42, %v4907_v63 }
0x14c7   :  { %v6381_v5 = vpop.eup %6380 }
0x14c8   :  { %4925 = vst [vmem:[%s8577_s18 + $0x18] sm:$0xff] %v4919_v23  ;;  %v4896_v15 = vmul.f32 %v6381_v5, %v4854_v33 }
0x14c9   :  { %v6383_v51 = vpop.eup %6382 }
0x14ca   :  { %v4908_v6 = vmul.f32 %v5203_v54, %v4896_v15  ;;  %v4897_v19 = vmul.f32 %v6383_v51, %v4855_v45 }
0x14cc   :  { %v4920_v34 = vadd.f32 %v5204_v42, %v4908_v6  ;;  %v4909_v8 = vmul.f32 %v5203_v54, %v4897_v19 }
0x14ce   :  { %4926 = vst [vmem:[%s8577_s18 + $0x20] sm:$0xff] %v4920_v34  ;;  %v4921_v44 = vadd.f32 %v5204_v42, %v4909_v8 }
0x14d0   :  { %4927 = vst [vmem:[%s8577_s18 + $0x28] sm:$0xff] %v4921_v44 }

</bundles_post_ra>
